<compile_context>
chip_gen: v6e
topology: v6e:2x2x1
jax: 0.10.0
libtpu: 0.0.40
codegen_flags: <defaults>
</compile_context>

<pallas_src>
import functools
import math

import jax
import jax.numpy as jnp
from jax.experimental import pallas as pl
from jax.experimental.pallas import tpu as pltpu


# ----------------------------------------------------------------------------
# In-kernel helpers
# ----------------------------------------------------------------------------
def _erf(x):
    # Abramowitz & Stegun 7.1.26 rational approximation, |err| < 1.5e-7 (f32-exact
    # for our purposes; matches PyTorch's default exact GELU).
    a1, a2, a3, a4, a5 = 0.254829592, -0.284496736, 1.421413741, -1.453152027, 1.061405429
    p = 0.3275911
    ax = jnp.abs(x)
    t = 1.0 / (1.0 + p * ax)
    poly = ((((a5 * t + a4) * t + a3) * t + a2) * t + a1) * t
    y = 1.0 - poly * jnp.exp(-ax * ax)          # exp -> EUP slot (free next to MXU/VPU work)
    return jnp.where(x < 0, -y, y)


def _res_block_kernel(x_ref, m_ref, gm_ref,
                      w1_ref, b1_ref, g1_ref, bb1_ref,
                      w2_ref, b2_ref, g2_ref, bb2_ref,
                      o_ref, *, W, num_groups):
    """B_TILE samples per grid step, lane-dense (C, HW) layout per sample.

      x_ref  : (B_TILE, C, HW) f32   input block (residual source)
      m_ref  : (9, 1, HW)      f32   per-tap validity masks (zero-padding boundaries)
      gm_ref : (C, C)          f32   group-membership matrix pre-scaled by 1/(cpg*HW)
      w*_ref : (C, 9C)         conv weights, columns ordered tap-major / in-channel-minor
      b*_ref : (C, 1)          conv bias;  g*/bb*: (C,1) GroupNorm gamma / beta
      o_ref  : (B_TILE, C, HW) f32   output block
    """
    b_tile, C, HW = x_ref.shape
    cpg = C // num_groups
    inv_gsz = 1.0 / float(cpg * HW)
    cdt = w1_ref.dtype                                         # conv matmul operand dtype
    prec = jax.lax.Precision.HIGHEST if cdt == jnp.float32 else None

    def conv_gn_gelu(inp, w_ref, b_ref, g_ref, bt_ref):
        # --- 3x3 conv (padding=1) as ONE (C,9C)@(9C,HW) MXU matmul ---
        taps = []
        for dy in (-1, 0, 1):
            for dx in (-1, 0, 1):
                t = (dy + 1) * 3 + (dx + 1)
                s = dy * W + dx                                # flat-index shift
                if s == 0:
                    taps.append(inp)
                else:
                    # want xs[:, p] = inp[:, p + s]  ->  roll by (-s) mod HW (XLU)
                    xs = pltpu.roll(inp, shift=(-s) % HW, axis=1)
                    taps.append(xs * m_ref[t])                 # zero out-of-bounds taps
        stacked = jnp.concatenate(taps, axis=0).astype(cdt)    # (9C, HW), bf16 on MXU
        acc = jnp.dot(w_ref[...], stacked,
                      preferred_element_type=jnp.float32, precision=prec)
        acc = acc + b_ref[...]                                 # (C,1) broadcast over lanes

        # --- GroupNorm(num_groups, C), biased variance, eps=1e-5 ---
        ch_sum = jnp.sum(acc, axis=1, keepdims=True)           # (C,1) lane reduce
        ch_ss = jnp.sum(acc * acc, axis=1, keepdims=True)      # (C,1)
        if cpg == 1:                                           # one channel per group
            mean = ch_sum * inv_gsz
            ex2 = ch_ss * inv_gsz
        else:                                                  # fused group reduce (one dot)
            stats = jnp.concatenate([ch_sum, ch_ss], axis=1)   # (C,2)
            gstats = jnp.dot(gm_ref[...], stats, preferred_element_type=jnp.float32)
            mean = gstats[:, 0:1]
            ex2 = gstats[:, 1:2]
        var = ex2 - mean * mean
        scale = g_ref[...] * jax.lax.rsqrt(var + 1e-5)
        shift = bt_ref[...] - mean * scale
        y = acc * scale + shift

        # --- exact GELU (approximate='none') in f32 ---
        return 0.5 * y * (1.0 + _erf(y * (1.0 / math.sqrt(2.0))))

    for b in range(b_tile):                                    # static unroll over the tile
        x = x_ref[b]                                           # (C, HW) f32
        h = conv_gn_gelu(x, w1_ref, b1_ref, g1_ref, bb1_ref)
        h = conv_gn_gelu(h, w2_ref, b2_ref, g2_ref, bb2_ref)
        o_ref[b] = (x + h).astype(o_ref.dtype)                 # residual add, lane-dense store


# ----------------------------------------------------------------------------
# Host-side preparation
# ----------------------------------------------------------------------------
def _tap_masks(H, W):
    """(9, 1, H*W) f32 validity masks for the 3x3 taps (zero padding at the border)."""
    i = jnp.arange(H * W, dtype=jnp.int32) // W
    j = jnp.arange(H * W, dtype=jnp.int32) % W
    ms = []
    for dy in (-1, 0, 1):
        for dx in (-1, 0, 1):
            valid = (i + dy >= 0) & (i + dy < H) & (j + dx >= 0) & (j + dx < W)
            ms.append(valid.astype(jnp.float32))
    return jnp.stack(ms).reshape(9, 1, H * W)


def _group_matrix(C, num_groups, HW):
    """(C, C) group-membership matrix pre-scaled by 1/(channels_per_group * HW)."""
    cpg = C // num_groups
    gid = jnp.arange(C, dtype=jnp.int32) // cpg
    same = (gid[:, None] == gid[None, :]).astype(jnp.float32)
    return same * (1.0 / float(cpg * HW))


def _prep_params(p, conv_dtype):
    """PyTorch-layout params -> kernel layout: (C, 9C) tap-major weights, column vectors."""
    C = p["w1"].shape[0]
    # w_flat[o, t*C + i] = w[o, i, ky, kx], t = ky*3 + kx  (matches in-kernel tap stacking)
    to_flat = lambda w: jnp.transpose(w, (0, 2, 3, 1)).reshape(C, 9 * C).astype(conv_dtype)
    col = lambda v: v.reshape(C, 1).astype(jnp.float32)
    return dict(
        w1=to_flat(p["w1"]), b1=col(p["b1"]), g1=col(p["g1"]), bb1=col(p["bt1"]),
        w2=to_flat(p["w2"]), b2=col(p["b2"]), g2=col(p["g2"]), bb2=col(p["bt2"]))


def _vmem_budget_bytes():
    """Generation-aware VMEM cap: ~80% of physical (128 MiB v5e/v6e, 64 MiB v7x)."""
    try:
        cap = int(pltpu.get_tpu_info().vmem_capacity_bytes)
    except Exception:
        cap = 64 * 1024 * 1024          # conservative fallback: fits every generation
    return int(cap * 0.8)


def _pick_b_tile(N, C, HW, conv_bytes, vmem_budget, const_bytes):
    """Largest divisor of N (<= 8) whose per-step footprint fits the VMEM budget."""
    # per sample: in+out blocks double-buffered (f32) + stacked 9C tap operand + f32 temps
    per_sample = C * HW * (4 * 4 + 9 * conv_bytes + 4 * 4)
    avail = max(0, vmem_budget // 2 - 2 * const_bytes)
    cap = int(max(1, min(8, N, avail // max(per_sample, 1))))
    bt = 1
    for d in range(1, cap + 1):
        if N % d == 0:
            bt = d
    return bt


def _const_spec(shape, single_buffer):
    """BlockSpec for a constant (grid-invariant) operand; single-buffered when supported."""
    nd = len(shape)
    idx = lambda g: (0,) * nd
    if single_buffer and hasattr(pl, "Buffered"):
        try:
            return pl.BlockSpec(shape, idx, pipeline_mode=pl.Buffered(buffer_count=1))
        except Exception:
            pass
    return pl.BlockSpec(shape, idx)


def res_block_forward(params, x_nchw, conv_dtype=jnp.bfloat16, single_buffer_consts=True):
    """x_nchw: (N, C, H, W) float32 -> (N, C, H, W).  Single fused pallas_call."""
    N, C, H, W = x_nchw.shape
    HW = H * W
    num_groups = min(32, C)
    assert C % num_groups == 0

    kp = _prep_params(params, conv_dtype)
    masks = _tap_masks(H, W)
    gm = _group_matrix(C, num_groups, HW)
    # NCHW already has channels-major / spatial-minor, so (N, C, HW) is a pure reshape
    # and gives the lane-dense (C on sublanes, HW on lanes) kernel layout.
    x2 = x_nchw.reshape(N, C, HW).astype(jnp.float32)

    conv_bytes = jnp.dtype(conv_dtype).itemsize
    vmem_budget = _vmem_budget_bytes()
    const_bytes = (2 * 9 * C * C) * conv_bytes + (9 * HW + C * C + 8 * C) * 4
    b_tile = _pick_b_tile(N, C, HW, conv_bytes, vmem_budget, const_bytes)

    kernel = functools.partial(_res_block_kernel, W=W, num_groups=num_groups)
    csp = lambda shape: _const_spec(shape, single_buffer_consts)

    out = pl.pallas_call(
        kernel,
        out_shape=jax.ShapeDtypeStruct((N, C, HW), jnp.float32),
        grid=(N // b_tile,),
        in_specs=[
            pl.BlockSpec((b_tile, C, HW), lambda g: (g, 0, 0)),   # x block (B_TILE samples)
            csp((9, 1, HW)),                                      # tap boundary masks
            csp((C, C)),                                          # pre-scaled group matrix
            csp((C, 9 * C)), csp((C, 1)), csp((C, 1)), csp((C, 1)),   # conv1 / GN1
            csp((C, 9 * C)), csp((C, 1)), csp((C, 1)), csp((C, 1)),   # conv2 / GN2
        ],
        out_specs=pl.BlockSpec((b_tile, C, HW), lambda g: (g, 0, 0)),
        compiler_params=pltpu.CompilerParams(
            dimension_semantics=("parallel",),        # batch blocks split across TCs (v7x)
            vmem_limit_bytes=vmem_budget,
        ),
    )(x2, masks, gm,
      kp["w1"], kp["b1"], kp["g1"], kp["bb1"],
      kp["w2"], kp["b2"], kp["g2"], kp["bb2"])
    return out.reshape(N, C, H, W)


# ----------------------------------------------------------------------------
# Deterministic parameter init (PyTorch layouts) and pure-JAX references
# ----------------------------------------------------------------------------
def init_res_block(key, C):
    ks = jax.random.split(key, 8)
    fan_in = 9 * C
    w1 = jax.random.normal(ks[0], (C, C, 3, 3), jnp.float32) / math.sqrt(fan_in)
    b1 = 0.05 * jax.random.normal(ks[1], (C,), jnp.float32)
    w2 = jax.random.normal(ks[2], (C, C, 3, 3), jnp.float32) / math.sqrt(fan_in)
    b2 = 0.05 * jax.random.normal(ks[3], (C,), jnp.float32)
    g1 = 1.0 + 0.1 * jax.random.normal(ks[4], (C,), jnp.float32)
    bt1 = 0.1 * jax.random.normal(ks[5], (C,), jnp.float32)
    g2 = 1.0 + 0.1 * jax.random.normal(ks[6], (C,), jnp.float32)
    bt2 = 0.1 * jax.random.normal(ks[7], (C,), jnp.float32)
    return dict(w1=w1, b1=b1, g1=g1, bt1=bt1, w2=w2, b2=b2, g2=g2, bt2=bt2)


def ref_res_block(p, x, conv_dtype=jnp.float32):
    """Plain-JAX/XLA reference with PyTorch semantics.  conv_dtype controls whether the
    conv operands are cast to bf16 (to match the kernel's MXU precision) or kept f32."""
    prec = jax.lax.Precision.HIGHEST if conv_dtype == jnp.float32 else None

    def conv_block(xin, w, b, gamma, beta):
        y = jax.lax.conv_general_dilated(
            xin.astype(conv_dtype), w.astype(conv_dtype),
            window_strides=(1, 1), padding=((1, 1), (1, 1)),
            dimension_numbers=("NCHW", "OIHW", "NCHW"),
            preferred_element_type=jnp.float32, precision=prec)
        y = y + b[None, :, None, None]
        n, c, h, w_ = y.shape
        g = min(32, c)
        yg = y.reshape(n, g, c // g, h, w_)
        mean = jnp.mean(yg, axis=(2, 3, 4), keepdims=True)
        var = jnp.mean((yg - mean) ** 2, axis=(2, 3, 4), keepdims=True)
        yg = (yg - mean) * jax.lax.rsqrt(var + 1e-5)
        y = yg.reshape(n, c, h, w_) * gamma[None, :, None, None] + beta[None, :, None, None]
        return jax.nn.gelu(y, approximate=False)

    h = conv_block(x, p["w1"], p["b1"], p["g1"], p["bt1"])
    h = conv_block(h, p["w2"], p["b2"], p["g2"], p["bt2"])
    return x + h


if __name__ == "__main__":
    key = jax.random.PRNGKey(0)
    k_params, k_x = jax.random.split(key)

    # ResBlock(channels=8) on a (2, 8, 16, 16) input -> HW = 256 (lane-dense blocks).
    N, C, H, W = 2, 8, 16, 16
    params = init_res_block(k_params, C)
    x = jax.random.normal(k_x, (N, C, H, W), jnp.float32)

    fwd = jax.jit(res_block_forward,
                  static_argnames=("conv_dtype", "single_buffer_consts"))
    try:
        out = jax.block_until_ready(fwd(params, x))
    except Exception:
        # Fallback if this jax/libtpu rejects pl.Buffered(1) single-buffering.
        out = jax.block_until_ready(fwd(params, x, single_buffer_consts=False))

    # Matching-precision reference (bf16 conv operands, f32 accumulation / GN / GELU).
    ref_match = jax.block_until_ready(ref_res_block(params, x, conv_dtype=jnp.bfloat16))
    # Exact f32 reference (PyTorch semantics) as a loose structural sanity check.
    ref_exact = jax.block_until_ready(ref_res_block(params, x, conv_dtype=jnp.float32))

    assert out.shape == (N, C, H, W)
    assert bool(jnp.all(jnp.isfinite(out)))
    err_match = float(jnp.max(jnp.abs(out - ref_match)))
    err_exact = float(jnp.max(jnp.abs(out - ref_exact)))
    assert err_match < 2e-3, f"mismatch vs matching-precision reference: {err_match}"
    assert err_exact < 1e-1, f"mismatch vs exact f32 reference: {err_exact}"
    print("KERNEL_OK")
</pallas_src>

<mosaic_0001>
module attributes {stable_mosaic.version = 11 : i64} {
  func.func @_res_block_kernel(%arg0: i32, %arg1: memref<2x8x256xf32, #tpu.memory_space<vmem>>, %arg2: memref<9x1x256xf32, #tpu.memory_space<vmem>>, %arg3: memref<8x8xf32, #tpu.memory_space<vmem>>, %arg4: memref<8x72xbf16, #tpu.memory_space<vmem>>, %arg5: memref<8x1xf32, #tpu.memory_space<vmem>>, %arg6: memref<8x1xf32, #tpu.memory_space<vmem>>, %arg7: memref<8x1xf32, #tpu.memory_space<vmem>>, %arg8: memref<8x72xbf16, #tpu.memory_space<vmem>>, %arg9: memref<8x1xf32, #tpu.memory_space<vmem>>, %arg10: memref<8x1xf32, #tpu.memory_space<vmem>>, %arg11: memref<8x1xf32, #tpu.memory_space<vmem>>, %arg12: memref<2x8x256xf32, #tpu.memory_space<vmem>>) attributes {dimension_semantics = [#tpu.dimension_semantics<parallel>], iteration_bounds = array<i64: 1>, scalar_prefetch = 0 : i64, scratch_operands = 0 : i64, tpu.core_type = #tpu.core_type<tc>, window_params = [{transform_indices = @transform_0, window_bounds = array<i64: 2, 8, 256>}, {pipeline_mode = #tpu.pipeline_mode<synchronous>, transform_indices = @transform_1, window_bounds = array<i64: 9, 1, 256>}, {pipeline_mode = #tpu.pipeline_mode<synchronous>, transform_indices = @transform_2, window_bounds = array<i64: 8, 8>}, {pipeline_mode = #tpu.pipeline_mode<synchronous>, transform_indices = @transform_3, window_bounds = array<i64: 8, 72>}, {pipeline_mode = #tpu.pipeline_mode<synchronous>, transform_indices = @transform_4, window_bounds = array<i64: 8, 1>}, {pipeline_mode = #tpu.pipeline_mode<synchronous>, transform_indices = @transform_5, window_bounds = array<i64: 8, 1>}, {pipeline_mode = #tpu.pipeline_mode<synchronous>, transform_indices = @transform_6, window_bounds = array<i64: 8, 1>}, {pipeline_mode = #tpu.pipeline_mode<synchronous>, transform_indices = @transform_7, window_bounds = array<i64: 8, 72>}, {pipeline_mode = #tpu.pipeline_mode<synchronous>, transform_indices = @transform_8, window_bounds = array<i64: 8, 1>}, {pipeline_mode = #tpu.pipeline_mode<synchronous>, transform_indices = @transform_9, window_bounds = array<i64: 8, 1>}, {pipeline_mode = #tpu.pipeline_mode<synchronous>, transform_indices = @transform_10, window_bounds = array<i64: 8, 1>}, {transform_indices = @transform_11, window_bounds = array<i64: 2, 8, 256>}]} {
    %c0 = arith.constant 0 : index
    %c0_0 = arith.constant 0 : index
    %c0_1 = arith.constant 0 : index
    %0 = vector.load %arg1[%c0, %c0_0, %c0_1] : memref<2x8x256xf32, #tpu.memory_space<vmem>>, vector<1x8x256xf32>
    %1 = vector.shape_cast %0 : vector<1x8x256xf32> to vector<8x256xf32>
    %c17_i32 = arith.constant 17 : i32
    %2 = tpu.dynamic_rotate %1 by %c17_i32 dim 1 : vector<8x256xf32>, i32 -> vector<8x256xf32>
    %c0_2 = arith.constant 0 : index
    %c0_3 = arith.constant 0 : index
    %c0_4 = arith.constant 0 : index
    %3 = vector.load %arg2[%c0_2, %c0_3, %c0_4] : memref<9x1x256xf32, #tpu.memory_space<vmem>>, vector<1x1x256xf32>
    %4 = vector.shape_cast %3 : vector<1x1x256xf32> to vector<1x256xf32>
    %5 = vector.broadcast %4 : vector<1x256xf32> to vector<8x256xf32>
    %6 = arith.mulf %2, %5 : vector<8x256xf32>
    %c16_i32 = arith.constant 16 : i32
    %7 = tpu.dynamic_rotate %1 by %c16_i32 dim 1 : vector<8x256xf32>, i32 -> vector<8x256xf32>
    %c1 = arith.constant 1 : index
    %c0_5 = arith.constant 0 : index
    %c0_6 = arith.constant 0 : index
    %8 = vector.load %arg2[%c1, %c0_5, %c0_6] : memref<9x1x256xf32, #tpu.memory_space<vmem>>, vector<1x1x256xf32>
    %9 = vector.shape_cast %8 : vector<1x1x256xf32> to vector<1x256xf32>
    %10 = vector.broadcast %9 : vector<1x256xf32> to vector<8x256xf32>
    %11 = arith.mulf %7, %10 : vector<8x256xf32>
    %c15_i32 = arith.constant 15 : i32
    %12 = tpu.dynamic_rotate %1 by %c15_i32 dim 1 : vector<8x256xf32>, i32 -> vector<8x256xf32>
    %c2 = arith.constant 2 : index
    %c0_7 = arith.constant 0 : index
    %c0_8 = arith.constant 0 : index
    %13 = vector.load %arg2[%c2, %c0_7, %c0_8] : memref<9x1x256xf32, #tpu.memory_space<vmem>>, vector<1x1x256xf32>
    %14 = vector.shape_cast %13 : vector<1x1x256xf32> to vector<1x256xf32>
    %15 = vector.broadcast %14 : vector<1x256xf32> to vector<8x256xf32>
    %16 = arith.mulf %12, %15 : vector<8x256xf32>
    %c1_i32 = arith.constant 1 : i32
    %17 = tpu.dynamic_rotate %1 by %c1_i32 dim 1 : vector<8x256xf32>, i32 -> vector<8x256xf32>
    %c3 = arith.constant 3 : index
    %c0_9 = arith.constant 0 : index
    %c0_10 = arith.constant 0 : index
    %18 = vector.load %arg2[%c3, %c0_9, %c0_10] : memref<9x1x256xf32, #tpu.memory_space<vmem>>, vector<1x1x256xf32>
    %19 = vector.shape_cast %18 : vector<1x1x256xf32> to vector<1x256xf32>
    %20 = vector.broadcast %19 : vector<1x256xf32> to vector<8x256xf32>
    %21 = arith.mulf %17, %20 : vector<8x256xf32>
    %c255_i32 = arith.constant 255 : i32
    %22 = tpu.dynamic_rotate %1 by %c255_i32 dim 1 : vector<8x256xf32>, i32 -> vector<8x256xf32>
    %c5 = arith.constant 5 : index
    %c0_11 = arith.constant 0 : index
    %c0_12 = arith.constant 0 : index
    %23 = vector.load %arg2[%c5, %c0_11, %c0_12] : memref<9x1x256xf32, #tpu.memory_space<vmem>>, vector<1x1x256xf32>
    %24 = vector.shape_cast %23 : vector<1x1x256xf32> to vector<1x256xf32>
    %25 = vector.broadcast %24 : vector<1x256xf32> to vector<8x256xf32>
    %26 = arith.mulf %22, %25 : vector<8x256xf32>
    %c241_i32 = arith.constant 241 : i32
    %27 = tpu.dynamic_rotate %1 by %c241_i32 dim 1 : vector<8x256xf32>, i32 -> vector<8x256xf32>
    %c6 = arith.constant 6 : index
    %c0_13 = arith.constant 0 : index
    %c0_14 = arith.constant 0 : index
    %28 = vector.load %arg2[%c6, %c0_13, %c0_14] : memref<9x1x256xf32, #tpu.memory_space<vmem>>, vector<1x1x256xf32>
    %29 = vector.shape_cast %28 : vector<1x1x256xf32> to vector<1x256xf32>
    %30 = vector.broadcast %29 : vector<1x256xf32> to vector<8x256xf32>
    %31 = arith.mulf %27, %30 : vector<8x256xf32>
    %c240_i32 = arith.constant 240 : i32
    %32 = tpu.dynamic_rotate %1 by %c240_i32 dim 1 : vector<8x256xf32>, i32 -> vector<8x256xf32>
    %c7 = arith.constant 7 : index
    %c0_15 = arith.constant 0 : index
    %c0_16 = arith.constant 0 : index
    %33 = vector.load %arg2[%c7, %c0_15, %c0_16] : memref<9x1x256xf32, #tpu.memory_space<vmem>>, vector<1x1x256xf32>
    %34 = vector.shape_cast %33 : vector<1x1x256xf32> to vector<1x256xf32>
    %35 = vector.broadcast %34 : vector<1x256xf32> to vector<8x256xf32>
    %36 = arith.mulf %32, %35 : vector<8x256xf32>
    %c239_i32 = arith.constant 239 : i32
    %37 = tpu.dynamic_rotate %1 by %c239_i32 dim 1 : vector<8x256xf32>, i32 -> vector<8x256xf32>
    %c8 = arith.constant 8 : index
    %c0_17 = arith.constant 0 : index
    %c0_18 = arith.constant 0 : index
    %38 = vector.load %arg2[%c8, %c0_17, %c0_18] : memref<9x1x256xf32, #tpu.memory_space<vmem>>, vector<1x1x256xf32>
    %39 = vector.shape_cast %38 : vector<1x1x256xf32> to vector<1x256xf32>
    %40 = vector.broadcast %39 : vector<1x256xf32> to vector<8x256xf32>
    %41 = arith.mulf %37, %40 : vector<8x256xf32>
    %42 = tpu.concatenate %6, %11, %16, %21, %1, %26, %31, %36, %41 in 0 : vector<8x256xf32>, vector<8x256xf32>, vector<8x256xf32>, vector<8x256xf32>, vector<8x256xf32>, vector<8x256xf32>, vector<8x256xf32>, vector<8x256xf32>, vector<8x256xf32> -> vector<72x256xf32>
    %43 = arith.truncf %42 : vector<72x256xf32> to vector<72x256xbf16>
    %c0_19 = arith.constant 0 : index
    %c0_20 = arith.constant 0 : index
    %44 = vector.load %arg4[%c0_19, %c0_20] : memref<8x72xbf16, #tpu.memory_space<vmem>>, vector<8x72xbf16>
    %cst = arith.constant dense<0.000000e+00> : vector<8x256xf32>
    %45 = tpu.matmul %44, %43, %cst {dimension_numbers = #tpu.dot_dimension_numbers<[1], [0], [0], [1], [0, 0, 1, 1], [], []>} : vector<8x72xbf16>, vector<72x256xbf16>, vector<8x256xf32> -> vector<8x256xf32>
    %c0_21 = arith.constant 0 : index
    %c0_22 = arith.constant 0 : index
    %46 = vector.load %arg5[%c0_21, %c0_22] : memref<8x1xf32, #tpu.memory_space<vmem>>, vector<8x1xf32>
    %47 = vector.broadcast %46 : vector<8x1xf32> to vector<8x256xf32>
    %48 = arith.addf %45, %47 : vector<8x256xf32>
    %cst_23 = arith.constant dense<0.000000e+00> : vector<8xf32>
    %49 = vector.multi_reduction <add>, %48, %cst_23 [1] : vector<8x256xf32> to vector<8xf32>
    %50 = vector.shape_cast %49 : vector<8xf32> to vector<8x1xf32>
    %51 = arith.mulf %48, %48 : vector<8x256xf32>
    %cst_24 = arith.constant dense<0.000000e+00> : vector<8xf32>
    %52 = vector.multi_reduction <add>, %51, %cst_24 [1] : vector<8x256xf32> to vector<8xf32>
    %53 = vector.shape_cast %52 : vector<8xf32> to vector<8x1xf32>
    %cst_25 = arith.constant 3.906250e-03 : f32
    %54 = vector.broadcast %cst_25 : f32 to vector<8x1xf32>
    %55 = arith.mulf %50, %54 : vector<8x1xf32>
    %cst_26 = arith.constant 3.906250e-03 : f32
    %56 = vector.broadcast %cst_26 : f32 to vector<8x1xf32>
    %57 = arith.mulf %53, %56 : vector<8x1xf32>
    %58 = arith.mulf %55, %55 : vector<8x1xf32>
    %59 = arith.subf %57, %58 : vector<8x1xf32>
    %c0_27 = arith.constant 0 : index
    %c0_28 = arith.constant 0 : index
    %60 = vector.load %arg6[%c0_27, %c0_28] : memref<8x1xf32, #tpu.memory_space<vmem>>, vector<8x1xf32>
    %cst_29 = arith.constant 9.99999974E-6 : f32
    %61 = vector.broadcast %cst_29 : f32 to vector<8x1xf32>
    %62 = arith.addf %59, %61 : vector<8x1xf32>
    %63 = math.rsqrt %62 : vector<8x1xf32>
    %64 = arith.mulf %60, %63 : vector<8x1xf32>
    %c0_30 = arith.constant 0 : index
    %c0_31 = arith.constant 0 : index
    %65 = vector.load %arg7[%c0_30, %c0_31] : memref<8x1xf32, #tpu.memory_space<vmem>>, vector<8x1xf32>
    %66 = arith.mulf %55, %64 : vector<8x1xf32>
    %67 = arith.subf %65, %66 : vector<8x1xf32>
    %68 = vector.broadcast %64 : vector<8x1xf32> to vector<8x256xf32>
    %69 = arith.mulf %48, %68 : vector<8x256xf32>
    %70 = vector.broadcast %67 : vector<8x1xf32> to vector<8x256xf32>
    %71 = arith.addf %69, %70 : vector<8x256xf32>
    %cst_32 = arith.constant 5.000000e-01 : f32
    %72 = vector.broadcast %cst_32 : f32 to vector<8x256xf32>
    %73 = arith.mulf %72, %71 : vector<8x256xf32>
    %cst_33 = arith.constant 0.707106769 : f32
    %74 = vector.broadcast %cst_33 : f32 to vector<8x256xf32>
    %75 = arith.mulf %71, %74 : vector<8x256xf32>
    %76 = math.absf %75 : vector<8x256xf32>
    %cst_34 = arith.constant 0.327591091 : f32
    %77 = vector.broadcast %cst_34 : f32 to vector<8x256xf32>
    %78 = arith.mulf %77, %76 : vector<8x256xf32>
    %cst_35 = arith.constant 1.000000e+00 : f32
    %79 = vector.broadcast %cst_35 : f32 to vector<8x256xf32>
    %80 = arith.addf %79, %78 : vector<8x256xf32>
    %cst_36 = arith.constant 1.000000e+00 : f32
    %81 = vector.broadcast %cst_36 : f32 to vector<8x256xf32>
    %82 = arith.divf %81, %80 : vector<8x256xf32>
    %cst_37 = arith.constant 1.06140542 : f32
    %83 = vector.broadcast %cst_37 : f32 to vector<8x256xf32>
    %84 = arith.mulf %83, %82 : vector<8x256xf32>
    %cst_38 = arith.constant -1.45315206 : f32
    %85 = vector.broadcast %cst_38 : f32 to vector<8x256xf32>
    %86 = arith.addf %84, %85 : vector<8x256xf32>
    %87 = arith.mulf %86, %82 : vector<8x256xf32>
    %cst_39 = arith.constant 1.42141378 : f32
    %88 = vector.broadcast %cst_39 : f32 to vector<8x256xf32>
    %89 = arith.addf %87, %88 : vector<8x256xf32>
    %90 = arith.mulf %89, %82 : vector<8x256xf32>
    %cst_40 = arith.constant -0.284496725 : f32
    %91 = vector.broadcast %cst_40 : f32 to vector<8x256xf32>
    %92 = arith.addf %90, %91 : vector<8x256xf32>
    %93 = arith.mulf %92, %82 : vector<8x256xf32>
    %cst_41 = arith.constant 0.254829586 : f32
    %94 = vector.broadcast %cst_41 : f32 to vector<8x256xf32>
    %95 = arith.addf %93, %94 : vector<8x256xf32>
    %96 = arith.mulf %95, %82 : vector<8x256xf32>
    %cst_42 = arith.constant 0.000000e+00 : f32
    %97 = vector.broadcast %cst_42 : f32 to vector<8x256xf32>
    %98 = arith.subf %97, %76 : vector<8x256xf32>
    %99 = arith.mulf %98, %76 : vector<8x256xf32>
    %100 = math.exp %99 : vector<8x256xf32>
    %101 = arith.mulf %96, %100 : vector<8x256xf32>
    %cst_43 = arith.constant 1.000000e+00 : f32
    %102 = vector.broadcast %cst_43 : f32 to vector<8x256xf32>
    %103 = arith.subf %102, %101 : vector<8x256xf32>
    %cst_44 = arith.constant 0.000000e+00 : f32
    %104 = vector.broadcast %cst_44 : f32 to vector<8x256xf32>
    %105 = arith.cmpf olt, %75, %104 : vector<8x256xf32>
    %cst_45 = arith.constant 0.000000e+00 : f32
    %106 = vector.broadcast %cst_45 : f32 to vector<8x256xf32>
    %107 = arith.subf %106, %103 : vector<8x256xf32>
    %108 = arith.select %105, %107, %103 : vector<8x256xi1>, vector<8x256xf32>
    %cst_46 = arith.constant 1.000000e+00 : f32
    %109 = vector.broadcast %cst_46 : f32 to vector<8x256xf32>
    %110 = arith.addf %109, %108 : vector<8x256xf32>
    %111 = arith.mulf %73, %110 : vector<8x256xf32>
    %c17_i32_47 = arith.constant 17 : i32
    %112 = tpu.dynamic_rotate %111 by %c17_i32_47 dim 1 : vector<8x256xf32>, i32 -> vector<8x256xf32>
    %c0_48 = arith.constant 0 : index
    %c0_49 = arith.constant 0 : index
    %c0_50 = arith.constant 0 : index
    %113 = vector.load %arg2[%c0_48, %c0_49, %c0_50] : memref<9x1x256xf32, #tpu.memory_space<vmem>>, vector<1x1x256xf32>
    %114 = vector.shape_cast %113 : vector<1x1x256xf32> to vector<1x256xf32>
    %115 = vector.broadcast %114 : vector<1x256xf32> to vector<8x256xf32>
    %116 = arith.mulf %112, %115 : vector<8x256xf32>
    %c16_i32_51 = arith.constant 16 : i32
    %117 = tpu.dynamic_rotate %111 by %c16_i32_51 dim 1 : vector<8x256xf32>, i32 -> vector<8x256xf32>
    %c1_52 = arith.constant 1 : index
    %c0_53 = arith.constant 0 : index
    %c0_54 = arith.constant 0 : index
    %118 = vector.load %arg2[%c1_52, %c0_53, %c0_54] : memref<9x1x256xf32, #tpu.memory_space<vmem>>, vector<1x1x256xf32>
    %119 = vector.shape_cast %118 : vector<1x1x256xf32> to vector<1x256xf32>
    %120 = vector.broadcast %119 : vector<1x256xf32> to vector<8x256xf32>
    %121 = arith.mulf %117, %120 : vector<8x256xf32>
    %c15_i32_55 = arith.constant 15 : i32
    %122 = tpu.dynamic_rotate %111 by %c15_i32_55 dim 1 : vector<8x256xf32>, i32 -> vector<8x256xf32>
    %c2_56 = arith.constant 2 : index
    %c0_57 = arith.constant 0 : index
    %c0_58 = arith.constant 0 : index
    %123 = vector.load %arg2[%c2_56, %c0_57, %c0_58] : memref<9x1x256xf32, #tpu.memory_space<vmem>>, vector<1x1x256xf32>
    %124 = vector.shape_cast %123 : vector<1x1x256xf32> to vector<1x256xf32>
    %125 = vector.broadcast %124 : vector<1x256xf32> to vector<8x256xf32>
    %126 = arith.mulf %122, %125 : vector<8x256xf32>
    %c1_i32_59 = arith.constant 1 : i32
    %127 = tpu.dynamic_rotate %111 by %c1_i32_59 dim 1 : vector<8x256xf32>, i32 -> vector<8x256xf32>
    %c3_60 = arith.constant 3 : index
    %c0_61 = arith.constant 0 : index
    %c0_62 = arith.constant 0 : index
    %128 = vector.load %arg2[%c3_60, %c0_61, %c0_62] : memref<9x1x256xf32, #tpu.memory_space<vmem>>, vector<1x1x256xf32>
    %129 = vector.shape_cast %128 : vector<1x1x256xf32> to vector<1x256xf32>
    %130 = vector.broadcast %129 : vector<1x256xf32> to vector<8x256xf32>
    %131 = arith.mulf %127, %130 : vector<8x256xf32>
    %c255_i32_63 = arith.constant 255 : i32
    %132 = tpu.dynamic_rotate %111 by %c255_i32_63 dim 1 : vector<8x256xf32>, i32 -> vector<8x256xf32>
    %c5_64 = arith.constant 5 : index
    %c0_65 = arith.constant 0 : index
    %c0_66 = arith.constant 0 : index
    %133 = vector.load %arg2[%c5_64, %c0_65, %c0_66] : memref<9x1x256xf32, #tpu.memory_space<vmem>>, vector<1x1x256xf32>
    %134 = vector.shape_cast %133 : vector<1x1x256xf32> to vector<1x256xf32>
    %135 = vector.broadcast %134 : vector<1x256xf32> to vector<8x256xf32>
    %136 = arith.mulf %132, %135 : vector<8x256xf32>
    %c241_i32_67 = arith.constant 241 : i32
    %137 = tpu.dynamic_rotate %111 by %c241_i32_67 dim 1 : vector<8x256xf32>, i32 -> vector<8x256xf32>
    %c6_68 = arith.constant 6 : index
    %c0_69 = arith.constant 0 : index
    %c0_70 = arith.constant 0 : index
    %138 = vector.load %arg2[%c6_68, %c0_69, %c0_70] : memref<9x1x256xf32, #tpu.memory_space<vmem>>, vector<1x1x256xf32>
    %139 = vector.shape_cast %138 : vector<1x1x256xf32> to vector<1x256xf32>
    %140 = vector.broadcast %139 : vector<1x256xf32> to vector<8x256xf32>
    %141 = arith.mulf %137, %140 : vector<8x256xf32>
    %c240_i32_71 = arith.constant 240 : i32
    %142 = tpu.dynamic_rotate %111 by %c240_i32_71 dim 1 : vector<8x256xf32>, i32 -> vector<8x256xf32>
    %c7_72 = arith.constant 7 : index
    %c0_73 = arith.constant 0 : index
    %c0_74 = arith.constant 0 : index
    %143 = vector.load %arg2[%c7_72, %c0_73, %c0_74] : memref<9x1x256xf32, #tpu.memory_space<vmem>>, vector<1x1x256xf32>
    %144 = vector.shape_cast %143 : vector<1x1x256xf32> to vector<1x256xf32>
    %145 = vector.broadcast %144 : vector<1x256xf32> to vector<8x256xf32>
    %146 = arith.mulf %142, %145 : vector<8x256xf32>
    %c239_i32_75 = arith.constant 239 : i32
    %147 = tpu.dynamic_rotate %111 by %c239_i32_75 dim 1 : vector<8x256xf32>, i32 -> vector<8x256xf32>
    %c8_76 = arith.constant 8 : index
    %c0_77 = arith.constant 0 : index
    %c0_78 = arith.constant 0 : index
    %148 = vector.load %arg2[%c8_76, %c0_77, %c0_78] : memref<9x1x256xf32, #tpu.memory_space<vmem>>, vector<1x1x256xf32>
    %149 = vector.shape_cast %148 : vector<1x1x256xf32> to vector<1x256xf32>
    %150 = vector.broadcast %149 : vector<1x256xf32> to vector<8x256xf32>
    %151 = arith.mulf %147, %150 : vector<8x256xf32>
    %152 = tpu.concatenate %116, %121, %126, %131, %111, %136, %141, %146, %151 in 0 : vector<8x256xf32>, vector<8x256xf32>, vector<8x256xf32>, vector<8x256xf32>, vector<8x256xf32>, vector<8x256xf32>, vector<8x256xf32>, vector<8x256xf32>, vector<8x256xf32> -> vector<72x256xf32>
    %153 = arith.truncf %152 : vector<72x256xf32> to vector<72x256xbf16>
    %c0_79 = arith.constant 0 : index
    %c0_80 = arith.constant 0 : index
    %154 = vector.load %arg8[%c0_79, %c0_80] : memref<8x72xbf16, #tpu.memory_space<vmem>>, vector<8x72xbf16>
    %cst_81 = arith.constant dense<0.000000e+00> : vector<8x256xf32>
    %155 = tpu.matmul %154, %153, %cst_81 {dimension_numbers = #tpu.dot_dimension_numbers<[1], [0], [0], [1], [0, 0, 1, 1], [], []>} : vector<8x72xbf16>, vector<72x256xbf16>, vector<8x256xf32> -> vector<8x256xf32>
    %c0_82 = arith.constant 0 : index
    %c0_83 = arith.constant 0 : index
    %156 = vector.load %arg9[%c0_82, %c0_83] : memref<8x1xf32, #tpu.memory_space<vmem>>, vector<8x1xf32>
    %157 = vector.broadcast %156 : vector<8x1xf32> to vector<8x256xf32>
    %158 = arith.addf %155, %157 : vector<8x256xf32>
    %cst_84 = arith.constant dense<0.000000e+00> : vector<8xf32>
    %159 = vector.multi_reduction <add>, %158, %cst_84 [1] : vector<8x256xf32> to vector<8xf32>
    %160 = vector.shape_cast %159 : vector<8xf32> to vector<8x1xf32>
    %161 = arith.mulf %158, %158 : vector<8x256xf32>
    %cst_85 = arith.constant dense<0.000000e+00> : vector<8xf32>
    %162 = vector.multi_reduction <add>, %161, %cst_85 [1] : vector<8x256xf32> to vector<8xf32>
    %163 = vector.shape_cast %162 : vector<8xf32> to vector<8x1xf32>
    %cst_86 = arith.constant 3.906250e-03 : f32
    %164 = vector.broadcast %cst_86 : f32 to vector<8x1xf32>
    %165 = arith.mulf %160, %164 : vector<8x1xf32>
    %cst_87 = arith.constant 3.906250e-03 : f32
    %166 = vector.broadcast %cst_87 : f32 to vector<8x1xf32>
    %167 = arith.mulf %163, %166 : vector<8x1xf32>
    %168 = arith.mulf %165, %165 : vector<8x1xf32>
    %169 = arith.subf %167, %168 : vector<8x1xf32>
    %c0_88 = arith.constant 0 : index
    %c0_89 = arith.constant 0 : index
    %170 = vector.load %arg10[%c0_88, %c0_89] : memref<8x1xf32, #tpu.memory_space<vmem>>, vector<8x1xf32>
    %cst_90 = arith.constant 9.99999974E-6 : f32
    %171 = vector.broadcast %cst_90 : f32 to vector<8x1xf32>
    %172 = arith.addf %169, %171 : vector<8x1xf32>
    %173 = math.rsqrt %172 : vector<8x1xf32>
    %174 = arith.mulf %170, %173 : vector<8x1xf32>
    %c0_91 = arith.constant 0 : index
    %c0_92 = arith.constant 0 : index
    %175 = vector.load %arg11[%c0_91, %c0_92] : memref<8x1xf32, #tpu.memory_space<vmem>>, vector<8x1xf32>
    %176 = arith.mulf %165, %174 : vector<8x1xf32>
    %177 = arith.subf %175, %176 : vector<8x1xf32>
    %178 = vector.broadcast %174 : vector<8x1xf32> to vector<8x256xf32>
    %179 = arith.mulf %158, %178 : vector<8x256xf32>
    %180 = vector.broadcast %177 : vector<8x1xf32> to vector<8x256xf32>
    %181 = arith.addf %179, %180 : vector<8x256xf32>
    %cst_93 = arith.constant 5.000000e-01 : f32
    %182 = vector.broadcast %cst_93 : f32 to vector<8x256xf32>
    %183 = arith.mulf %182, %181 : vector<8x256xf32>
    %cst_94 = arith.constant 0.707106769 : f32
    %184 = vector.broadcast %cst_94 : f32 to vector<8x256xf32>
    %185 = arith.mulf %181, %184 : vector<8x256xf32>
    %186 = math.absf %185 : vector<8x256xf32>
    %cst_95 = arith.constant 0.327591091 : f32
    %187 = vector.broadcast %cst_95 : f32 to vector<8x256xf32>
    %188 = arith.mulf %187, %186 : vector<8x256xf32>
    %cst_96 = arith.constant 1.000000e+00 : f32
    %189 = vector.broadcast %cst_96 : f32 to vector<8x256xf32>
    %190 = arith.addf %189, %188 : vector<8x256xf32>
    %cst_97 = arith.constant 1.000000e+00 : f32
    %191 = vector.broadcast %cst_97 : f32 to vector<8x256xf32>
    %192 = arith.divf %191, %190 : vector<8x256xf32>
    %cst_98 = arith.constant 1.06140542 : f32
    %193 = vector.broadcast %cst_98 : f32 to vector<8x256xf32>
    %194 = arith.mulf %193, %192 : vector<8x256xf32>
    %cst_99 = arith.constant -1.45315206 : f32
    %195 = vector.broadcast %cst_99 : f32 to vector<8x256xf32>
    %196 = arith.addf %194, %195 : vector<8x256xf32>
    %197 = arith.mulf %196, %192 : vector<8x256xf32>
    %cst_100 = arith.constant 1.42141378 : f32
    %198 = vector.broadcast %cst_100 : f32 to vector<8x256xf32>
    %199 = arith.addf %197, %198 : vector<8x256xf32>
    %200 = arith.mulf %199, %192 : vector<8x256xf32>
    %cst_101 = arith.constant -0.284496725 : f32
    %201 = vector.broadcast %cst_101 : f32 to vector<8x256xf32>
    %202 = arith.addf %200, %201 : vector<8x256xf32>
    %203 = arith.mulf %202, %192 : vector<8x256xf32>
    %cst_102 = arith.constant 0.254829586 : f32
    %204 = vector.broadcast %cst_102 : f32 to vector<8x256xf32>
    %205 = arith.addf %203, %204 : vector<8x256xf32>
    %206 = arith.mulf %205, %192 : vector<8x256xf32>
    %cst_103 = arith.constant 0.000000e+00 : f32
    %207 = vector.broadcast %cst_103 : f32 to vector<8x256xf32>
    %208 = arith.subf %207, %186 : vector<8x256xf32>
    %209 = arith.mulf %208, %186 : vector<8x256xf32>
    %210 = math.exp %209 : vector<8x256xf32>
    %211 = arith.mulf %206, %210 : vector<8x256xf32>
    %cst_104 = arith.constant 1.000000e+00 : f32
    %212 = vector.broadcast %cst_104 : f32 to vector<8x256xf32>
    %213 = arith.subf %212, %211 : vector<8x256xf32>
    %cst_105 = arith.constant 0.000000e+00 : f32
    %214 = vector.broadcast %cst_105 : f32 to vector<8x256xf32>
    %215 = arith.cmpf olt, %185, %214 : vector<8x256xf32>
    %cst_106 = arith.constant 0.000000e+00 : f32
    %216 = vector.broadcast %cst_106 : f32 to vector<8x256xf32>
    %217 = arith.subf %216, %213 : vector<8x256xf32>
    %218 = arith.select %215, %217, %213 : vector<8x256xi1>, vector<8x256xf32>
    %cst_107 = arith.constant 1.000000e+00 : f32
    %219 = vector.broadcast %cst_107 : f32 to vector<8x256xf32>
    %220 = arith.addf %219, %218 : vector<8x256xf32>
    %221 = arith.mulf %183, %220 : vector<8x256xf32>
    %222 = arith.addf %1, %221 : vector<8x256xf32>
    %c0_108 = arith.constant 0 : index
    %c0_109 = arith.constant 0 : index
    %c0_110 = arith.constant 0 : index
    %223 = vector.load %arg12[%c0_108, %c0_109, %c0_110] : memref<2x8x256xf32, #tpu.memory_space<vmem>>, vector<1x8x256xf32>
    %224 = vector.shape_cast %223 : vector<1x8x256xf32> to vector<8x256xf32>
    %225 = vector.shape_cast %222 : vector<8x256xf32> to vector<1x8x256xf32>
    tpu.vector_store %arg12[%c0_108, %c0_109, %c0_110], %225 {strides = array<i32>} : memref<2x8x256xf32, #tpu.memory_space<vmem>>, vector<1x8x256xf32>,
    %c1_111 = arith.constant 1 : index
    %c0_112 = arith.constant 0 : index
    %c0_113 = arith.constant 0 : index
    %226 = vector.load %arg1[%c1_111, %c0_112, %c0_113] : memref<2x8x256xf32, #tpu.memory_space<vmem>>, vector<1x8x256xf32>
    %227 = vector.shape_cast %226 : vector<1x8x256xf32> to vector<8x256xf32>
    %c17_i32_114 = arith.constant 17 : i32
    %228 = tpu.dynamic_rotate %227 by %c17_i32_114 dim 1 : vector<8x256xf32>, i32 -> vector<8x256xf32>
    %c0_115 = arith.constant 0 : index
    %c0_116 = arith.constant 0 : index
    %c0_117 = arith.constant 0 : index
    %229 = vector.load %arg2[%c0_115, %c0_116, %c0_117] : memref<9x1x256xf32, #tpu.memory_space<vmem>>, vector<1x1x256xf32>
    %230 = vector.shape_cast %229 : vector<1x1x256xf32> to vector<1x256xf32>
    %231 = vector.broadcast %230 : vector<1x256xf32> to vector<8x256xf32>
    %232 = arith.mulf %228, %231 : vector<8x256xf32>
    %c16_i32_118 = arith.constant 16 : i32
    %233 = tpu.dynamic_rotate %227 by %c16_i32_118 dim 1 : vector<8x256xf32>, i32 -> vector<8x256xf32>
    %c1_119 = arith.constant 1 : index
    %c0_120 = arith.constant 0 : index
    %c0_121 = arith.constant 0 : index
    %234 = vector.load %arg2[%c1_119, %c0_120, %c0_121] : memref<9x1x256xf32, #tpu.memory_space<vmem>>, vector<1x1x256xf32>
    %235 = vector.shape_cast %234 : vector<1x1x256xf32> to vector<1x256xf32>
    %236 = vector.broadcast %235 : vector<1x256xf32> to vector<8x256xf32>
    %237 = arith.mulf %233, %236 : vector<8x256xf32>
    %c15_i32_122 = arith.constant 15 : i32
    %238 = tpu.dynamic_rotate %227 by %c15_i32_122 dim 1 : vector<8x256xf32>, i32 -> vector<8x256xf32>
    %c2_123 = arith.constant 2 : index
    %c0_124 = arith.constant 0 : index
    %c0_125 = arith.constant 0 : index
    %239 = vector.load %arg2[%c2_123, %c0_124, %c0_125] : memref<9x1x256xf32, #tpu.memory_space<vmem>>, vector<1x1x256xf32>
    %240 = vector.shape_cast %239 : vector<1x1x256xf32> to vector<1x256xf32>
    %241 = vector.broadcast %240 : vector<1x256xf32> to vector<8x256xf32>
    %242 = arith.mulf %238, %241 : vector<8x256xf32>
    %c1_i32_126 = arith.constant 1 : i32
    %243 = tpu.dynamic_rotate %227 by %c1_i32_126 dim 1 : vector<8x256xf32>, i32 -> vector<8x256xf32>
    %c3_127 = arith.constant 3 : index
    %c0_128 = arith.constant 0 : index
    %c0_129 = arith.constant 0 : index
    %244 = vector.load %arg2[%c3_127, %c0_128, %c0_129] : memref<9x1x256xf32, #tpu.memory_space<vmem>>, vector<1x1x256xf32>
    %245 = vector.shape_cast %244 : vector<1x1x256xf32> to vector<1x256xf32>
    %246 = vector.broadcast %245 : vector<1x256xf32> to vector<8x256xf32>
    %247 = arith.mulf %243, %246 : vector<8x256xf32>
    %c255_i32_130 = arith.constant 255 : i32
    %248 = tpu.dynamic_rotate %227 by %c255_i32_130 dim 1 : vector<8x256xf32>, i32 -> vector<8x256xf32>
    %c5_131 = arith.constant 5 : index
    %c0_132 = arith.constant 0 : index
    %c0_133 = arith.constant 0 : index
    %249 = vector.load %arg2[%c5_131, %c0_132, %c0_133] : memref<9x1x256xf32, #tpu.memory_space<vmem>>, vector<1x1x256xf32>
    %250 = vector.shape_cast %249 : vector<1x1x256xf32> to vector<1x256xf32>
    %251 = vector.broadcast %250 : vector<1x256xf32> to vector<8x256xf32>
    %252 = arith.mulf %248, %251 : vector<8x256xf32>
    %c241_i32_134 = arith.constant 241 : i32
    %253 = tpu.dynamic_rotate %227 by %c241_i32_134 dim 1 : vector<8x256xf32>, i32 -> vector<8x256xf32>
    %c6_135 = arith.constant 6 : index
    %c0_136 = arith.constant 0 : index
    %c0_137 = arith.constant 0 : index
    %254 = vector.load %arg2[%c6_135, %c0_136, %c0_137] : memref<9x1x256xf32, #tpu.memory_space<vmem>>, vector<1x1x256xf32>
    %255 = vector.shape_cast %254 : vector<1x1x256xf32> to vector<1x256xf32>
    %256 = vector.broadcast %255 : vector<1x256xf32> to vector<8x256xf32>
    %257 = arith.mulf %253, %256 : vector<8x256xf32>
    %c240_i32_138 = arith.constant 240 : i32
    %258 = tpu.dynamic_rotate %227 by %c240_i32_138 dim 1 : vector<8x256xf32>, i32 -> vector<8x256xf32>
    %c7_139 = arith.constant 7 : index
    %c0_140 = arith.constant 0 : index
    %c0_141 = arith.constant 0 : index
    %259 = vector.load %arg2[%c7_139, %c0_140, %c0_141] : memref<9x1x256xf32, #tpu.memory_space<vmem>>, vector<1x1x256xf32>
    %260 = vector.shape_cast %259 : vector<1x1x256xf32> to vector<1x256xf32>
    %261 = vector.broadcast %260 : vector<1x256xf32> to vector<8x256xf32>
    %262 = arith.mulf %258, %261 : vector<8x256xf32>
    %c239_i32_142 = arith.constant 239 : i32
    %263 = tpu.dynamic_rotate %227 by %c239_i32_142 dim 1 : vector<8x256xf32>, i32 -> vector<8x256xf32>
    %c8_143 = arith.constant 8 : index
    %c0_144 = arith.constant 0 : index
    %c0_145 = arith.constant 0 : index
    %264 = vector.load %arg2[%c8_143, %c0_144, %c0_145] : memref<9x1x256xf32, #tpu.memory_space<vmem>>, vector<1x1x256xf32>
    %265 = vector.shape_cast %264 : vector<1x1x256xf32> to vector<1x256xf32>
    %266 = vector.broadcast %265 : vector<1x256xf32> to vector<8x256xf32>
    %267 = arith.mulf %263, %266 : vector<8x256xf32>
    %268 = tpu.concatenate %232, %237, %242, %247, %227, %252, %257, %262, %267 in 0 : vector<8x256xf32>, vector<8x256xf32>, vector<8x256xf32>, vector<8x256xf32>, vector<8x256xf32>, vector<8x256xf32>, vector<8x256xf32>, vector<8x256xf32>, vector<8x256xf32> -> vector<72x256xf32>
    %269 = arith.truncf %268 : vector<72x256xf32> to vector<72x256xbf16>
    %c0_146 = arith.constant 0 : index
    %c0_147 = arith.constant 0 : index
    %270 = vector.load %arg4[%c0_146, %c0_147] : memref<8x72xbf16, #tpu.memory_space<vmem>>, vector<8x72xbf16>
    %cst_148 = arith.constant dense<0.000000e+00> : vector<8x256xf32>
    %271 = tpu.matmul %270, %269, %cst_148 {dimension_numbers = #tpu.dot_dimension_numbers<[1], [0], [0], [1], [0, 0, 1, 1], [], []>} : vector<8x72xbf16>, vector<72x256xbf16>, vector<8x256xf32> -> vector<8x256xf32>
    %c0_149 = arith.constant 0 : index
    %c0_150 = arith.constant 0 : index
    %272 = vector.load %arg5[%c0_149, %c0_150] : memref<8x1xf32, #tpu.memory_space<vmem>>, vector<8x1xf32>
    %273 = vector.broadcast %272 : vector<8x1xf32> to vector<8x256xf32>
    %274 = arith.addf %271, %273 : vector<8x256xf32>
    %cst_151 = arith.constant dense<0.000000e+00> : vector<8xf32>
    %275 = vector.multi_reduction <add>, %274, %cst_151 [1] : vector<8x256xf32> to vector<8xf32>
    %276 = vector.shape_cast %275 : vector<8xf32> to vector<8x1xf32>
    %277 = arith.mulf %274, %274 : vector<8x256xf32>
    %cst_152 = arith.constant dense<0.000000e+00> : vector<8xf32>
    %278 = vector.multi_reduction <add>, %277, %cst_152 [1] : vector<8x256xf32> to vector<8xf32>
    %279 = vector.shape_cast %278 : vector<8xf32> to vector<8x1xf32>
    %cst_153 = arith.constant 3.906250e-03 : f32
    %280 = vector.broadcast %cst_153 : f32 to vector<8x1xf32>
    %281 = arith.mulf %276, %280 : vector<8x1xf32>
    %cst_154 = arith.constant 3.906250e-03 : f32
    %282 = vector.broadcast %cst_154 : f32 to vector<8x1xf32>
    %283 = arith.mulf %279, %282 : vector<8x1xf32>
    %284 = arith.mulf %281, %281 : vector<8x1xf32>
    %285 = arith.subf %283, %284 : vector<8x1xf32>
    %c0_155 = arith.constant 0 : index
    %c0_156 = arith.constant 0 : index
    %286 = vector.load %arg6[%c0_155, %c0_156] : memref<8x1xf32, #tpu.memory_space<vmem>>, vector<8x1xf32>
    %cst_157 = arith.constant 9.99999974E-6 : f32
    %287 = vector.broadcast %cst_157 : f32 to vector<8x1xf32>
    %288 = arith.addf %285, %287 : vector<8x1xf32>
    %289 = math.rsqrt %288 : vector<8x1xf32>
    %290 = arith.mulf %286, %289 : vector<8x1xf32>
    %c0_158 = arith.constant 0 : index
    %c0_159 = arith.constant 0 : index
    %291 = vector.load %arg7[%c0_158, %c0_159] : memref<8x1xf32, #tpu.memory_space<vmem>>, vector<8x1xf32>
    %292 = arith.mulf %281, %290 : vector<8x1xf32>
    %293 = arith.subf %291, %292 : vector<8x1xf32>
    %294 = vector.broadcast %290 : vector<8x1xf32> to vector<8x256xf32>
    %295 = arith.mulf %274, %294 : vector<8x256xf32>
    %296 = vector.broadcast %293 : vector<8x1xf32> to vector<8x256xf32>
    %297 = arith.addf %295, %296 : vector<8x256xf32>
    %cst_160 = arith.constant 5.000000e-01 : f32
    %298 = vector.broadcast %cst_160 : f32 to vector<8x256xf32>
    %299 = arith.mulf %298, %297 : vector<8x256xf32>
    %cst_161 = arith.constant 0.707106769 : f32
    %300 = vector.broadcast %cst_161 : f32 to vector<8x256xf32>
    %301 = arith.mulf %297, %300 : vector<8x256xf32>
    %302 = math.absf %301 : vector<8x256xf32>
    %cst_162 = arith.constant 0.327591091 : f32
    %303 = vector.broadcast %cst_162 : f32 to vector<8x256xf32>
    %304 = arith.mulf %303, %302 : vector<8x256xf32>
    %cst_163 = arith.constant 1.000000e+00 : f32
    %305 = vector.broadcast %cst_163 : f32 to vector<8x256xf32>
    %306 = arith.addf %305, %304 : vector<8x256xf32>
    %cst_164 = arith.constant 1.000000e+00 : f32
    %307 = vector.broadcast %cst_164 : f32 to vector<8x256xf32>
    %308 = arith.divf %307, %306 : vector<8x256xf32>
    %cst_165 = arith.constant 1.06140542 : f32
    %309 = vector.broadcast %cst_165 : f32 to vector<8x256xf32>
    %310 = arith.mulf %309, %308 : vector<8x256xf32>
    %cst_166 = arith.constant -1.45315206 : f32
    %311 = vector.broadcast %cst_166 : f32 to vector<8x256xf32>
    %312 = arith.addf %310, %311 : vector<8x256xf32>
    %313 = arith.mulf %312, %308 : vector<8x256xf32>
    %cst_167 = arith.constant 1.42141378 : f32
    %314 = vector.broadcast %cst_167 : f32 to vector<8x256xf32>
    %315 = arith.addf %313, %314 : vector<8x256xf32>
    %316 = arith.mulf %315, %308 : vector<8x256xf32>
    %cst_168 = arith.constant -0.284496725 : f32
    %317 = vector.broadcast %cst_168 : f32 to vector<8x256xf32>
    %318 = arith.addf %316, %317 : vector<8x256xf32>
    %319 = arith.mulf %318, %308 : vector<8x256xf32>
    %cst_169 = arith.constant 0.254829586 : f32
    %320 = vector.broadcast %cst_169 : f32 to vector<8x256xf32>
    %321 = arith.addf %319, %320 : vector<8x256xf32>
    %322 = arith.mulf %321, %308 : vector<8x256xf32>
    %cst_170 = arith.constant 0.000000e+00 : f32
    %323 = vector.broadcast %cst_170 : f32 to vector<8x256xf32>
    %324 = arith.subf %323, %302 : vector<8x256xf32>
    %325 = arith.mulf %324, %302 : vector<8x256xf32>
    %326 = math.exp %325 : vector<8x256xf32>
    %327 = arith.mulf %322, %326 : vector<8x256xf32>
    %cst_171 = arith.constant 1.000000e+00 : f32
    %328 = vector.broadcast %cst_171 : f32 to vector<8x256xf32>
    %329 = arith.subf %328, %327 : vector<8x256xf32>
    %cst_172 = arith.constant 0.000000e+00 : f32
    %330 = vector.broadcast %cst_172 : f32 to vector<8x256xf32>
    %331 = arith.cmpf olt, %301, %330 : vector<8x256xf32>
    %cst_173 = arith.constant 0.000000e+00 : f32
    %332 = vector.broadcast %cst_173 : f32 to vector<8x256xf32>
    %333 = arith.subf %332, %329 : vector<8x256xf32>
    %334 = arith.select %331, %333, %329 : vector<8x256xi1>, vector<8x256xf32>
    %cst_174 = arith.constant 1.000000e+00 : f32
    %335 = vector.broadcast %cst_174 : f32 to vector<8x256xf32>
    %336 = arith.addf %335, %334 : vector<8x256xf32>
    %337 = arith.mulf %299, %336 : vector<8x256xf32>
    %c17_i32_175 = arith.constant 17 : i32
    %338 = tpu.dynamic_rotate %337 by %c17_i32_175 dim 1 : vector<8x256xf32>, i32 -> vector<8x256xf32>
    %c0_176 = arith.constant 0 : index
    %c0_177 = arith.constant 0 : index
    %c0_178 = arith.constant 0 : index
    %339 = vector.load %arg2[%c0_176, %c0_177, %c0_178] : memref<9x1x256xf32, #tpu.memory_space<vmem>>, vector<1x1x256xf32>
    %340 = vector.shape_cast %339 : vector<1x1x256xf32> to vector<1x256xf32>
    %341 = vector.broadcast %340 : vector<1x256xf32> to vector<8x256xf32>
    %342 = arith.mulf %338, %341 : vector<8x256xf32>
    %c16_i32_179 = arith.constant 16 : i32
    %343 = tpu.dynamic_rotate %337 by %c16_i32_179 dim 1 : vector<8x256xf32>, i32 -> vector<8x256xf32>
    %c1_180 = arith.constant 1 : index
    %c0_181 = arith.constant 0 : index
    %c0_182 = arith.constant 0 : index
    %344 = vector.load %arg2[%c1_180, %c0_181, %c0_182] : memref<9x1x256xf32, #tpu.memory_space<vmem>>, vector<1x1x256xf32>
    %345 = vector.shape_cast %344 : vector<1x1x256xf32> to vector<1x256xf32>
    %346 = vector.broadcast %345 : vector<1x256xf32> to vector<8x256xf32>
    %347 = arith.mulf %343, %346 : vector<8x256xf32>
    %c15_i32_183 = arith.constant 15 : i32
    %348 = tpu.dynamic_rotate %337 by %c15_i32_183 dim 1 : vector<8x256xf32>, i32 -> vector<8x256xf32>
    %c2_184 = arith.constant 2 : index
    %c0_185 = arith.constant 0 : index
    %c0_186 = arith.constant 0 : index
    %349 = vector.load %arg2[%c2_184, %c0_185, %c0_186] : memref<9x1x256xf32, #tpu.memory_space<vmem>>, vector<1x1x256xf32>
    %350 = vector.shape_cast %349 : vector<1x1x256xf32> to vector<1x256xf32>
    %351 = vector.broadcast %350 : vector<1x256xf32> to vector<8x256xf32>
    %352 = arith.mulf %348, %351 : vector<8x256xf32>
    %c1_i32_187 = arith.constant 1 : i32
    %353 = tpu.dynamic_rotate %337 by %c1_i32_187 dim 1 : vector<8x256xf32>, i32 -> vector<8x256xf32>
    %c3_188 = arith.constant 3 : index
    %c0_189 = arith.constant 0 : index
    %c0_190 = arith.constant 0 : index
    %354 = vector.load %arg2[%c3_188, %c0_189, %c0_190] : memref<9x1x256xf32, #tpu.memory_space<vmem>>, vector<1x1x256xf32>
    %355 = vector.shape_cast %354 : vector<1x1x256xf32> to vector<1x256xf32>
    %356 = vector.broadcast %355 : vector<1x256xf32> to vector<8x256xf32>
    %357 = arith.mulf %353, %356 : vector<8x256xf32>
    %c255_i32_191 = arith.constant 255 : i32
    %358 = tpu.dynamic_rotate %337 by %c255_i32_191 dim 1 : vector<8x256xf32>, i32 -> vector<8x256xf32>
    %c5_192 = arith.constant 5 : index
    %c0_193 = arith.constant 0 : index
    %c0_194 = arith.constant 0 : index
    %359 = vector.load %arg2[%c5_192, %c0_193, %c0_194] : memref<9x1x256xf32, #tpu.memory_space<vmem>>, vector<1x1x256xf32>
    %360 = vector.shape_cast %359 : vector<1x1x256xf32> to vector<1x256xf32>
    %361 = vector.broadcast %360 : vector<1x256xf32> to vector<8x256xf32>
    %362 = arith.mulf %358, %361 : vector<8x256xf32>
    %c241_i32_195 = arith.constant 241 : i32
    %363 = tpu.dynamic_rotate %337 by %c241_i32_195 dim 1 : vector<8x256xf32>, i32 -> vector<8x256xf32>
    %c6_196 = arith.constant 6 : index
    %c0_197 = arith.constant 0 : index
    %c0_198 = arith.constant 0 : index
    %364 = vector.load %arg2[%c6_196, %c0_197, %c0_198] : memref<9x1x256xf32, #tpu.memory_space<vmem>>, vector<1x1x256xf32>
    %365 = vector.shape_cast %364 : vector<1x1x256xf32> to vector<1x256xf32>
    %366 = vector.broadcast %365 : vector<1x256xf32> to vector<8x256xf32>
    %367 = arith.mulf %363, %366 : vector<8x256xf32>
    %c240_i32_199 = arith.constant 240 : i32
    %368 = tpu.dynamic_rotate %337 by %c240_i32_199 dim 1 : vector<8x256xf32>, i32 -> vector<8x256xf32>
    %c7_200 = arith.constant 7 : index
    %c0_201 = arith.constant 0 : index
    %c0_202 = arith.constant 0 : index
    %369 = vector.load %arg2[%c7_200, %c0_201, %c0_202] : memref<9x1x256xf32, #tpu.memory_space<vmem>>, vector<1x1x256xf32>
    %370 = vector.shape_cast %369 : vector<1x1x256xf32> to vector<1x256xf32>
    %371 = vector.broadcast %370 : vector<1x256xf32> to vector<8x256xf32>
    %372 = arith.mulf %368, %371 : vector<8x256xf32>
    %c239_i32_203 = arith.constant 239 : i32
    %373 = tpu.dynamic_rotate %337 by %c239_i32_203 dim 1 : vector<8x256xf32>, i32 -> vector<8x256xf32>
    %c8_204 = arith.constant 8 : index
    %c0_205 = arith.constant 0 : index
    %c0_206 = arith.constant 0 : index
    %374 = vector.load %arg2[%c8_204, %c0_205, %c0_206] : memref<9x1x256xf32, #tpu.memory_space<vmem>>, vector<1x1x256xf32>
    %375 = vector.shape_cast %374 : vector<1x1x256xf32> to vector<1x256xf32>
    %376 = vector.broadcast %375 : vector<1x256xf32> to vector<8x256xf32>
    %377 = arith.mulf %373, %376 : vector<8x256xf32>
    %378 = tpu.concatenate %342, %347, %352, %357, %337, %362, %367, %372, %377 in 0 : vector<8x256xf32>, vector<8x256xf32>, vector<8x256xf32>, vector<8x256xf32>, vector<8x256xf32>, vector<8x256xf32>, vector<8x256xf32>, vector<8x256xf32>, vector<8x256xf32> -> vector<72x256xf32>
    %379 = arith.truncf %378 : vector<72x256xf32> to vector<72x256xbf16>
    %c0_207 = arith.constant 0 : index
    %c0_208 = arith.constant 0 : index
    %380 = vector.load %arg8[%c0_207, %c0_208] : memref<8x72xbf16, #tpu.memory_space<vmem>>, vector<8x72xbf16>
    %cst_209 = arith.constant dense<0.000000e+00> : vector<8x256xf32>
    %381 = tpu.matmul %380, %379, %cst_209 {dimension_numbers = #tpu.dot_dimension_numbers<[1], [0], [0], [1], [0, 0, 1, 1], [], []>} : vector<8x72xbf16>, vector<72x256xbf16>, vector<8x256xf32> -> vector<8x256xf32>
    %c0_210 = arith.constant 0 : index
    %c0_211 = arith.constant 0 : index
    %382 = vector.load %arg9[%c0_210, %c0_211] : memref<8x1xf32, #tpu.memory_space<vmem>>, vector<8x1xf32>
    %383 = vector.broadcast %382 : vector<8x1xf32> to vector<8x256xf32>
    %384 = arith.addf %381, %383 : vector<8x256xf32>
    %cst_212 = arith.constant dense<0.000000e+00> : vector<8xf32>
    %385 = vector.multi_reduction <add>, %384, %cst_212 [1] : vector<8x256xf32> to vector<8xf32>
    %386 = vector.shape_cast %385 : vector<8xf32> to vector<8x1xf32>
    %387 = arith.mulf %384, %384 : vector<8x256xf32>
    %cst_213 = arith.constant dense<0.000000e+00> : vector<8xf32>
    %388 = vector.multi_reduction <add>, %387, %cst_213 [1] : vector<8x256xf32> to vector<8xf32>
    %389 = vector.shape_cast %388 : vector<8xf32> to vector<8x1xf32>
    %cst_214 = arith.constant 3.906250e-03 : f32
    %390 = vector.broadcast %cst_214 : f32 to vector<8x1xf32>
    %391 = arith.mulf %386, %390 : vector<8x1xf32>
    %cst_215 = arith.constant 3.906250e-03 : f32
    %392 = vector.broadcast %cst_215 : f32 to vector<8x1xf32>
    %393 = arith.mulf %389, %392 : vector<8x1xf32>
    %394 = arith.mulf %391, %391 : vector<8x1xf32>
    %395 = arith.subf %393, %394 : vector<8x1xf32>
    %c0_216 = arith.constant 0 : index
    %c0_217 = arith.constant 0 : index
    %396 = vector.load %arg10[%c0_216, %c0_217] : memref<8x1xf32, #tpu.memory_space<vmem>>, vector<8x1xf32>
    %cst_218 = arith.constant 9.99999974E-6 : f32
    %397 = vector.broadcast %cst_218 : f32 to vector<8x1xf32>
    %398 = arith.addf %395, %397 : vector<8x1xf32>
    %399 = math.rsqrt %398 : vector<8x1xf32>
    %400 = arith.mulf %396, %399 : vector<8x1xf32>
    %c0_219 = arith.constant 0 : index
    %c0_220 = arith.constant 0 : index
    %401 = vector.load %arg11[%c0_219, %c0_220] : memref<8x1xf32, #tpu.memory_space<vmem>>, vector<8x1xf32>
    %402 = arith.mulf %391, %400 : vector<8x1xf32>
    %403 = arith.subf %401, %402 : vector<8x1xf32>
    %404 = vector.broadcast %400 : vector<8x1xf32> to vector<8x256xf32>
    %405 = arith.mulf %384, %404 : vector<8x256xf32>
    %406 = vector.broadcast %403 : vector<8x1xf32> to vector<8x256xf32>
    %407 = arith.addf %405, %406 : vector<8x256xf32>
    %cst_221 = arith.constant 5.000000e-01 : f32
    %408 = vector.broadcast %cst_221 : f32 to vector<8x256xf32>
    %409 = arith.mulf %408, %407 : vector<8x256xf32>
    %cst_222 = arith.constant 0.707106769 : f32
    %410 = vector.broadcast %cst_222 : f32 to vector<8x256xf32>
    %411 = arith.mulf %407, %410 : vector<8x256xf32>
    %412 = math.absf %411 : vector<8x256xf32>
    %cst_223 = arith.constant 0.327591091 : f32
    %413 = vector.broadcast %cst_223 : f32 to vector<8x256xf32>
    %414 = arith.mulf %413, %412 : vector<8x256xf32>
    %cst_224 = arith.constant 1.000000e+00 : f32
    %415 = vector.broadcast %cst_224 : f32 to vector<8x256xf32>
    %416 = arith.addf %415, %414 : vector<8x256xf32>
    %cst_225 = arith.constant 1.000000e+00 : f32
    %417 = vector.broadcast %cst_225 : f32 to vector<8x256xf32>
    %418 = arith.divf %417, %416 : vector<8x256xf32>
    %cst_226 = arith.constant 1.06140542 : f32
    %419 = vector.broadcast %cst_226 : f32 to vector<8x256xf32>
    %420 = arith.mulf %419, %418 : vector<8x256xf32>
    %cst_227 = arith.constant -1.45315206 : f32
    %421 = vector.broadcast %cst_227 : f32 to vector<8x256xf32>
    %422 = arith.addf %420, %421 : vector<8x256xf32>
    %423 = arith.mulf %422, %418 : vector<8x256xf32>
    %cst_228 = arith.constant 1.42141378 : f32
    %424 = vector.broadcast %cst_228 : f32 to vector<8x256xf32>
    %425 = arith.addf %423, %424 : vector<8x256xf32>
    %426 = arith.mulf %425, %418 : vector<8x256xf32>
    %cst_229 = arith.constant -0.284496725 : f32
    %427 = vector.broadcast %cst_229 : f32 to vector<8x256xf32>
    %428 = arith.addf %426, %427 : vector<8x256xf32>
    %429 = arith.mulf %428, %418 : vector<8x256xf32>
    %cst_230 = arith.constant 0.254829586 : f32
    %430 = vector.broadcast %cst_230 : f32 to vector<8x256xf32>
    %431 = arith.addf %429, %430 : vector<8x256xf32>
    %432 = arith.mulf %431, %418 : vector<8x256xf32>
    %cst_231 = arith.constant 0.000000e+00 : f32
    %433 = vector.broadcast %cst_231 : f32 to vector<8x256xf32>
    %434 = arith.subf %433, %412 : vector<8x256xf32>
    %435 = arith.mulf %434, %412 : vector<8x256xf32>
    %436 = math.exp %435 : vector<8x256xf32>
    %437 = arith.mulf %432, %436 : vector<8x256xf32>
    %cst_232 = arith.constant 1.000000e+00 : f32
    %438 = vector.broadcast %cst_232 : f32 to vector<8x256xf32>
    %439 = arith.subf %438, %437 : vector<8x256xf32>
    %cst_233 = arith.constant 0.000000e+00 : f32
    %440 = vector.broadcast %cst_233 : f32 to vector<8x256xf32>
    %441 = arith.cmpf olt, %411, %440 : vector<8x256xf32>
    %cst_234 = arith.constant 0.000000e+00 : f32
    %442 = vector.broadcast %cst_234 : f32 to vector<8x256xf32>
    %443 = arith.subf %442, %439 : vector<8x256xf32>
    %444 = arith.select %441, %443, %439 : vector<8x256xi1>, vector<8x256xf32>
    %cst_235 = arith.constant 1.000000e+00 : f32
    %445 = vector.broadcast %cst_235 : f32 to vector<8x256xf32>
    %446 = arith.addf %445, %444 : vector<8x256xf32>
    %447 = arith.mulf %409, %446 : vector<8x256xf32>
    %448 = arith.addf %227, %447 : vector<8x256xf32>
    %c1_236 = arith.constant 1 : index
    %c0_237 = arith.constant 0 : index
    %c0_238 = arith.constant 0 : index
    %449 = vector.load %arg12[%c1_236, %c0_237, %c0_238] : memref<2x8x256xf32, #tpu.memory_space<vmem>>, vector<1x8x256xf32>
    %450 = vector.shape_cast %449 : vector<1x8x256xf32> to vector<8x256xf32>
    %451 = vector.shape_cast %448 : vector<8x256xf32> to vector<1x8x256xf32>
    tpu.vector_store %arg12[%c1_236, %c0_237, %c0_238], %451 {strides = array<i32>} : memref<2x8x256xf32, #tpu.memory_space<vmem>>, vector<1x8x256xf32>,
    return
  }
  func.func @transform_0(%arg0: i32) -> (i32, i32, i32) {
    %c0_i32 = arith.constant 0 : i32
    %c0_i32_0 = arith.constant 0 : i32
    %c0_i32_1 = arith.constant 0 : i32
    return %arg0, %c0_i32, %c0_i32_0 : i32, i32, i32
  }
  func.func @transform_1(%arg0: i32) -> (i32, i32, i32) {
    %c0_i32 = arith.constant 0 : i32
    %c0_i32_0 = arith.constant 0 : i32
    %c0_i32_1 = arith.constant 0 : i32
    %c0_i32_2 = arith.constant 0 : i32
    return %c0_i32, %c0_i32_0, %c0_i32_1 : i32, i32, i32
  }
  func.func @transform_2(%arg0: i32) -> (i32, i32) {
    %c0_i32 = arith.constant 0 : i32
    %c0_i32_0 = arith.constant 0 : i32
    %c0_i32_1 = arith.constant 0 : i32
    return %c0_i32, %c0_i32_0 : i32, i32
  }
  func.func @transform_3(%arg0: i32) -> (i32, i32) {
    %c0_i32 = arith.constant 0 : i32
    %c0_i32_0 = arith.constant 0 : i32
    %c0_i32_1 = arith.constant 0 : i32
    return %c0_i32, %c0_i32_0 : i32, i32
  }
  func.func @transform_4(%arg0: i32) -> (i32, i32) {
    %c0_i32 = arith.constant 0 : i32
    %c0_i32_0 = arith.constant 0 : i32
    %c0_i32_1 = arith.constant 0 : i32
    return %c0_i32, %c0_i32_0 : i32, i32
  }
  func.func @transform_5(%arg0: i32) -> (i32, i32) {
    %c0_i32 = arith.constant 0 : i32
    %c0_i32_0 = arith.constant 0 : i32
    %c0_i32_1 = arith.constant 0 : i32
    return %c0_i32, %c0_i32_0 : i32, i32
  }
  func.func @transform_6(%arg0: i32) -> (i32, i32) {
    %c0_i32 = arith.constant 0 : i32
    %c0_i32_0 = arith.constant 0 : i32
    %c0_i32_1 = arith.constant 0 : i32
    return %c0_i32, %c0_i32_0 : i32, i32
  }
  func.func @transform_7(%arg0: i32) -> (i32, i32) {
    %c0_i32 = arith.constant 0 : i32
    %c0_i32_0 = arith.constant 0 : i32
    %c0_i32_1 = arith.constant 0 : i32
    return %c0_i32, %c0_i32_0 : i32, i32
  }
  func.func @transform_8(%arg0: i32) -> (i32, i32) {
    %c0_i32 = arith.constant 0 : i32
    %c0_i32_0 = arith.constant 0 : i32
    %c0_i32_1 = arith.constant 0 : i32
    return %c0_i32, %c0_i32_0 : i32, i32
  }
  func.func @transform_9(%arg0: i32) -> (i32, i32) {
    %c0_i32 = arith.constant 0 : i32
    %c0_i32_0 = arith.constant 0 : i32
    %c0_i32_1 = arith.constant 0 : i32
    return %c0_i32, %c0_i32_0 : i32, i32
  }
  func.func @transform_10(%arg0: i32) -> (i32, i32) {
    %c0_i32 = arith.constant 0 : i32
    %c0_i32_0 = arith.constant 0 : i32
    %c0_i32_1 = arith.constant 0 : i32
    return %c0_i32, %c0_i32_0 : i32, i32
  }
  func.func @transform_11(%arg0: i32) -> (i32, i32, i32) {
    %c0_i32 = arith.constant 0 : i32
    %c0_i32_0 = arith.constant 0 : i32
    %c0_i32_1 = arith.constant 0 : i32
    return %arg0, %c0_i32, %c0_i32_0 : i32, i32, i32
  }
}

module attributes {stable_mosaic.version = 11 : i64} {
  func.func @_res_block_kernel(%arg0: i32, %arg1: memref<2x8x256xf32, #tpu.memory_space<vmem>>, %arg2: memref<9x1x256xf32, #tpu.memory_space<vmem>>, %arg3: memref<8x8xf32, #tpu.memory_space<vmem>>, %arg4: memref<8x72xbf16, #tpu.memory_space<vmem>>, %arg5: memref<8x1xf32, #tpu.memory_space<vmem>>, %arg6: memref<8x1xf32, #tpu.memory_space<vmem>>, %arg7: memref<8x1xf32, #tpu.memory_space<vmem>>, %arg8: memref<8x72xbf16, #tpu.memory_space<vmem>>, %arg9: memref<8x1xf32, #tpu.memory_space<vmem>>, %arg10: memref<8x1xf32, #tpu.memory_space<vmem>>, %arg11: memref<8x1xf32, #tpu.memory_space<vmem>>, %arg12: memref<2x8x256xf32, #tpu.memory_space<vmem>>) attributes {dimension_semantics = [#tpu.dimension_semantics<parallel>], iteration_bounds = array<i64: 1>, scalar_prefetch = 0 : i64, scratch_operands = 0 : i64, tpu.core_type = #tpu.core_type<tc>, window_params = [{transform_indices = @transform_0, window_bounds = array<i64: 2, 8, 256>}, {pipeline_mode = #tpu.pipeline_mode<synchronous>, transform_indices = @transform_1, window_bounds = array<i64: 9, 1, 256>}, {pipeline_mode = #tpu.pipeline_mode<synchronous>, transform_indices = @transform_2, window_bounds = array<i64: 8, 8>}, {pipeline_mode = #tpu.pipeline_mode<synchronous>, transform_indices = @transform_3, window_bounds = array<i64: 8, 72>}, {pipeline_mode = #tpu.pipeline_mode<synchronous>, transform_indices = @transform_4, window_bounds = array<i64: 8, 1>}, {pipeline_mode = #tpu.pipeline_mode<synchronous>, transform_indices = @transform_5, window_bounds = array<i64: 8, 1>}, {pipeline_mode = #tpu.pipeline_mode<synchronous>, transform_indices = @transform_6, window_bounds = array<i64: 8, 1>}, {pipeline_mode = #tpu.pipeline_mode<synchronous>, transform_indices = @transform_7, window_bounds = array<i64: 8, 72>}, {pipeline_mode = #tpu.pipeline_mode<synchronous>, transform_indices = @transform_8, window_bounds = array<i64: 8, 1>}, {pipeline_mode = #tpu.pipeline_mode<synchronous>, transform_indices = @transform_9, window_bounds = array<i64: 8, 1>}, {pipeline_mode = #tpu.pipeline_mode<synchronous>, transform_indices = @transform_10, window_bounds = array<i64: 8, 1>}, {transform_indices = @transform_11, window_bounds = array<i64: 2, 8, 256>}]} {
    %c0 = arith.constant 0 : index
    %c0_0 = arith.constant 0 : index
    %c0_1 = arith.constant 0 : index
    %0 = vector.load %arg1[%c0, %c0_0, %c0_1] : memref<2x8x256xf32, #tpu.memory_space<vmem>>, vector<1x8x256xf32>
    %1 = vector.shape_cast %0 : vector<1x8x256xf32> to vector<8x256xf32>
    %c17_i32 = arith.constant 17 : i32
    %2 = tpu.dynamic_rotate %1 by %c17_i32 dim 1 : vector<8x256xf32>, i32 -> vector<8x256xf32>
    %c0_2 = arith.constant 0 : index
    %c0_3 = arith.constant 0 : index
    %c0_4 = arith.constant 0 : index
    %3 = vector.load %arg2[%c0_2, %c0_3, %c0_4] : memref<9x1x256xf32, #tpu.memory_space<vmem>>, vector<1x1x256xf32>
    %4 = vector.shape_cast %3 : vector<1x1x256xf32> to vector<1x256xf32>
    %5 = vector.broadcast %4 : vector<1x256xf32> to vector<8x256xf32>
    %6 = arith.mulf %2, %5 : vector<8x256xf32>
    %c16_i32 = arith.constant 16 : i32
    %7 = tpu.dynamic_rotate %1 by %c16_i32 dim 1 : vector<8x256xf32>, i32 -> vector<8x256xf32>
    %c1 = arith.constant 1 : index
    %c0_5 = arith.constant 0 : index
    %c0_6 = arith.constant 0 : index
    %8 = vector.load %arg2[%c1, %c0_5, %c0_6] : memref<9x1x256xf32, #tpu.memory_space<vmem>>, vector<1x1x256xf32>
    %9 = vector.shape_cast %8 : vector<1x1x256xf32> to vector<1x256xf32>
    %10 = vector.broadcast %9 : vector<1x256xf32> to vector<8x256xf32>
    %11 = arith.mulf %7, %10 : vector<8x256xf32>
    %c15_i32 = arith.constant 15 : i32
    %12 = tpu.dynamic_rotate %1 by %c15_i32 dim 1 : vector<8x256xf32>, i32 -> vector<8x256xf32>
    %c2 = arith.constant 2 : index
    %c0_7 = arith.constant 0 : index
    %c0_8 = arith.constant 0 : index
    %13 = vector.load %arg2[%c2, %c0_7, %c0_8] : memref<9x1x256xf32, #tpu.memory_space<vmem>>, vector<1x1x256xf32>
    %14 = vector.shape_cast %13 : vector<1x1x256xf32> to vector<1x256xf32>
    %15 = vector.broadcast %14 : vector<1x256xf32> to vector<8x256xf32>
    %16 = arith.mulf %12, %15 : vector<8x256xf32>
    %c1_i32 = arith.constant 1 : i32
    %17 = tpu.dynamic_rotate %1 by %c1_i32 dim 1 : vector<8x256xf32>, i32 -> vector<8x256xf32>
    %c3 = arith.constant 3 : index
    %c0_9 = arith.constant 0 : index
    %c0_10 = arith.constant 0 : index
    %18 = vector.load %arg2[%c3, %c0_9, %c0_10] : memref<9x1x256xf32, #tpu.memory_space<vmem>>, vector<1x1x256xf32>
    %19 = vector.shape_cast %18 : vector<1x1x256xf32> to vector<1x256xf32>
    %20 = vector.broadcast %19 : vector<1x256xf32> to vector<8x256xf32>
    %21 = arith.mulf %17, %20 : vector<8x256xf32>
    %c255_i32 = arith.constant 255 : i32
    %22 = tpu.dynamic_rotate %1 by %c255_i32 dim 1 : vector<8x256xf32>, i32 -> vector<8x256xf32>
    %c5 = arith.constant 5 : index
    %c0_11 = arith.constant 0 : index
    %c0_12 = arith.constant 0 : index
    %23 = vector.load %arg2[%c5, %c0_11, %c0_12] : memref<9x1x256xf32, #tpu.memory_space<vmem>>, vector<1x1x256xf32>
    %24 = vector.shape_cast %23 : vector<1x1x256xf32> to vector<1x256xf32>
    %25 = vector.broadcast %24 : vector<1x256xf32> to vector<8x256xf32>
    %26 = arith.mulf %22, %25 : vector<8x256xf32>
    %c241_i32 = arith.constant 241 : i32
    %27 = tpu.dynamic_rotate %1 by %c241_i32 dim 1 : vector<8x256xf32>, i32 -> vector<8x256xf32>
    %c6 = arith.constant 6 : index
    %c0_13 = arith.constant 0 : index
    %c0_14 = arith.constant 0 : index
    %28 = vector.load %arg2[%c6, %c0_13, %c0_14] : memref<9x1x256xf32, #tpu.memory_space<vmem>>, vector<1x1x256xf32>
    %29 = vector.shape_cast %28 : vector<1x1x256xf32> to vector<1x256xf32>
    %30 = vector.broadcast %29 : vector<1x256xf32> to vector<8x256xf32>
    %31 = arith.mulf %27, %30 : vector<8x256xf32>
    %c240_i32 = arith.constant 240 : i32
    %32 = tpu.dynamic_rotate %1 by %c240_i32 dim 1 : vector<8x256xf32>, i32 -> vector<8x256xf32>
    %c7 = arith.constant 7 : index
    %c0_15 = arith.constant 0 : index
    %c0_16 = arith.constant 0 : index
    %33 = vector.load %arg2[%c7, %c0_15, %c0_16] : memref<9x1x256xf32, #tpu.memory_space<vmem>>, vector<1x1x256xf32>
    %34 = vector.shape_cast %33 : vector<1x1x256xf32> to vector<1x256xf32>
    %35 = vector.broadcast %34 : vector<1x256xf32> to vector<8x256xf32>
    %36 = arith.mulf %32, %35 : vector<8x256xf32>
    %c239_i32 = arith.constant 239 : i32
    %37 = tpu.dynamic_rotate %1 by %c239_i32 dim 1 : vector<8x256xf32>, i32 -> vector<8x256xf32>
    %c8 = arith.constant 8 : index
    %c0_17 = arith.constant 0 : index
    %c0_18 = arith.constant 0 : index
    %38 = vector.load %arg2[%c8, %c0_17, %c0_18] : memref<9x1x256xf32, #tpu.memory_space<vmem>>, vector<1x1x256xf32>
    %39 = vector.shape_cast %38 : vector<1x1x256xf32> to vector<1x256xf32>
    %40 = vector.broadcast %39 : vector<1x256xf32> to vector<8x256xf32>
    %41 = arith.mulf %37, %40 : vector<8x256xf32>
    %42 = tpu.concatenate %6, %11, %16, %21, %1, %26, %31, %36, %41 in 0 : vector<8x256xf32>, vector<8x256xf32>, vector<8x256xf32>, vector<8x256xf32>, vector<8x256xf32>, vector<8x256xf32>, vector<8x256xf32>, vector<8x256xf32>, vector<8x256xf32> -> vector<72x256xf32>
    %43 = arith.truncf %42 : vector<72x256xf32> to vector<72x256xbf16>
    %c0_19 = arith.constant 0 : index
    %c0_20 = arith.constant 0 : index
    %44 = vector.load %arg4[%c0_19, %c0_20] : memref<8x72xbf16, #tpu.memory_space<vmem>>, vector<8x72xbf16>
    %cst = arith.constant dense<0.000000e+00> : vector<8x256xf32>
    %45 = tpu.matmul %44, %43, %cst {dimension_numbers = #tpu.dot_dimension_numbers<[1], [0], [0], [1], [0, 0, 1, 1], [], []>} : vector<8x72xbf16>, vector<72x256xbf16>, vector<8x256xf32> -> vector<8x256xf32>
    %c0_21 = arith.constant 0 : index
    %c0_22 = arith.constant 0 : index
    %46 = vector.load %arg5[%c0_21, %c0_22] : memref<8x1xf32, #tpu.memory_space<vmem>>, vector<8x1xf32>
    %47 = vector.broadcast %46 : vector<8x1xf32> to vector<8x256xf32>
    %48 = arith.addf %45, %47 : vector<8x256xf32>
    %cst_23 = arith.constant dense<0.000000e+00> : vector<8xf32>
    %49 = vector.multi_reduction <add>, %48, %cst_23 [1] : vector<8x256xf32> to vector<8xf32>
    %50 = vector.shape_cast %49 : vector<8xf32> to vector<8x1xf32>
    %51 = arith.mulf %48, %48 : vector<8x256xf32>
    %cst_24 = arith.constant dense<0.000000e+00> : vector<8xf32>
    %52 = vector.multi_reduction <add>, %51, %cst_24 [1] : vector<8x256xf32> to vector<8xf32>
    %53 = vector.shape_cast %52 : vector<8xf32> to vector<8x1xf32>
    %cst_25 = arith.constant 3.906250e-03 : f32
    %54 = vector.broadcast %cst_25 : f32 to vector<8x1xf32>
    %55 = arith.mulf %50, %54 : vector<8x1xf32>
    %cst_26 = arith.constant 3.906250e-03 : f32
    %56 = vector.broadcast %cst_26 : f32 to vector<8x1xf32>
    %57 = arith.mulf %53, %56 : vector<8x1xf32>
    %58 = arith.mulf %55, %55 : vector<8x1xf32>
    %59 = arith.subf %57, %58 : vector<8x1xf32>
    %c0_27 = arith.constant 0 : index
    %c0_28 = arith.constant 0 : index
    %60 = vector.load %arg6[%c0_27, %c0_28] : memref<8x1xf32, #tpu.memory_space<vmem>>, vector<8x1xf32>
    %cst_29 = arith.constant 9.99999974E-6 : f32
    %61 = vector.broadcast %cst_29 : f32 to vector<8x1xf32>
    %62 = arith.addf %59, %61 : vector<8x1xf32>
    %63 = math.rsqrt %62 : vector<8x1xf32>
    %64 = arith.mulf %60, %63 : vector<8x1xf32>
    %c0_30 = arith.constant 0 : index
    %c0_31 = arith.constant 0 : index
    %65 = vector.load %arg7[%c0_30, %c0_31] : memref<8x1xf32, #tpu.memory_space<vmem>>, vector<8x1xf32>
    %66 = arith.mulf %55, %64 : vector<8x1xf32>
    %67 = arith.subf %65, %66 : vector<8x1xf32>
    %68 = vector.broadcast %64 : vector<8x1xf32> to vector<8x256xf32>
    %69 = arith.mulf %48, %68 : vector<8x256xf32>
    %70 = vector.broadcast %67 : vector<8x1xf32> to vector<8x256xf32>
    %71 = arith.addf %69, %70 : vector<8x256xf32>
    %cst_32 = arith.constant 5.000000e-01 : f32
    %72 = vector.broadcast %cst_32 : f32 to vector<8x256xf32>
    %73 = arith.mulf %72, %71 : vector<8x256xf32>
    %cst_33 = arith.constant 0.707106769 : f32
    %74 = vector.broadcast %cst_33 : f32 to vector<8x256xf32>
    %75 = arith.mulf %71, %74 : vector<8x256xf32>
    %76 = math.absf %75 : vector<8x256xf32>
    %cst_34 = arith.constant 0.327591091 : f32
    %77 = vector.broadcast %cst_34 : f32 to vector<8x256xf32>
    %78 = arith.mulf %77, %76 : vector<8x256xf32>
    %cst_35 = arith.constant 1.000000e+00 : f32
    %79 = vector.broadcast %cst_35 : f32 to vector<8x256xf32>
    %80 = arith.addf %79, %78 : vector<8x256xf32>
    %cst_36 = arith.constant 1.000000e+00 : f32
    %81 = vector.broadcast %cst_36 : f32 to vector<8x256xf32>
    %82 = arith.divf %81, %80 : vector<8x256xf32>
    %cst_37 = arith.constant 1.06140542 : f32
    %83 = vector.broadcast %cst_37 : f32 to vector<8x256xf32>
    %84 = arith.mulf %83, %82 : vector<8x256xf32>
    %cst_38 = arith.constant -1.45315206 : f32
    %85 = vector.broadcast %cst_38 : f32 to vector<8x256xf32>
    %86 = arith.addf %84, %85 : vector<8x256xf32>
    %87 = arith.mulf %86, %82 : vector<8x256xf32>
    %cst_39 = arith.constant 1.42141378 : f32
    %88 = vector.broadcast %cst_39 : f32 to vector<8x256xf32>
    %89 = arith.addf %87, %88 : vector<8x256xf32>
    %90 = arith.mulf %89, %82 : vector<8x256xf32>
    %cst_40 = arith.constant -0.284496725 : f32
    %91 = vector.broadcast %cst_40 : f32 to vector<8x256xf32>
    %92 = arith.addf %90, %91 : vector<8x256xf32>
    %93 = arith.mulf %92, %82 : vector<8x256xf32>
    %cst_41 = arith.constant 0.254829586 : f32
    %94 = vector.broadcast %cst_41 : f32 to vector<8x256xf32>
    %95 = arith.addf %93, %94 : vector<8x256xf32>
    %96 = arith.mulf %95, %82 : vector<8x256xf32>
    %cst_42 = arith.constant 0.000000e+00 : f32
    %97 = vector.broadcast %cst_42 : f32 to vector<8x256xf32>
    %98 = arith.subf %97, %76 : vector<8x256xf32>
    %99 = arith.mulf %98, %76 : vector<8x256xf32>
    %100 = math.exp %99 : vector<8x256xf32>
    %101 = arith.mulf %96, %100 : vector<8x256xf32>
    %cst_43 = arith.constant 1.000000e+00 : f32
    %102 = vector.broadcast %cst_43 : f32 to vector<8x256xf32>
    %103 = arith.subf %102, %101 : vector<8x256xf32>
    %cst_44 = arith.constant 0.000000e+00 : f32
    %104 = vector.broadcast %cst_44 : f32 to vector<8x256xf32>
    %105 = arith.cmpf olt, %75, %104 : vector<8x256xf32>
    %cst_45 = arith.constant 0.000000e+00 : f32
    %106 = vector.broadcast %cst_45 : f32 to vector<8x256xf32>
    %107 = arith.subf %106, %103 : vector<8x256xf32>
    %108 = arith.select %105, %107, %103 : vector<8x256xi1>, vector<8x256xf32>
    %cst_46 = arith.constant 1.000000e+00 : f32
    %109 = vector.broadcast %cst_46 : f32 to vector<8x256xf32>
    %110 = arith.addf %109, %108 : vector<8x256xf32>
    %111 = arith.mulf %73, %110 : vector<8x256xf32>
    %c17_i32_47 = arith.constant 17 : i32
    %112 = tpu.dynamic_rotate %111 by %c17_i32_47 dim 1 : vector<8x256xf32>, i32 -> vector<8x256xf32>
    %c0_48 = arith.constant 0 : index
    %c0_49 = arith.constant 0 : index
    %c0_50 = arith.constant 0 : index
    %113 = vector.load %arg2[%c0_48, %c0_49, %c0_50] : memref<9x1x256xf32, #tpu.memory_space<vmem>>, vector<1x1x256xf32>
    %114 = vector.shape_cast %113 : vector<1x1x256xf32> to vector<1x256xf32>
    %115 = vector.broadcast %114 : vector<1x256xf32> to vector<8x256xf32>
    %116 = arith.mulf %112, %115 : vector<8x256xf32>
    %c16_i32_51 = arith.constant 16 : i32
    %117 = tpu.dynamic_rotate %111 by %c16_i32_51 dim 1 : vector<8x256xf32>, i32 -> vector<8x256xf32>
    %c1_52 = arith.constant 1 : index
    %c0_53 = arith.constant 0 : index
    %c0_54 = arith.constant 0 : index
    %118 = vector.load %arg2[%c1_52, %c0_53, %c0_54] : memref<9x1x256xf32, #tpu.memory_space<vmem>>, vector<1x1x256xf32>
    %119 = vector.shape_cast %118 : vector<1x1x256xf32> to vector<1x256xf32>
    %120 = vector.broadcast %119 : vector<1x256xf32> to vector<8x256xf32>
    %121 = arith.mulf %117, %120 : vector<8x256xf32>
    %c15_i32_55 = arith.constant 15 : i32
    %122 = tpu.dynamic_rotate %111 by %c15_i32_55 dim 1 : vector<8x256xf32>, i32 -> vector<8x256xf32>
    %c2_56 = arith.constant 2 : index
    %c0_57 = arith.constant 0 : index
    %c0_58 = arith.constant 0 : index
    %123 = vector.load %arg2[%c2_56, %c0_57, %c0_58] : memref<9x1x256xf32, #tpu.memory_space<vmem>>, vector<1x1x256xf32>
    %124 = vector.shape_cast %123 : vector<1x1x256xf32> to vector<1x256xf32>
    %125 = vector.broadcast %124 : vector<1x256xf32> to vector<8x256xf32>
    %126 = arith.mulf %122, %125 : vector<8x256xf32>
    %c1_i32_59 = arith.constant 1 : i32
    %127 = tpu.dynamic_rotate %111 by %c1_i32_59 dim 1 : vector<8x256xf32>, i32 -> vector<8x256xf32>
    %c3_60 = arith.constant 3 : index
    %c0_61 = arith.constant 0 : index
    %c0_62 = arith.constant 0 : index
    %128 = vector.load %arg2[%c3_60, %c0_61, %c0_62] : memref<9x1x256xf32, #tpu.memory_space<vmem>>, vector<1x1x256xf32>
    %129 = vector.shape_cast %128 : vector<1x1x256xf32> to vector<1x256xf32>
    %130 = vector.broadcast %129 : vector<1x256xf32> to vector<8x256xf32>
    %131 = arith.mulf %127, %130 : vector<8x256xf32>
    %c255_i32_63 = arith.constant 255 : i32
    %132 = tpu.dynamic_rotate %111 by %c255_i32_63 dim 1 : vector<8x256xf32>, i32 -> vector<8x256xf32>
    %c5_64 = arith.constant 5 : index
    %c0_65 = arith.constant 0 : index
    %c0_66 = arith.constant 0 : index
    %133 = vector.load %arg2[%c5_64, %c0_65, %c0_66] : memref<9x1x256xf32, #tpu.memory_space<vmem>>, vector<1x1x256xf32>
    %134 = vector.shape_cast %133 : vector<1x1x256xf32> to vector<1x256xf32>
    %135 = vector.broadcast %134 : vector<1x256xf32> to vector<8x256xf32>
    %136 = arith.mulf %132, %135 : vector<8x256xf32>
    %c241_i32_67 = arith.constant 241 : i32
    %137 = tpu.dynamic_rotate %111 by %c241_i32_67 dim 1 : vector<8x256xf32>, i32 -> vector<8x256xf32>
    %c6_68 = arith.constant 6 : index
    %c0_69 = arith.constant 0 : index
    %c0_70 = arith.constant 0 : index
    %138 = vector.load %arg2[%c6_68, %c0_69, %c0_70] : memref<9x1x256xf32, #tpu.memory_space<vmem>>, vector<1x1x256xf32>
    %139 = vector.shape_cast %138 : vector<1x1x256xf32> to vector<1x256xf32>
    %140 = vector.broadcast %139 : vector<1x256xf32> to vector<8x256xf32>
    %141 = arith.mulf %137, %140 : vector<8x256xf32>
    %c240_i32_71 = arith.constant 240 : i32
    %142 = tpu.dynamic_rotate %111 by %c240_i32_71 dim 1 : vector<8x256xf32>, i32 -> vector<8x256xf32>
    %c7_72 = arith.constant 7 : index
    %c0_73 = arith.constant 0 : index
    %c0_74 = arith.constant 0 : index
    %143 = vector.load %arg2[%c7_72, %c0_73, %c0_74] : memref<9x1x256xf32, #tpu.memory_space<vmem>>, vector<1x1x256xf32>
    %144 = vector.shape_cast %143 : vector<1x1x256xf32> to vector<1x256xf32>
    %145 = vector.broadcast %144 : vector<1x256xf32> to vector<8x256xf32>
    %146 = arith.mulf %142, %145 : vector<8x256xf32>
    %c239_i32_75 = arith.constant 239 : i32
    %147 = tpu.dynamic_rotate %111 by %c239_i32_75 dim 1 : vector<8x256xf32>, i32 -> vector<8x256xf32>
    %c8_76 = arith.constant 8 : index
    %c0_77 = arith.constant 0 : index
    %c0_78 = arith.constant 0 : index
    %148 = vector.load %arg2[%c8_76, %c0_77, %c0_78] : memref<9x1x256xf32, #tpu.memory_space<vmem>>, vector<1x1x256xf32>
    %149 = vector.shape_cast %148 : vector<1x1x256xf32> to vector<1x256xf32>
    %150 = vector.broadcast %149 : vector<1x256xf32> to vector<8x256xf32>
    %151 = arith.mulf %147, %150 : vector<8x256xf32>
    %152 = tpu.concatenate %116, %121, %126, %131, %111, %136, %141, %146, %151 in 0 : vector<8x256xf32>, vector<8x256xf32>, vector<8x256xf32>, vector<8x256xf32>, vector<8x256xf32>, vector<8x256xf32>, vector<8x256xf32>, vector<8x256xf32>, vector<8x256xf32> -> vector<72x256xf32>
    %153 = arith.truncf %152 : vector<72x256xf32> to vector<72x256xbf16>
    %c0_79 = arith.constant 0 : index
    %c0_80 = arith.constant 0 : index
    %154 = vector.load %arg8[%c0_79, %c0_80] : memref<8x72xbf16, #tpu.memory_space<vmem>>, vector<8x72xbf16>
    %cst_81 = arith.constant dense<0.000000e+00> : vector<8x256xf32>
    %155 = tpu.matmul %154, %153, %cst_81 {dimension_numbers = #tpu.dot_dimension_numbers<[1], [0], [0], [1], [0, 0, 1, 1], [], []>} : vector<8x72xbf16>, vector<72x256xbf16>, vector<8x256xf32> -> vector<8x256xf32>
    %c0_82 = arith.constant 0 : index
    %c0_83 = arith.constant 0 : index
    %156 = vector.load %arg9[%c0_82, %c0_83] : memref<8x1xf32, #tpu.memory_space<vmem>>, vector<8x1xf32>
    %157 = vector.broadcast %156 : vector<8x1xf32> to vector<8x256xf32>
    %158 = arith.addf %155, %157 : vector<8x256xf32>
    %cst_84 = arith.constant dense<0.000000e+00> : vector<8xf32>
    %159 = vector.multi_reduction <add>, %158, %cst_84 [1] : vector<8x256xf32> to vector<8xf32>
    %160 = vector.shape_cast %159 : vector<8xf32> to vector<8x1xf32>
    %161 = arith.mulf %158, %158 : vector<8x256xf32>
    %cst_85 = arith.constant dense<0.000000e+00> : vector<8xf32>
    %162 = vector.multi_reduction <add>, %161, %cst_85 [1] : vector<8x256xf32> to vector<8xf32>
    %163 = vector.shape_cast %162 : vector<8xf32> to vector<8x1xf32>
    %cst_86 = arith.constant 3.906250e-03 : f32
    %164 = vector.broadcast %cst_86 : f32 to vector<8x1xf32>
    %165 = arith.mulf %160, %164 : vector<8x1xf32>
    %cst_87 = arith.constant 3.906250e-03 : f32
    %166 = vector.broadcast %cst_87 : f32 to vector<8x1xf32>
    %167 = arith.mulf %163, %166 : vector<8x1xf32>
    %168 = arith.mulf %165, %165 : vector<8x1xf32>
    %169 = arith.subf %167, %168 : vector<8x1xf32>
    %c0_88 = arith.constant 0 : index
    %c0_89 = arith.constant 0 : index
    %170 = vector.load %arg10[%c0_88, %c0_89] : memref<8x1xf32, #tpu.memory_space<vmem>>, vector<8x1xf32>
    %cst_90 = arith.constant 9.99999974E-6 : f32
    %171 = vector.broadcast %cst_90 : f32 to vector<8x1xf32>
    %172 = arith.addf %169, %171 : vector<8x1xf32>
    %173 = math.rsqrt %172 : vector<8x1xf32>
    %174 = arith.mulf %170, %173 : vector<8x1xf32>
    %c0_91 = arith.constant 0 : index
    %c0_92 = arith.constant 0 : index
    %175 = vector.load %arg11[%c0_91, %c0_92] : memref<8x1xf32, #tpu.memory_space<vmem>>, vector<8x1xf32>
    %176 = arith.mulf %165, %174 : vector<8x1xf32>
    %177 = arith.subf %175, %176 : vector<8x1xf32>
    %178 = vector.broadcast %174 : vector<8x1xf32> to vector<8x256xf32>
    %179 = arith.mulf %158, %178 : vector<8x256xf32>
    %180 = vector.broadcast %177 : vector<8x1xf32> to vector<8x256xf32>
    %181 = arith.addf %179, %180 : vector<8x256xf32>
    %cst_93 = arith.constant 5.000000e-01 : f32
    %182 = vector.broadcast %cst_93 : f32 to vector<8x256xf32>
    %183 = arith.mulf %182, %181 : vector<8x256xf32>
    %cst_94 = arith.constant 0.707106769 : f32
    %184 = vector.broadcast %cst_94 : f32 to vector<8x256xf32>
    %185 = arith.mulf %181, %184 : vector<8x256xf32>
    %186 = math.absf %185 : vector<8x256xf32>
    %cst_95 = arith.constant 0.327591091 : f32
    %187 = vector.broadcast %cst_95 : f32 to vector<8x256xf32>
    %188 = arith.mulf %187, %186 : vector<8x256xf32>
    %cst_96 = arith.constant 1.000000e+00 : f32
    %189 = vector.broadcast %cst_96 : f32 to vector<8x256xf32>
    %190 = arith.addf %189, %188 : vector<8x256xf32>
    %cst_97 = arith.constant 1.000000e+00 : f32
    %191 = vector.broadcast %cst_97 : f32 to vector<8x256xf32>
    %192 = arith.divf %191, %190 : vector<8x256xf32>
    %cst_98 = arith.constant 1.06140542 : f32
    %193 = vector.broadcast %cst_98 : f32 to vector<8x256xf32>
    %194 = arith.mulf %193, %192 : vector<8x256xf32>
    %cst_99 = arith.constant -1.45315206 : f32
    %195 = vector.broadcast %cst_99 : f32 to vector<8x256xf32>
    %196 = arith.addf %194, %195 : vector<8x256xf32>
    %197 = arith.mulf %196, %192 : vector<8x256xf32>
    %cst_100 = arith.constant 1.42141378 : f32
    %198 = vector.broadcast %cst_100 : f32 to vector<8x256xf32>
    %199 = arith.addf %197, %198 : vector<8x256xf32>
    %200 = arith.mulf %199, %192 : vector<8x256xf32>
    %cst_101 = arith.constant -0.284496725 : f32
    %201 = vector.broadcast %cst_101 : f32 to vector<8x256xf32>
    %202 = arith.addf %200, %201 : vector<8x256xf32>
    %203 = arith.mulf %202, %192 : vector<8x256xf32>
    %cst_102 = arith.constant 0.254829586 : f32
    %204 = vector.broadcast %cst_102 : f32 to vector<8x256xf32>
    %205 = arith.addf %203, %204 : vector<8x256xf32>
    %206 = arith.mulf %205, %192 : vector<8x256xf32>
    %cst_103 = arith.constant 0.000000e+00 : f32
    %207 = vector.broadcast %cst_103 : f32 to vector<8x256xf32>
    %208 = arith.subf %207, %186 : vector<8x256xf32>
    %209 = arith.mulf %208, %186 : vector<8x256xf32>
    %210 = math.exp %209 : vector<8x256xf32>
    %211 = arith.mulf %206, %210 : vector<8x256xf32>
    %cst_104 = arith.constant 1.000000e+00 : f32
    %212 = vector.broadcast %cst_104 : f32 to vector<8x256xf32>
    %213 = arith.subf %212, %211 : vector<8x256xf32>
    %cst_105 = arith.constant 0.000000e+00 : f32
    %214 = vector.broadcast %cst_105 : f32 to vector<8x256xf32>
    %215 = arith.cmpf olt, %185, %214 : vector<8x256xf32>
    %cst_106 = arith.constant 0.000000e+00 : f32
    %216 = vector.broadcast %cst_106 : f32 to vector<8x256xf32>
    %217 = arith.subf %216, %213 : vector<8x256xf32>
    %218 = arith.select %215, %217, %213 : vector<8x256xi1>, vector<8x256xf32>
    %cst_107 = arith.constant 1.000000e+00 : f32
    %219 = vector.broadcast %cst_107 : f32 to vector<8x256xf32>
    %220 = arith.addf %219, %218 : vector<8x256xf32>
    %221 = arith.mulf %183, %220 : vector<8x256xf32>
    %222 = arith.addf %1, %221 : vector<8x256xf32>
    %c0_108 = arith.constant 0 : index
    %c0_109 = arith.constant 0 : index
    %c0_110 = arith.constant 0 : index
    %223 = vector.load %arg12[%c0_108, %c0_109, %c0_110] : memref<2x8x256xf32, #tpu.memory_space<vmem>>, vector<1x8x256xf32>
    %224 = vector.shape_cast %223 : vector<1x8x256xf32> to vector<8x256xf32>
    %225 = vector.shape_cast %222 : vector<8x256xf32> to vector<1x8x256xf32>
    tpu.vector_store %arg12[%c0_108, %c0_109, %c0_110], %225 {strides = array<i32>} : memref<2x8x256xf32, #tpu.memory_space<vmem>>, vector<1x8x256xf32>,
    %c1_111 = arith.constant 1 : index
    %c0_112 = arith.constant 0 : index
    %c0_113 = arith.constant 0 : index
    %226 = vector.load %arg1[%c1_111, %c0_112, %c0_113] : memref<2x8x256xf32, #tpu.memory_space<vmem>>, vector<1x8x256xf32>
    %227 = vector.shape_cast %226 : vector<1x8x256xf32> to vector<8x256xf32>
    %c17_i32_114 = arith.constant 17 : i32
    %228 = tpu.dynamic_rotate %227 by %c17_i32_114 dim 1 : vector<8x256xf32>, i32 -> vector<8x256xf32>
    %c0_115 = arith.constant 0 : index
    %c0_116 = arith.constant 0 : index
    %c0_117 = arith.constant 0 : index
    %229 = vector.load %arg2[%c0_115, %c0_116, %c0_117] : memref<9x1x256xf32, #tpu.memory_space<vmem>>, vector<1x1x256xf32>
    %230 = vector.shape_cast %229 : vector<1x1x256xf32> to vector<1x256xf32>
    %231 = vector.broadcast %230 : vector<1x256xf32> to vector<8x256xf32>
    %232 = arith.mulf %228, %231 : vector<8x256xf32>
    %c16_i32_118 = arith.constant 16 : i32
    %233 = tpu.dynamic_rotate %227 by %c16_i32_118 dim 1 : vector<8x256xf32>, i32 -> vector<8x256xf32>
    %c1_119 = arith.constant 1 : index
    %c0_120 = arith.constant 0 : index
    %c0_121 = arith.constant 0 : index
    %234 = vector.load %arg2[%c1_119, %c0_120, %c0_121] : memref<9x1x256xf32, #tpu.memory_space<vmem>>, vector<1x1x256xf32>
    %235 = vector.shape_cast %234 : vector<1x1x256xf32> to vector<1x256xf32>
    %236 = vector.broadcast %235 : vector<1x256xf32> to vector<8x256xf32>
    %237 = arith.mulf %233, %236 : vector<8x256xf32>
    %c15_i32_122 = arith.constant 15 : i32
    %238 = tpu.dynamic_rotate %227 by %c15_i32_122 dim 1 : vector<8x256xf32>, i32 -> vector<8x256xf32>
    %c2_123 = arith.constant 2 : index
    %c0_124 = arith.constant 0 : index
    %c0_125 = arith.constant 0 : index
    %239 = vector.load %arg2[%c2_123, %c0_124, %c0_125] : memref<9x1x256xf32, #tpu.memory_space<vmem>>, vector<1x1x256xf32>
    %240 = vector.shape_cast %239 : vector<1x1x256xf32> to vector<1x256xf32>
    %241 = vector.broadcast %240 : vector<1x256xf32> to vector<8x256xf32>
    %242 = arith.mulf %238, %241 : vector<8x256xf32>
    %c1_i32_126 = arith.constant 1 : i32
    %243 = tpu.dynamic_rotate %227 by %c1_i32_126 dim 1 : vector<8x256xf32>, i32 -> vector<8x256xf32>
    %c3_127 = arith.constant 3 : index
    %c0_128 = arith.constant 0 : index
    %c0_129 = arith.constant 0 : index
    %244 = vector.load %arg2[%c3_127, %c0_128, %c0_129] : memref<9x1x256xf32, #tpu.memory_space<vmem>>, vector<1x1x256xf32>
    %245 = vector.shape_cast %244 : vector<1x1x256xf32> to vector<1x256xf32>
    %246 = vector.broadcast %245 : vector<1x256xf32> to vector<8x256xf32>
    %247 = arith.mulf %243, %246 : vector<8x256xf32>
    %c255_i32_130 = arith.constant 255 : i32
    %248 = tpu.dynamic_rotate %227 by %c255_i32_130 dim 1 : vector<8x256xf32>, i32 -> vector<8x256xf32>
    %c5_131 = arith.constant 5 : index
    %c0_132 = arith.constant 0 : index
    %c0_133 = arith.constant 0 : index
    %249 = vector.load %arg2[%c5_131, %c0_132, %c0_133] : memref<9x1x256xf32, #tpu.memory_space<vmem>>, vector<1x1x256xf32>
    %250 = vector.shape_cast %249 : vector<1x1x256xf32> to vector<1x256xf32>
    %251 = vector.broadcast %250 : vector<1x256xf32> to vector<8x256xf32>
    %252 = arith.mulf %248, %251 : vector<8x256xf32>
    %c241_i32_134 = arith.constant 241 : i32
    %253 = tpu.dynamic_rotate %227 by %c241_i32_134 dim 1 : vector<8x256xf32>, i32 -> vector<8x256xf32>
    %c6_135 = arith.constant 6 : index
    %c0_136 = arith.constant 0 : index
    %c0_137 = arith.constant 0 : index
    %254 = vector.load %arg2[%c6_135, %c0_136, %c0_137] : memref<9x1x256xf32, #tpu.memory_space<vmem>>, vector<1x1x256xf32>
    %255 = vector.shape_cast %254 : vector<1x1x256xf32> to vector<1x256xf32>
    %256 = vector.broadcast %255 : vector<1x256xf32> to vector<8x256xf32>
    %257 = arith.mulf %253, %256 : vector<8x256xf32>
    %c240_i32_138 = arith.constant 240 : i32
    %258 = tpu.dynamic_rotate %227 by %c240_i32_138 dim 1 : vector<8x256xf32>, i32 -> vector<8x256xf32>
    %c7_139 = arith.constant 7 : index
    %c0_140 = arith.constant 0 : index
    %c0_141 = arith.constant 0 : index
    %259 = vector.load %arg2[%c7_139, %c0_140, %c0_141] : memref<9x1x256xf32, #tpu.memory_space<vmem>>, vector<1x1x256xf32>
    %260 = vector.shape_cast %259 : vector<1x1x256xf32> to vector<1x256xf32>
    %261 = vector.broadcast %260 : vector<1x256xf32> to vector<8x256xf32>
    %262 = arith.mulf %258, %261 : vector<8x256xf32>
    %c239_i32_142 = arith.constant 239 : i32
    %263 = tpu.dynamic_rotate %227 by %c239_i32_142 dim 1 : vector<8x256xf32>, i32 -> vector<8x256xf32>
    %c8_143 = arith.constant 8 : index
    %c0_144 = arith.constant 0 : index
    %c0_145 = arith.constant 0 : index
    %264 = vector.load %arg2[%c8_143, %c0_144, %c0_145] : memref<9x1x256xf32, #tpu.memory_space<vmem>>, vector<1x1x256xf32>
    %265 = vector.shape_cast %264 : vector<1x1x256xf32> to vector<1x256xf32>
    %266 = vector.broadcast %265 : vector<1x256xf32> to vector<8x256xf32>
    %267 = arith.mulf %263, %266 : vector<8x256xf32>
    %268 = tpu.concatenate %232, %237, %242, %247, %227, %252, %257, %262, %267 in 0 : vector<8x256xf32>, vector<8x256xf32>, vector<8x256xf32>, vector<8x256xf32>, vector<8x256xf32>, vector<8x256xf32>, vector<8x256xf32>, vector<8x256xf32>, vector<8x256xf32> -> vector<72x256xf32>
    %269 = arith.truncf %268 : vector<72x256xf32> to vector<72x256xbf16>
    %c0_146 = arith.constant 0 : index
    %c0_147 = arith.constant 0 : index
    %270 = vector.load %arg4[%c0_146, %c0_147] : memref<8x72xbf16, #tpu.memory_space<vmem>>, vector<8x72xbf16>
    %cst_148 = arith.constant dense<0.000000e+00> : vector<8x256xf32>
    %271 = tpu.matmul %270, %269, %cst_148 {dimension_numbers = #tpu.dot_dimension_numbers<[1], [0], [0], [1], [0, 0, 1, 1], [], []>} : vector<8x72xbf16>, vector<72x256xbf16>, vector<8x256xf32> -> vector<8x256xf32>
    %c0_149 = arith.constant 0 : index
    %c0_150 = arith.constant 0 : index
    %272 = vector.load %arg5[%c0_149, %c0_150] : memref<8x1xf32, #tpu.memory_space<vmem>>, vector<8x1xf32>
    %273 = vector.broadcast %272 : vector<8x1xf32> to vector<8x256xf32>
    %274 = arith.addf %271, %273 : vector<8x256xf32>
    %cst_151 = arith.constant dense<0.000000e+00> : vector<8xf32>
    %275 = vector.multi_reduction <add>, %274, %cst_151 [1] : vector<8x256xf32> to vector<8xf32>
    %276 = vector.shape_cast %275 : vector<8xf32> to vector<8x1xf32>
    %277 = arith.mulf %274, %274 : vector<8x256xf32>
    %cst_152 = arith.constant dense<0.000000e+00> : vector<8xf32>
    %278 = vector.multi_reduction <add>, %277, %cst_152 [1] : vector<8x256xf32> to vector<8xf32>
    %279 = vector.shape_cast %278 : vector<8xf32> to vector<8x1xf32>
    %cst_153 = arith.constant 3.906250e-03 : f32
    %280 = vector.broadcast %cst_153 : f32 to vector<8x1xf32>
    %281 = arith.mulf %276, %280 : vector<8x1xf32>
    %cst_154 = arith.constant 3.906250e-03 : f32
    %282 = vector.broadcast %cst_154 : f32 to vector<8x1xf32>
    %283 = arith.mulf %279, %282 : vector<8x1xf32>
    %284 = arith.mulf %281, %281 : vector<8x1xf32>
    %285 = arith.subf %283, %284 : vector<8x1xf32>
    %c0_155 = arith.constant 0 : index
    %c0_156 = arith.constant 0 : index
    %286 = vector.load %arg6[%c0_155, %c0_156] : memref<8x1xf32, #tpu.memory_space<vmem>>, vector<8x1xf32>
    %cst_157 = arith.constant 9.99999974E-6 : f32
    %287 = vector.broadcast %cst_157 : f32 to vector<8x1xf32>
    %288 = arith.addf %285, %287 : vector<8x1xf32>
    %289 = math.rsqrt %288 : vector<8x1xf32>
    %290 = arith.mulf %286, %289 : vector<8x1xf32>
    %c0_158 = arith.constant 0 : index
    %c0_159 = arith.constant 0 : index
    %291 = vector.load %arg7[%c0_158, %c0_159] : memref<8x1xf32, #tpu.memory_space<vmem>>, vector<8x1xf32>
    %292 = arith.mulf %281, %290 : vector<8x1xf32>
    %293 = arith.subf %291, %292 : vector<8x1xf32>
    %294 = vector.broadcast %290 : vector<8x1xf32> to vector<8x256xf32>
    %295 = arith.mulf %274, %294 : vector<8x256xf32>
    %296 = vector.broadcast %293 : vector<8x1xf32> to vector<8x256xf32>
    %297 = arith.addf %295, %296 : vector<8x256xf32>
    %cst_160 = arith.constant 5.000000e-01 : f32
    %298 = vector.broadcast %cst_160 : f32 to vector<8x256xf32>
    %299 = arith.mulf %298, %297 : vector<8x256xf32>
    %cst_161 = arith.constant 0.707106769 : f32
    %300 = vector.broadcast %cst_161 : f32 to vector<8x256xf32>
    %301 = arith.mulf %297, %300 : vector<8x256xf32>
    %302 = math.absf %301 : vector<8x256xf32>
    %cst_162 = arith.constant 0.327591091 : f32
    %303 = vector.broadcast %cst_162 : f32 to vector<8x256xf32>
    %304 = arith.mulf %303, %302 : vector<8x256xf32>
    %cst_163 = arith.constant 1.000000e+00 : f32
    %305 = vector.broadcast %cst_163 : f32 to vector<8x256xf32>
    %306 = arith.addf %305, %304 : vector<8x256xf32>
    %cst_164 = arith.constant 1.000000e+00 : f32
    %307 = vector.broadcast %cst_164 : f32 to vector<8x256xf32>
    %308 = arith.divf %307, %306 : vector<8x256xf32>
    %cst_165 = arith.constant 1.06140542 : f32
    %309 = vector.broadcast %cst_165 : f32 to vector<8x256xf32>
    %310 = arith.mulf %309, %308 : vector<8x256xf32>
    %cst_166 = arith.constant -1.45315206 : f32
    %311 = vector.broadcast %cst_166 : f32 to vector<8x256xf32>
    %312 = arith.addf %310, %311 : vector<8x256xf32>
    %313 = arith.mulf %312, %308 : vector<8x256xf32>
    %cst_167 = arith.constant 1.42141378 : f32
    %314 = vector.broadcast %cst_167 : f32 to vector<8x256xf32>
    %315 = arith.addf %313, %314 : vector<8x256xf32>
    %316 = arith.mulf %315, %308 : vector<8x256xf32>
    %cst_168 = arith.constant -0.284496725 : f32
    %317 = vector.broadcast %cst_168 : f32 to vector<8x256xf32>
    %318 = arith.addf %316, %317 : vector<8x256xf32>
    %319 = arith.mulf %318, %308 : vector<8x256xf32>
    %cst_169 = arith.constant 0.254829586 : f32
    %320 = vector.broadcast %cst_169 : f32 to vector<8x256xf32>
    %321 = arith.addf %319, %320 : vector<8x256xf32>
    %322 = arith.mulf %321, %308 : vector<8x256xf32>
    %cst_170 = arith.constant 0.000000e+00 : f32
    %323 = vector.broadcast %cst_170 : f32 to vector<8x256xf32>
    %324 = arith.subf %323, %302 : vector<8x256xf32>
    %325 = arith.mulf %324, %302 : vector<8x256xf32>
    %326 = math.exp %325 : vector<8x256xf32>
    %327 = arith.mulf %322, %326 : vector<8x256xf32>
    %cst_171 = arith.constant 1.000000e+00 : f32
    %328 = vector.broadcast %cst_171 : f32 to vector<8x256xf32>
    %329 = arith.subf %328, %327 : vector<8x256xf32>
    %cst_172 = arith.constant 0.000000e+00 : f32
    %330 = vector.broadcast %cst_172 : f32 to vector<8x256xf32>
    %331 = arith.cmpf olt, %301, %330 : vector<8x256xf32>
    %cst_173 = arith.constant 0.000000e+00 : f32
    %332 = vector.broadcast %cst_173 : f32 to vector<8x256xf32>
    %333 = arith.subf %332, %329 : vector<8x256xf32>
    %334 = arith.select %331, %333, %329 : vector<8x256xi1>, vector<8x256xf32>
    %cst_174 = arith.constant 1.000000e+00 : f32
    %335 = vector.broadcast %cst_174 : f32 to vector<8x256xf32>
    %336 = arith.addf %335, %334 : vector<8x256xf32>
    %337 = arith.mulf %299, %336 : vector<8x256xf32>
    %c17_i32_175 = arith.constant 17 : i32
    %338 = tpu.dynamic_rotate %337 by %c17_i32_175 dim 1 : vector<8x256xf32>, i32 -> vector<8x256xf32>
    %c0_176 = arith.constant 0 : index
    %c0_177 = arith.constant 0 : index
    %c0_178 = arith.constant 0 : index
    %339 = vector.load %arg2[%c0_176, %c0_177, %c0_178] : memref<9x1x256xf32, #tpu.memory_space<vmem>>, vector<1x1x256xf32>
    %340 = vector.shape_cast %339 : vector<1x1x256xf32> to vector<1x256xf32>
    %341 = vector.broadcast %340 : vector<1x256xf32> to vector<8x256xf32>
    %342 = arith.mulf %338, %341 : vector<8x256xf32>
    %c16_i32_179 = arith.constant 16 : i32
    %343 = tpu.dynamic_rotate %337 by %c16_i32_179 dim 1 : vector<8x256xf32>, i32 -> vector<8x256xf32>
    %c1_180 = arith.constant 1 : index
    %c0_181 = arith.constant 0 : index
    %c0_182 = arith.constant 0 : index
    %344 = vector.load %arg2[%c1_180, %c0_181, %c0_182] : memref<9x1x256xf32, #tpu.memory_space<vmem>>, vector<1x1x256xf32>
    %345 = vector.shape_cast %344 : vector<1x1x256xf32> to vector<1x256xf32>
    %346 = vector.broadcast %345 : vector<1x256xf32> to vector<8x256xf32>
    %347 = arith.mulf %343, %346 : vector<8x256xf32>
    %c15_i32_183 = arith.constant 15 : i32
    %348 = tpu.dynamic_rotate %337 by %c15_i32_183 dim 1 : vector<8x256xf32>, i32 -> vector<8x256xf32>
    %c2_184 = arith.constant 2 : index
    %c0_185 = arith.constant 0 : index
    %c0_186 = arith.constant 0 : index
    %349 = vector.load %arg2[%c2_184, %c0_185, %c0_186] : memref<9x1x256xf32, #tpu.memory_space<vmem>>, vector<1x1x256xf32>
    %350 = vector.shape_cast %349 : vector<1x1x256xf32> to vector<1x256xf32>
    %351 = vector.broadcast %350 : vector<1x256xf32> to vector<8x256xf32>
    %352 = arith.mulf %348, %351 : vector<8x256xf32>
    %c1_i32_187 = arith.constant 1 : i32
    %353 = tpu.dynamic_rotate %337 by %c1_i32_187 dim 1 : vector<8x256xf32>, i32 -> vector<8x256xf32>
    %c3_188 = arith.constant 3 : index
    %c0_189 = arith.constant 0 : index
    %c0_190 = arith.constant 0 : index
    %354 = vector.load %arg2[%c3_188, %c0_189, %c0_190] : memref<9x1x256xf32, #tpu.memory_space<vmem>>, vector<1x1x256xf32>
    %355 = vector.shape_cast %354 : vector<1x1x256xf32> to vector<1x256xf32>
    %356 = vector.broadcast %355 : vector<1x256xf32> to vector<8x256xf32>
    %357 = arith.mulf %353, %356 : vector<8x256xf32>
    %c255_i32_191 = arith.constant 255 : i32
    %358 = tpu.dynamic_rotate %337 by %c255_i32_191 dim 1 : vector<8x256xf32>, i32 -> vector<8x256xf32>
    %c5_192 = arith.constant 5 : index
    %c0_193 = arith.constant 0 : index
    %c0_194 = arith.constant 0 : index
    %359 = vector.load %arg2[%c5_192, %c0_193, %c0_194] : memref<9x1x256xf32, #tpu.memory_space<vmem>>, vector<1x1x256xf32>
    %360 = vector.shape_cast %359 : vector<1x1x256xf32> to vector<1x256xf32>
    %361 = vector.broadcast %360 : vector<1x256xf32> to vector<8x256xf32>
    %362 = arith.mulf %358, %361 : vector<8x256xf32>
    %c241_i32_195 = arith.constant 241 : i32
    %363 = tpu.dynamic_rotate %337 by %c241_i32_195 dim 1 : vector<8x256xf32>, i32 -> vector<8x256xf32>
    %c6_196 = arith.constant 6 : index
    %c0_197 = arith.constant 0 : index
    %c0_198 = arith.constant 0 : index
    %364 = vector.load %arg2[%c6_196, %c0_197, %c0_198] : memref<9x1x256xf32, #tpu.memory_space<vmem>>, vector<1x1x256xf32>
    %365 = vector.shape_cast %364 : vector<1x1x256xf32> to vector<1x256xf32>
    %366 = vector.broadcast %365 : vector<1x256xf32> to vector<8x256xf32>
    %367 = arith.mulf %363, %366 : vector<8x256xf32>
    %c240_i32_199 = arith.constant 240 : i32
    %368 = tpu.dynamic_rotate %337 by %c240_i32_199 dim 1 : vector<8x256xf32>, i32 -> vector<8x256xf32>
    %c7_200 = arith.constant 7 : index
    %c0_201 = arith.constant 0 : index
    %c0_202 = arith.constant 0 : index
    %369 = vector.load %arg2[%c7_200, %c0_201, %c0_202] : memref<9x1x256xf32, #tpu.memory_space<vmem>>, vector<1x1x256xf32>
    %370 = vector.shape_cast %369 : vector<1x1x256xf32> to vector<1x256xf32>
    %371 = vector.broadcast %370 : vector<1x256xf32> to vector<8x256xf32>
    %372 = arith.mulf %368, %371 : vector<8x256xf32>
    %c239_i32_203 = arith.constant 239 : i32
    %373 = tpu.dynamic_rotate %337 by %c239_i32_203 dim 1 : vector<8x256xf32>, i32 -> vector<8x256xf32>
    %c8_204 = arith.constant 8 : index
    %c0_205 = arith.constant 0 : index
    %c0_206 = arith.constant 0 : index
    %374 = vector.load %arg2[%c8_204, %c0_205, %c0_206] : memref<9x1x256xf32, #tpu.memory_space<vmem>>, vector<1x1x256xf32>
    %375 = vector.shape_cast %374 : vector<1x1x256xf32> to vector<1x256xf32>
    %376 = vector.broadcast %375 : vector<1x256xf32> to vector<8x256xf32>
    %377 = arith.mulf %373, %376 : vector<8x256xf32>
    %378 = tpu.concatenate %342, %347, %352, %357, %337, %362, %367, %372, %377 in 0 : vector<8x256xf32>, vector<8x256xf32>, vector<8x256xf32>, vector<8x256xf32>, vector<8x256xf32>, vector<8x256xf32>, vector<8x256xf32>, vector<8x256xf32>, vector<8x256xf32> -> vector<72x256xf32>
    %379 = arith.truncf %378 : vector<72x256xf32> to vector<72x256xbf16>
    %c0_207 = arith.constant 0 : index
    %c0_208 = arith.constant 0 : index
    %380 = vector.load %arg8[%c0_207, %c0_208] : memref<8x72xbf16, #tpu.memory_space<vmem>>, vector<8x72xbf16>
    %cst_209 = arith.constant dense<0.000000e+00> : vector<8x256xf32>
    %381 = tpu.matmul %380, %379, %cst_209 {dimension_numbers = #tpu.dot_dimension_numbers<[1], [0], [0], [1], [0, 0, 1, 1], [], []>} : vector<8x72xbf16>, vector<72x256xbf16>, vector<8x256xf32> -> vector<8x256xf32>
    %c0_210 = arith.constant 0 : index
    %c0_211 = arith.constant 0 : index
    %382 = vector.load %arg9[%c0_210, %c0_211] : memref<8x1xf32, #tpu.memory_space<vmem>>, vector<8x1xf32>
    %383 = vector.broadcast %382 : vector<8x1xf32> to vector<8x256xf32>
    %384 = arith.addf %381, %383 : vector<8x256xf32>
    %cst_212 = arith.constant dense<0.000000e+00> : vector<8xf32>
    %385 = vector.multi_reduction <add>, %384, %cst_212 [1] : vector<8x256xf32> to vector<8xf32>
    %386 = vector.shape_cast %385 : vector<8xf32> to vector<8x1xf32>
    %387 = arith.mulf %384, %384 : vector<8x256xf32>
    %cst_213 = arith.constant dense<0.000000e+00> : vector<8xf32>
    %388 = vector.multi_reduction <add>, %387, %cst_213 [1] : vector<8x256xf32> to vector<8xf32>
    %389 = vector.shape_cast %388 : vector<8xf32> to vector<8x1xf32>
    %cst_214 = arith.constant 3.906250e-03 : f32
    %390 = vector.broadcast %cst_214 : f32 to vector<8x1xf32>
    %391 = arith.mulf %386, %390 : vector<8x1xf32>
    %cst_215 = arith.constant 3.906250e-03 : f32
    %392 = vector.broadcast %cst_215 : f32 to vector<8x1xf32>
    %393 = arith.mulf %389, %392 : vector<8x1xf32>
    %394 = arith.mulf %391, %391 : vector<8x1xf32>
    %395 = arith.subf %393, %394 : vector<8x1xf32>
    %c0_216 = arith.constant 0 : index
    %c0_217 = arith.constant 0 : index
    %396 = vector.load %arg10[%c0_216, %c0_217] : memref<8x1xf32, #tpu.memory_space<vmem>>, vector<8x1xf32>
    %cst_218 = arith.constant 9.99999974E-6 : f32
    %397 = vector.broadcast %cst_218 : f32 to vector<8x1xf32>
    %398 = arith.addf %395, %397 : vector<8x1xf32>
    %399 = math.rsqrt %398 : vector<8x1xf32>
    %400 = arith.mulf %396, %399 : vector<8x1xf32>
    %c0_219 = arith.constant 0 : index
    %c0_220 = arith.constant 0 : index
    %401 = vector.load %arg11[%c0_219, %c0_220] : memref<8x1xf32, #tpu.memory_space<vmem>>, vector<8x1xf32>
    %402 = arith.mulf %391, %400 : vector<8x1xf32>
    %403 = arith.subf %401, %402 : vector<8x1xf32>
    %404 = vector.broadcast %400 : vector<8x1xf32> to vector<8x256xf32>
    %405 = arith.mulf %384, %404 : vector<8x256xf32>
    %406 = vector.broadcast %403 : vector<8x1xf32> to vector<8x256xf32>
    %407 = arith.addf %405, %406 : vector<8x256xf32>
    %cst_221 = arith.constant 5.000000e-01 : f32
    %408 = vector.broadcast %cst_221 : f32 to vector<8x256xf32>
    %409 = arith.mulf %408, %407 : vector<8x256xf32>
    %cst_222 = arith.constant 0.707106769 : f32
    %410 = vector.broadcast %cst_222 : f32 to vector<8x256xf32>
    %411 = arith.mulf %407, %410 : vector<8x256xf32>
    %412 = math.absf %411 : vector<8x256xf32>
    %cst_223 = arith.constant 0.327591091 : f32
    %413 = vector.broadcast %cst_223 : f32 to vector<8x256xf32>
    %414 = arith.mulf %413, %412 : vector<8x256xf32>
    %cst_224 = arith.constant 1.000000e+00 : f32
    %415 = vector.broadcast %cst_224 : f32 to vector<8x256xf32>
    %416 = arith.addf %415, %414 : vector<8x256xf32>
    %cst_225 = arith.constant 1.000000e+00 : f32
    %417 = vector.broadcast %cst_225 : f32 to vector<8x256xf32>
    %418 = arith.divf %417, %416 : vector<8x256xf32>
    %cst_226 = arith.constant 1.06140542 : f32
    %419 = vector.broadcast %cst_226 : f32 to vector<8x256xf32>
    %420 = arith.mulf %419, %418 : vector<8x256xf32>
    %cst_227 = arith.constant -1.45315206 : f32
    %421 = vector.broadcast %cst_227 : f32 to vector<8x256xf32>
    %422 = arith.addf %420, %421 : vector<8x256xf32>
    %423 = arith.mulf %422, %418 : vector<8x256xf32>
    %cst_228 = arith.constant 1.42141378 : f32
    %424 = vector.broadcast %cst_228 : f32 to vector<8x256xf32>
    %425 = arith.addf %423, %424 : vector<8x256xf32>
    %426 = arith.mulf %425, %418 : vector<8x256xf32>
    %cst_229 = arith.constant -0.284496725 : f32
    %427 = vector.broadcast %cst_229 : f32 to vector<8x256xf32>
    %428 = arith.addf %426, %427 : vector<8x256xf32>
    %429 = arith.mulf %428, %418 : vector<8x256xf32>
    %cst_230 = arith.constant 0.254829586 : f32
    %430 = vector.broadcast %cst_230 : f32 to vector<8x256xf32>
    %431 = arith.addf %429, %430 : vector<8x256xf32>
    %432 = arith.mulf %431, %418 : vector<8x256xf32>
    %cst_231 = arith.constant 0.000000e+00 : f32
    %433 = vector.broadcast %cst_231 : f32 to vector<8x256xf32>
    %434 = arith.subf %433, %412 : vector<8x256xf32>
    %435 = arith.mulf %434, %412 : vector<8x256xf32>
    %436 = math.exp %435 : vector<8x256xf32>
    %437 = arith.mulf %432, %436 : vector<8x256xf32>
    %cst_232 = arith.constant 1.000000e+00 : f32
    %438 = vector.broadcast %cst_232 : f32 to vector<8x256xf32>
    %439 = arith.subf %438, %437 : vector<8x256xf32>
    %cst_233 = arith.constant 0.000000e+00 : f32
    %440 = vector.broadcast %cst_233 : f32 to vector<8x256xf32>
    %441 = arith.cmpf olt, %411, %440 : vector<8x256xf32>
    %cst_234 = arith.constant 0.000000e+00 : f32
    %442 = vector.broadcast %cst_234 : f32 to vector<8x256xf32>
    %443 = arith.subf %442, %439 : vector<8x256xf32>
    %444 = arith.select %441, %443, %439 : vector<8x256xi1>, vector<8x256xf32>
    %cst_235 = arith.constant 1.000000e+00 : f32
    %445 = vector.broadcast %cst_235 : f32 to vector<8x256xf32>
    %446 = arith.addf %445, %444 : vector<8x256xf32>
    %447 = arith.mulf %409, %446 : vector<8x256xf32>
    %448 = arith.addf %227, %447 : vector<8x256xf32>
    %c1_236 = arith.constant 1 : index
    %c0_237 = arith.constant 0 : index
    %c0_238 = arith.constant 0 : index
    %449 = vector.load %arg12[%c1_236, %c0_237, %c0_238] : memref<2x8x256xf32, #tpu.memory_space<vmem>>, vector<1x8x256xf32>
    %450 = vector.shape_cast %449 : vector<1x8x256xf32> to vector<8x256xf32>
    %451 = vector.shape_cast %448 : vector<8x256xf32> to vector<1x8x256xf32>
    tpu.vector_store %arg12[%c1_236, %c0_237, %c0_238], %451 {strides = array<i32>} : memref<2x8x256xf32, #tpu.memory_space<vmem>>, vector<1x8x256xf32>,
    return
  }
  func.func @transform_0(%arg0: i32) -> (i32, i32, i32) {
    %c0_i32 = arith.constant 0 : i32
    %c0_i32_0 = arith.constant 0 : i32
    %c0_i32_1 = arith.constant 0 : i32
    return %arg0, %c0_i32, %c0_i32_0 : i32, i32, i32
  }
  func.func @transform_1(%arg0: i32) -> (i32, i32, i32) {
    %c0_i32 = arith.constant 0 : i32
    %c0_i32_0 = arith.constant 0 : i32
    %c0_i32_1 = arith.constant 0 : i32
    %c0_i32_2 = arith.constant 0 : i32
    return %c0_i32, %c0_i32_0, %c0_i32_1 : i32, i32, i32
  }
  func.func @transform_2(%arg0: i32) -> (i32, i32) {
    %c0_i32 = arith.constant 0 : i32
    %c0_i32_0 = arith.constant 0 : i32
    %c0_i32_1 = arith.constant 0 : i32
    return %c0_i32, %c0_i32_0 : i32, i32
  }
  func.func @transform_3(%arg0: i32) -> (i32, i32) {
    %c0_i32 = arith.constant 0 : i32
    %c0_i32_0 = arith.constant 0 : i32
    %c0_i32_1 = arith.constant 0 : i32
    return %c0_i32, %c0_i32_0 : i32, i32
  }
  func.func @transform_4(%arg0: i32) -> (i32, i32) {
    %c0_i32 = arith.constant 0 : i32
    %c0_i32_0 = arith.constant 0 : i32
    %c0_i32_1 = arith.constant 0 : i32
    return %c0_i32, %c0_i32_0 : i32, i32
  }
  func.func @transform_5(%arg0: i32) -> (i32, i32) {
    %c0_i32 = arith.constant 0 : i32
    %c0_i32_0 = arith.constant 0 : i32
    %c0_i32_1 = arith.constant 0 : i32
    return %c0_i32, %c0_i32_0 : i32, i32
  }
  func.func @transform_6(%arg0: i32) -> (i32, i32) {
    %c0_i32 = arith.constant 0 : i32
    %c0_i32_0 = arith.constant 0 : i32
    %c0_i32_1 = arith.constant 0 : i32
    return %c0_i32, %c0_i32_0 : i32, i32
  }
  func.func @transform_7(%arg0: i32) -> (i32, i32) {
    %c0_i32 = arith.constant 0 : i32
    %c0_i32_0 = arith.constant 0 : i32
    %c0_i32_1 = arith.constant 0 : i32
    return %c0_i32, %c0_i32_0 : i32, i32
  }
  func.func @transform_8(%arg0: i32) -> (i32, i32) {
    %c0_i32 = arith.constant 0 : i32
    %c0_i32_0 = arith.constant 0 : i32
    %c0_i32_1 = arith.constant 0 : i32
    return %c0_i32, %c0_i32_0 : i32, i32
  }
  func.func @transform_9(%arg0: i32) -> (i32, i32) {
    %c0_i32 = arith.constant 0 : i32
    %c0_i32_0 = arith.constant 0 : i32
    %c0_i32_1 = arith.constant 0 : i32
    return %c0_i32, %c0_i32_0 : i32, i32
  }
  func.func @transform_10(%arg0: i32) -> (i32, i32) {
    %c0_i32 = arith.constant 0 : i32
    %c0_i32_0 = arith.constant 0 : i32
    %c0_i32_1 = arith.constant 0 : i32
    return %c0_i32, %c0_i32_0 : i32, i32
  }
  func.func @transform_11(%arg0: i32) -> (i32, i32, i32) {
    %c0_i32 = arith.constant 0 : i32
    %c0_i32_0 = arith.constant 0 : i32
    %c0_i32_1 = arith.constant 0 : i32
    return %arg0, %c0_i32, %c0_i32_0 : i32, i32, i32
  }
}

</mosaic_0001>

<bundles_post_ra>
// kernel: res_block_forward.1
= control target key start
LH: loop header
LB: loop body
LE: loop exit
PB: predicated region body
PF: predicated region fallthrough
CT: control target
= control target key end

     0   :  { %s1221_s18 = smov 113   ;;  %s1222_s19 = smov 111   ;;  %v1227_v2 = vmov 0   ;;  %v45_v6 = vlaneseq  ;;  %vm239_vm3 = vcmask 1043456   ;;  %vm235_vm9 = vcmask 588800   ;;  %s1952_s0 = inlined_call_operand.vmem [shape: f32[2,8,256], index: 0, kind: input, shape index: {}]   ;;  %s1953_s2 = inlined_call_operand.vmem [shape: f32[8,8], index: 2, kind: input, shape index: {}]   ;;  %s1954_s4 = inlined_call_operand.vmem [shape: f32[8,1], index: 4, kind: input, shape index: {}]   ;;  %s1955_s1 = inlined_call_operand.vmem [shape: f32[9,1,256], index: 1, kind: input, shape index: {}]   ;;  %s1956_s3 = inlined_call_operand.vmem [shape: bf16[8,72], index: 3, kind: input, shape index: {}]   ;;  %s1957_s5 = inlined_call_operand.vmem [shape: f32[8,1], index: 5, kind: input, shape index: {}]   ;;  %s1958_s6 = inlined_call_operand.vmem [shape: f32[8,1], index: 6, kind: input, shape index: {}]   ;;  %s1959_s8 = inlined_call_operand.vmem [shape: f32[8,1], index: 8, kind: input, shape index: {}]   ;;  %s1960_s7 = inlined_call_operand.vmem [shape: bf16[8,72], index: 7, kind: input, shape index: {}]   ;;  %s1961_s9 = inlined_call_operand.vmem [shape: f32[8,1], index: 9, kind: input, shape index: {}]   ;;  %s1962_s10 = inlined_call_operand.vmem [shape: f32[8,1], index: 10, kind: input, shape index: {}]   ;;  %s1963_s11 = inlined_call_operand.vmem [shape: f32[2,8,256], index: 11, kind: output, shape index: {}]  }
   0x1   :  { %v1293_v0 = vld [vmem:[%s1952_s0] sm:$0xff]  ;;  %v1302_v1 = vld [vmem:[%s1952_s0 + $0x8] sm:$0xff]  ;;  %s1223_s22 = smov 112   ;;  %s1224_s23 = smov 127   ;;  %278 = vmatprep.mubr.bf16.mxu0 %v1227_v2  ;;  %1175 = vset.pattern.permute.xlu0 %v1227_v2  ;;  %v1339_v3 = vld [vmem:[%s1952_s0 + $0x18] sm:$0xff] }
   0x2   :  { %152 = vrot.lane.b32.xlu1 %v1293_v0, %s1221_s18  ;;  %196 = vrot.lane.b32.xlu0 %v1293_v0, %s1222_s19  ;;  %s1225_s24 = smov 15   ;;  %s1226_s25 = smov 1   ;;  %v1344_v4 = vld [vmem:[%s1952_s0 + $0x10] sm:$0xff]  ;;  %v229_v5 = vld [vmem:[%s1954_s4] sm:$0xff]  ;;  %v53_v7 = vshrl.u32 %v45_v6, 7  ;;  %v1381_v8 = vand.u32 127, %v45_v6 }
   0x3   :  { %s1228_s26 = smov 17   ;;  %1176 = vset.pattern.permute.xlu1 %v1227_v2  ;;  %496 = vmatprep.mubr.bf16.mxu1 %v1227_v2  ;;  %s1229_s27 = smov 16   ;;  %v1146_v11 = vld [vmem:[%s1955_s1 + $0x10] sm:$0x3]  ;;  %v1144_v14 = vld [vmem:[%s1955_s1 + $0xc] sm:$0x3] }
   0x4   :  { %v1383_v9 = vsub.s32 0, %v53_v7  ;;  %v1385_v10 = vsub.s32 1, %v53_v7  ;;  %vm200_vm0 = vcmp.lt.s32.totalorder %v1381_v8, 111  ;;  %v1145_v16 = vld [vmem:[%s1955_s1 + $0xe] sm:$0x3]  ;;  %vm156_vm1 = vcmp.lt.s32.totalorder %v1381_v8, 113 }
   0x5   :  { %vm178_vm2 = vcmp.lt.s32.totalorder %v1381_v8, 112  ;;  %v1143_v25 = vld [vmem:[%s1955_s1 + $0xa] sm:$0x3]  ;;  %vm134_vm4 = vcmp.lt.s32.totalorder %v1381_v8, 127  ;;  %v1141_v52 = vld [vmem:[%s1955_s1 + $0x4] sm:$0x3] }
   0x6   :  { %154 = vrot.lane.b32.xlu1 %v1302_v1, %s1221_s18  ;;  %198 = vrot.lane.b32.xlu0 %v1302_v1, %s1222_s19  ;;  %v1395_v15 = vrot.slane %v1146_v11, %v1383_v9  ;;  %v1401_v17 = vrot.slane %v1146_v11, %v1385_v10  ;;  %v1405_v18 = vrot.slane %v1144_v14, %v1383_v9  ;;  %v1142_v53 = vld [vmem:[%s1955_s1 + $0x6] sm:$0x3]  ;;  %vm90_vm5 = vcmp.lt.s32.totalorder %v1381_v8, 15 }
   0x7   :  { %v1409_v21 = vrot.slane %v1144_v14, %v1385_v10  ;;  %v1416_v24 = vrot.slane %v1145_v16, %v1383_v9  ;;  %v1425_v28 = vrot.slane %v1145_v16, %v1385_v10  ;;  %v1432_v35 = vrot.slane %v1143_v25, %v1383_v9  ;;  %v50_v14 = vld [vmem:[%s1955_s1] sm:$0x3]  ;;  %v1140_v16 = vld [vmem:[%s1955_s1 + $0x2] sm:$0x3] }
   0x8   :  { %v1440_v39 = vrot.slane %v1143_v25, %v1385_v10  ;;  %v1463_v58 = vrot.slane %v1141_v52, %v1383_v9  ;;  %v1466_v59 = vrot.slane %v1141_v52, %v1385_v10  ;;  %vm112_vm6 = vcmp.lt.s32.totalorder %v1381_v8, 1 }
   0x9   :  { %v1470_v60 = vrot.slane %v1142_v53, %v1383_v9  ;;  %v1473_v61 = vrot.slane %v1142_v53, %v1385_v10  ;;  %vm47_vm7 = vcmp.lt.s32.totalorder %v1381_v8, 17  ;;  %v1495_v25 = vrot.slane %v50_v14, %v1383_v9  ;;  %v1157_v53 = vld [vmem:[%s1955_s1 + $0xc] sm:$0x3] }
   0xa   :  { %176 = vrot.lane.b32.xlu1 %v1302_v1, %s1223_s22  ;;  %174 = vrot.lane.b32.xlu0 %v1293_v0, %s1223_s22  ;;  %vm68_vm8 = vcmp.lt.s32.totalorder %v1381_v8, 16 }
   0xe   :  { %132 = vrot.lane.b32.xlu1 %v1302_v1, %s1224_s23  ;;  %130 = vrot.lane.b32.xlu0 %v1293_v0, %s1224_s23 }
  0x12   :  { %88 = vrot.lane.b32.xlu1 %v1302_v1, %s1225_s24  ;;  %86 = vrot.lane.b32.xlu0 %v1293_v0, %s1225_s24 }
  0x16   :  { %110 = vrot.lane.b32.xlu1 %v1302_v1, %s1226_s25  ;;  %108 = vrot.lane.b32.xlu0 %v1293_v0, %s1226_s25 }
  0x1a   :  { %43 = vrot.lane.b32.xlu1 %v1302_v1, %s1228_s26  ;;  %41 = vrot.lane.b32.xlu0 %v1293_v0, %s1228_s26 }
  0x1e   :  { %66 = vrot.lane.b32.xlu1 %v1302_v1, %s1229_s27  ;;  %64 = vrot.lane.b32.xlu0 %v1293_v0, %s1229_s27 }
  0x22   :  { %741 = vrot.lane.b32.xlu1 %v1339_v3, %s1222_s19  ;;  %739 = vrot.lane.b32.xlu0 %v1344_v4, %s1222_s19 }
  0x26   :  { %701 = vrot.lane.b32.xlu1 %v1339_v3, %s1221_s18  ;;  %699 = vrot.lane.b32.xlu0 %v1344_v4, %s1221_s18 }
  0x2a   :  { %721 = vrot.lane.b32.xlu1 %v1339_v3, %s1223_s22  ;;  %719 = vrot.lane.b32.xlu0 %v1344_v4, %s1223_s22 }
  0x2e   :  { %681 = vrot.lane.b32.xlu1 %v1339_v3, %s1224_s23  ;;  %679 = vrot.lane.b32.xlu0 %v1344_v4, %s1224_s23 }
  0x32   :  { %641 = vrot.lane.b32.xlu1 %v1339_v3, %s1225_s24  ;;  %639 = vrot.lane.b32.xlu0 %v1344_v4, %s1225_s24 }
  0x36   :  { %661 = vrot.lane.b32.xlu1 %v1339_v3, %s1226_s25  ;;  %659 = vrot.lane.b32.xlu0 %v1344_v4, %s1226_s25 }
  0x3a   :  { %601 = vrot.lane.b32.xlu1 %v1339_v3, %s1228_s26  ;;  %599 = vrot.lane.b32.xlu0 %v1344_v4, %s1228_s26 }
  0x3e   :  { %621 = vrot.lane.b32.xlu1 %v1339_v3, %s1229_s27  ;;  %619 = vrot.lane.b32.xlu0 %v1344_v4, %s1229_s27 }
  0x42   :  { %232 = vperm.xlu0 %1175, %v229_v5   ;;  %773 = vperm.xlu1 %1176, %v229_v5  }
  0x74   :  { %v153_v12 = vpop.permute.xlu1 %152  ;;  %v197_v13 = vpop.permute.xlu0 %196 }
  0x78   :  { %v155_v19 = vpop.permute.xlu1 %154  ;;  %v199_v20 = vpop.permute.xlu0 %198 }
  0x79   :  { %v201_v22 = vsel %vm200_vm0, %v197_v13, %v199_v20  ;;  %v202_v23 = vsel %vm200_vm0, %v199_v20, %v197_v13  ;;  %v157_v26 = vsel %vm156_vm1, %v153_v12, %v155_v19  ;;  %v158_v30 = vsel %vm156_vm1, %v155_v19, %v153_v12 }
  0x7a   :  { %v216_v27 = vmul.f32 %v1395_v15, %v201_v22  ;;  %v217_v29 = vmul.f32 %v1401_v17, %v202_v23  ;;  %v172_v36 = vmul.f32 %v1405_v18, %v157_v26  ;;  %v173_v40 = vmul.f32 %v1409_v21, %v158_v30  ;;  %v1159_v30 = vld [vmem:[%s1955_s1 + $0x10] sm:$0x3] }
  0x7b   :  { %v1498_v26 = vrot.slane %v50_v14, %v1385_v10 }
  0x7c   :  { %v177_v31 = vpop.permute.xlu1 %176  ;;  %v175_v32 = vpop.permute.xlu0 %174  ;;  %v227_v33 = vpack.c.bf16 %v217_v29, %v217_v29  ;;  %v226_v34 = vpack.c.bf16 %v216_v27, %v216_v27  ;;  %v1502_v27 = vrot.slane %v1140_v16, %v1383_v9  ;;  %v1505_v29 = vrot.slane %v1140_v16, %v1385_v10 }
  0x7d   :  { %v179_v37 = vsel %vm178_vm2, %v175_v32, %v177_v31  ;;  %v180_v38 = vsel %vm178_vm2, %v177_v31, %v175_v32 }
  0x7e   :  { %v194_v41 = vmul.f32 %v1416_v24, %v179_v37  ;;  %v195_v42 = vmul.f32 %v1425_v28, %v180_v38  ;;  %1147 = vmatprep.subr.msk.bf16.mxu0 %vm239_vm3, %v227_v33  ;;  %v241_v43 = vsel %vm239_vm3, %v226_v34, 0  ;;  %v1519_v38 = vrot.slane %v1159_v30, %v1383_v9 }
  0x7f   :  { %253 = vmatpush1.bf16.msra.mxu0 %v241_v43 }
  0x80   :  { %v133_v44 = vpop.permute.xlu1 %132  ;;  %v131_v45 = vpop.permute.xlu0 %130  ;;  %v225_v46 = vpack.c.bf16 %v195_v42, %v173_v40  ;;  %v224_v47 = vpack.c.bf16 %v194_v41, %v172_v36  ;;  %v1522_v40 = vrot.slane %v1159_v30, %v1385_v10 }
  0x81   :  { %v135_v48 = vsel %vm134_vm4, %v131_v45, %v133_v44  ;;  %v136_v49 = vsel %vm134_vm4, %v133_v44, %v131_v45 }
  0x82   :  { %v150_v50 = vmul.f32 %v1432_v35, %v135_v48  ;;  %v151_v51 = vmul.f32 %v1440_v39, %v136_v49  ;;  %254 = vmatprep.subr.bf16.mxu0 %v225_v46 }
  0x83   :  { %255 = vmatpush1.bf16.msra.mxu0 %v224_v47 }
  0x84   :  { %v89_v54 = vpop.permute.xlu1 %88  ;;  %v87_v55 = vpop.permute.xlu0 %86  ;;  %v223_v56 = vpack.c.bf16 %v151_v51, %v1302_v1  ;;  %v222_v57 = vpack.c.bf16 %v150_v50, %v1293_v0 }
  0x85   :  { %v91_v62 = vsel %vm90_vm5, %v87_v55, %v89_v54  ;;  %v92_v63 = vsel %vm90_vm5, %v89_v54, %v87_v55  ;;  %v228_v54 = vld [vmem:[%s1956_s3] sm:$0xf]  ;;  %v1158_v55 = vld [vmem:[%s1955_s1 + $0xe] sm:$0x3] }
  0x86   :  { %256 = vmatprep.subr.bf16.mxu0 %v223_v56  ;;  %v106_v7 = vmul.f32 %v1463_v58, %v92_v63  ;;  %v107_v11 = vmul.f32 %v1466_v59, %v91_v62 }
  0x87   :  { %257 = vmatpush1.bf16.msra.mxu0 %v222_v57 }
  0x88   :  { %v111_v0 = vpop.permute.xlu1 %110  ;;  %v109_v1 = vpop.permute.xlu0 %108 }
  0x89   :  { %v113_v5 = vsel %vm112_vm6, %v109_v1, %v111_v0  ;;  %v114_v6 = vsel %vm112_vm6, %v111_v0, %v109_v1  ;;  %v1544_v0 = vrot.slane %v1157_v53, %v1383_v9  ;;  %v1547_v1 = vrot.slane %v1157_v53, %v1385_v10 }
  0x8a   :  { %v128_v12 = vmul.f32 %v1470_v60, %v114_v6  ;;  %v129_v13 = vmul.f32 %v1473_v61, %v113_v5  ;;  %v1553_v6 = vrot.slane %v1158_v55, %v1383_v9 }
  0x8c   :  { %v44_v19 = vpop.permute.xlu1 %43  ;;  %v42_v20 = vpop.permute.xlu0 %41  ;;  %v221_v22 = vpack.c.bf16 %v129_v13, %v107_v11  ;;  %v220_v23 = vpack.c.bf16 %v128_v12, %v106_v7  ;;  %v1556_v7 = vrot.slane %v1158_v55, %v1385_v10  ;;  %v1156_v11 = vld [vmem:[%s1955_s1 + $0xa] sm:$0x3] }
  0x8d   :  { %v48_v31 = vsel %vm47_vm7, %v42_v20, %v44_v19  ;;  %v49_v32 = vsel %vm47_vm7, %v44_v19, %v42_v20 }
  0x8e   :  { %258 = vmatprep.subr.bf16.mxu0 %v221_v22  ;;  %v62_v41 = vmul.f32 %v1495_v25, %v49_v32  ;;  %v63_v42 = vmul.f32 %v1498_v26, %v48_v31  ;;  %v1571_v22 = vrot.slane %v1156_v11, %v1383_v9 }
  0x8f   :  { %259 = vmatpush1.bf16.msra.mxu0 %v220_v23  ;;  %v1574_v23 = vrot.slane %v1156_v11, %v1385_v10 }
  0x90   :  { %v67_v33 = vpop.permute.xlu1 %66  ;;  %v65_v34 = vpop.permute.xlu0 %64 }
  0x91   :  { %v69_v36 = vsel %vm68_vm8, %v65_v34, %v67_v33  ;;  %v70_v37 = vsel %vm68_vm8, %v67_v33, %v65_v34 }
  0x92   :  { %v84_v43 = vmul.f32 %v1502_v27, %v70_v37  ;;  %v85_v44 = vmul.f32 %v1505_v29, %v69_v36 }
  0x94   :  { %v742_v45 = vpop.permute.xlu1 %741  ;;  %v740_v46 = vpop.permute.xlu0 %739  ;;  %v219_v47 = vpack.c.bf16 %v85_v44, %v63_v42  ;;  %v218_v48 = vpack.c.bf16 %v84_v43, %v62_v41 }
  0x95   :  { %v743_v49 = vsel %vm200_vm0, %v740_v46, %v742_v45  ;;  %v744_v50 = vsel %vm200_vm0, %v742_v45, %v740_v46  ;;  %v1154_v46 = vld [vmem:[%s1955_s1 + $0x4] sm:$0x3] }
  0x96   :  { %v757_v51 = vmul.f32 %v1519_v38, %v743_v49  ;;  %v758_v52 = vmul.f32 %v1522_v40, %v744_v50  ;;  %260 = vmatprep.subr.bf16.mxu0 %v219_v47  ;;  %v1155_v47 = vld [vmem:[%s1955_s1 + $0x6] sm:$0x3]  ;;  %v1598_v53 = vrot.slane %v1154_v46, %v1385_v10 }
  0x97   :  { %261 = vmatpush1.bf16.msra.mxu0 %v218_v48  ;;  %v1604_v55 = vrot.slane %v1155_v47, %v1385_v10 }
  0x98   :  { %v767_v56 = vpack.c.bf16 %v757_v51, %v757_v51  ;;  %v768_v57 = vpack.c.bf16 %v758_v52, %v758_v52  ;;  %v702_v62 = vpop.permute.xlu1 %701  ;;  %v700_v63 = vpop.permute.xlu0 %699  ;;  %v1595_v52 = vrot.slane %v1154_v46, %v1383_v9 }
  0x99   :  { %v703_v12 = vsel %vm156_vm1, %v700_v63, %v702_v62  ;;  %v704_v13 = vsel %vm156_vm1, %v702_v62, %v700_v63 }
  0x9a   :  { %1148 = vmatmul.mubr.msk.bf16.vlgmr.msra.gmra.mxu0 %vm235_vm9, %v228_v54  ;;  %1160 = vmatprep.subr.msk.bf16.mxu0 %vm239_vm3, %v768_v57  ;;  %v780_v5 = vsel %vm239_vm3, %v767_v56, 0  ;;  %v717_v30 = vmul.f32 %v1544_v0, %v703_v12  ;;  %v718_v31 = vmul.f32 %v1547_v1, %v704_v13  ;;  %v1601_v54 = vrot.slane %v1155_v47, %v1383_v9 }
  0x9b   :  { %792 = vmatpush1.bf16.msra.mxu0 %v780_v5  ;;  %817 = vmatprep.mubr.bf16.mxu0 %v1227_v2 }
  0x9c   :  { %v722_v14 = vpop.permute.xlu1 %721  ;;  %v720_v16 = vpop.permute.xlu0 %719 }
  0x9d   :  { %v723_v19 = vsel %vm178_vm2, %v720_v16, %v722_v14  ;;  %v724_v20 = vsel %vm178_vm2, %v722_v14, %v720_v16  ;;  %v605_v14 = vld [vmem:[%s1955_s1] sm:$0x3]  ;;  %v1153_v16 = vld [vmem:[%s1955_s1 + $0x2] sm:$0x3] }
  0x9e   :  { %v737_v32 = vmul.f32 %v1553_v6, %v723_v19  ;;  %v738_v33 = vmul.f32 %v1556_v7, %v724_v20 }
  0xa0   :  { %v765_v34 = vpack.c.bf16 %v737_v32, %v717_v30  ;;  %v682_v36 = vpop.permute.xlu1 %681  ;;  %v680_v37 = vpop.permute.xlu0 %679  ;;  %v766_v41 = vpack.c.bf16 %v738_v33, %v718_v31  ;;  %v1625_v32 = vrot.slane %v605_v14, %v1383_v9  ;;  %v1628_v33 = vrot.slane %v605_v14, %v1385_v10 }
  0xa1   :  { %v683_v42 = vsel %vm134_vm4, %v680_v37, %v682_v36  ;;  %v684_v43 = vsel %vm134_vm4, %v682_v36, %v680_v37  ;;  %v1634_v36 = vrot.slane %v1153_v16, %v1385_v10 }
  0xa2   :  { %v697_v44 = vmul.f32 %v1571_v22, %v683_v42  ;;  %v698_v45 = vmul.f32 %v1574_v23, %v684_v43  ;;  %793 = vmatprep.subr.bf16.mxu0 %v766_v41 }
  0xa3   :  { %794 = vmatpush1.bf16.msra.mxu0 %v765_v34  ;;  %v1631_v34 = vrot.slane %v1153_v16, %v1383_v9 }
  0xa4   :  { %v763_v48 = vpack.c.bf16 %v697_v44, %v1344_v4  ;;  %v642_v49 = vpop.permute.xlu1 %641  ;;  %v640_v50 = vpop.permute.xlu0 %639  ;;  %v764_v51 = vpack.c.bf16 %v698_v45, %v1339_v3 }
  0xa5   :  { %v643_v4 = vsel %vm90_vm5, %v640_v50, %v642_v49  ;;  %v644_v56 = vsel %vm90_vm5, %v642_v49, %v640_v50  ;;  %v769_v50 = vld [vmem:[%s1956_s3] sm:$0xf] }
  0xa6   :  { %795 = vmatprep.subr.bf16.mxu0 %v764_v51  ;;  %v657_v5 = vmul.f32 %v1595_v52, %v644_v56  ;;  %v658_v11 = vmul.f32 %v1598_v53, %v643_v4 }
  0xa7   :  { %796 = vmatpush1.bf16.msra.mxu0 %v763_v48 }
  0xa8   :  { %v662_v3 = vpop.permute.xlu1 %661  ;;  %v660_v57 = vpop.permute.xlu0 %659 }
  0xa9   :  { %v663_v62 = vsel %vm112_vm6, %v660_v57, %v662_v3  ;;  %v664_v63 = vsel %vm112_vm6, %v662_v3, %v660_v57 }
  0xaa   :  { %v677_v12 = vmul.f32 %v1601_v54, %v664_v63  ;;  %v678_v13 = vmul.f32 %v1604_v55, %v663_v62 }
  0xac   :  { %v761_v19 = vpack.c.bf16 %v677_v12, %v657_v5  ;;  %v602_v20 = vpop.permute.xlu1 %601  ;;  %v600_v30 = vpop.permute.xlu0 %599  ;;  %v762_v31 = vpack.c.bf16 %v678_v13, %v658_v11 }
  0xad   :  { %v603_v37 = vsel %vm47_vm7, %v600_v30, %v602_v20  ;;  %v604_v41 = vsel %vm47_vm7, %v602_v20, %v600_v30 }
  0xae   :  { %797 = vmatprep.subr.bf16.mxu0 %v762_v31  ;;  %v617_v9 = vmul.f32 %v1625_v32, %v604_v41  ;;  %v618_v10 = vmul.f32 %v1628_v33, %v603_v37 }
  0xaf   :  { %798 = vmatpush1.bf16.msra.mxu0 %v761_v19 }
  0xb0   :  { %v622_v42 = vpop.permute.xlu1 %621  ;;  %v620_v43 = vpop.permute.xlu0 %619 }
  0xb1   :  { %v623_v44 = vsel %vm68_vm8, %v620_v43, %v622_v42  ;;  %v624_v45 = vsel %vm68_vm8, %v622_v42, %v620_v43 }
  0xb2   :  { %v637_v46 = vmul.f32 %v1631_v34, %v624_v45  ;;  %v638_v47 = vmul.f32 %v1634_v36, %v623_v44 }
  0xb4   :  { %v759_v48 = vpack.c.bf16 %v637_v46, %v617_v9  ;;  %v760_v49 = vpack.c.bf16 %v638_v47, %v618_v10 }
  0xb6   :  { %799 = vmatprep.subr.bf16.mxu0 %v760_v49 }
  0xb7   :  { %800 = vmatpush1.bf16.msra.mxu0 %v759_v48 }
  0xba   :  { %1161 = vmatmul.mubr.msk.bf16.vlgmr.msra.gmra.mxu0 %vm235_vm9, %v769_v50  ;;  %v299_v50 = vld [vmem:[%s1957_s5] sm:$0xff] }
  0xbd   :  { %v233_v51 = vpop.permute.xlu0 %232  ;;  %v774_v14 = vpop.permute.xlu1 %773 }
 0x15a   :  { %v280_v4 = vpop.f32.mrf.mxu0 }
 0x15b   :  { %v281_v56 = vadd.f32 %v280_v4, %v233_v51 }
 0x15c   :  { %v282_v3 = vpop.f32.mrf.mxu0 }
 0x15d   :  { %v283_v57 = vadd.f32 %v282_v3, %v233_v51  ;;  %v290_v5 = vmul.f32 %v281_v56, %v281_v56  ;;  %v303_v3 = vld [vmem:[%s1958_s6] sm:$0xff] }
 0x15e   :  { %v284_v62 = vpop.f32.mrf.mxu0 }
 0x15f   :  { %v287_v63 = vadd.f32 %v283_v57, %v281_v56  ;;  %v291_v11 = vmul.f32 %v283_v57, %v283_v57 }
 0x160   :  { %v285_v12 = vpop.f32.mrf.mxu0 }
 0x161   :  { %288 = vadd.xlane.f32.xlu1 %v287_v63  ;;  %v292_v13 = vadd.f32 %v291_v11, %v290_v5 }
 0x163   :  { %293 = vadd.xlane.f32.xlu0 %v292_v13 }
 0x17a   :  { %v819_v16 = vpop.f32.mrf.mxu0 }
 0x17b   :  { %v1652_v19 = vadd.f32 %v819_v16, %v774_v14 }
 0x17c   :  { %v821_v20 = vpop.f32.mrf.mxu0 }
 0x17d   :  { %v1654_v30 = vadd.f32 %v821_v20, %v774_v14  ;;  %v829_v41 = vmul.f32 %v1652_v19, %v1652_v19 }
 0x17e   :  { %v823_v31 = vpop.f32.mrf.mxu0 }
 0x17f   :  { %v826_v37 = vadd.f32 %v1654_v30, %v1652_v19  ;;  %v830_v42 = vmul.f32 %v1654_v30, %v1654_v30 }
 0x180   :  { %v824_v43 = vpop.f32.mrf.mxu0 }
 0x181   :  { %827 = vadd.xlane.f32.xlu0 %v826_v37  ;;  %v831_v44 = vadd.f32 %v830_v42, %v829_v41 }
 0x183   :  { %832 = vadd.xlane.f32.xlu1 %v831_v44 }
 0x1ea   :  { %v289_v45 = vpop.xlane.xlu1 %288 }
 0x1eb   :  { %v295_v9 = vmul.f32 0.00390625, %v289_v45 }
 0x1ec   :  { %v294_v10 = vpop.xlane.xlu0 %293 }
 0x1ed   :  { %v297_v46 = vmul.f32 %v295_v9, %v295_v9  ;;  %v296_v47 = vmul.f32 0.00390625, %v294_v10 }
 0x1ef   :  { %v298_v48 = vsub.f32 %v296_v47, %v297_v46 }
 0x1f1   :  { %v300_v49 = vadd.f32 1e-05, %v298_v48 }
 0x1f3   :  { %1177 = vrsqrt.f32 %v300_v49 }
 0x200   :  { %v1178_v51 = vpop.eup %1177 }
 0x201   :  { %v302_v4 = vmul.f32 %v1178_v51, %v299_v50 }
 0x203   :  { %308 = vperm.xlu0 %1175, %v302_v4   ;;  %v304_v62 = vmul.f32 %v302_v4, %v295_v9 }
 0x205   :  { %v305_v63 = vsub.f32 %v303_v3, %v304_v62 }
 0x207   :  { %315 = vperm.xlu1 %1176, %v305_v63  }
 0x20a   :  { %v828_v5 = vpop.xlane.xlu0 %827 }
 0x20b   :  { %v834_v11 = vmul.f32 0.00390625, %v828_v5 }
 0x20c   :  { %v833_v12 = vpop.xlane.xlu1 %832 }
 0x20d   :  { %v836_v13 = vmul.f32 %v834_v11, %v834_v11  ;;  %v835_v14 = vmul.f32 0.00390625, %v833_v12 }
 0x20f   :  { %v837_v16 = vsub.f32 %v835_v14, %v836_v13 }
 0x211   :  { %v839_v20 = vadd.f32 1e-05, %v837_v16 }
 0x213   :  { %1179 = vrsqrt.f32 %v839_v20 }
 0x220   :  { %v1180_v31 = vpop.eup %1179 }
 0x221   :  { %v841_v37 = vmul.f32 %v1180_v31, %v299_v50 }
 0x223   :  { %847 = vperm.xlu1 %1176, %v841_v37   ;;  %v843_v41 = vmul.f32 %v841_v37, %v834_v11 }
 0x225   :  { %v844_v42 = vsub.f32 %v303_v3, %v843_v41 }
 0x227   :  { %854 = vperm.xlu0 %1175, %v844_v42  }
 0x27e   :  { %v309_v43 = vpop.permute.xlu0 %308 }
 0x27f   :  { %v311_v44 = vmul.f32 %v309_v43, %v281_v56  ;;  %v312_v45 = vmul.f32 %v309_v43, %v283_v57 }
 0x282   :  { %v316_v9 = vpop.permute.xlu1 %315 }
 0x283   :  { %v1668_v10 = vadd.f32 %v316_v9, %v311_v44  ;;  %v1670_v46 = vadd.f32 %v316_v9, %v312_v45 }
 0x285   :  { %v1673_v47 = vmul.f32 0.70710677, %v1668_v10  ;;  %v1676_v48 = vmul.f32 0.70710677, %v1670_v46 }
 0x287   :  { %v324_v49 = vand.u32 2147483647, %v1673_v47  ;;  %v325_v50 = vand.u32 2147483647, %v1676_v48  ;;  %vm364_vm10 = vcmp.lt.f32.partialorder %v1673_v47, 0.0  ;;  %vm365_vm11 = vcmp.lt.f32.partialorder %v1676_v48, 0.0 }
 0x289   :  { %v326_v51 = vmul.f32 0.3275911, %v324_v49  ;;  %v327_v4 = vmul.f32 0.3275911, %v325_v50  ;;  %v352_v57 = vsub.f32 0.0, %v324_v49  ;;  %v353_v62 = vsub.f32 0.0, %v325_v50 }
 0x28b   :  { %v328_v3 = vadd.f32 1.0, %v326_v51  ;;  %v329_v56 = vadd.f32 1.0, %v327_v4  ;;  %v354_v63 = vmul.f32 %v352_v57, %v324_v49  ;;  %v355_v5 = vmul.f32 %v353_v62, %v325_v50 }
 0x28d   :  { %1181 = vrcp.f32 %v328_v3  ;;  %v356_v14 = vmul.f32 1.442695, %v354_v63  ;;  %v358_v20 = vmul.f32 1.442695, %v355_v5 }
 0x28e   :  { %1183 = vrcp.f32 %v329_v56 }
 0x28f   :  { %1185 = vpow2.f32 %v356_v14 }
 0x290   :  { %1187 = vpow2.f32 %v358_v20 }
 0x29a   :  { %v1182_v11 = vpop.eup %1181 }
 0x29b   :  { %v1184_v12 = vpop.eup %1183  ;;  %v334_v13 = vmul.f32 1.0614054, %v1182_v11 }
 0x29c   :  { %v335_v16 = vmul.f32 1.0614054, %v1184_v12 }
 0x29d   :  { %v336_v31 = vadd.f32 -1.4531521, %v334_v13 }
 0x29e   :  { %v337_v37 = vadd.f32 -1.4531521, %v335_v16  ;;  %v848_v41 = vpop.permute.xlu1 %847 }
 0x29f   :  { %v338_v42 = vmul.f32 %v1182_v11, %v336_v31  ;;  %v850_v45 = vmul.f32 %v848_v41, %v1652_v19  ;;  %v851_v9 = vmul.f32 %v848_v41, %v1654_v30 }
 0x2a0   :  { %v339_v43 = vmul.f32 %v1184_v12, %v337_v37 }
 0x2a1   :  { %v340_v44 = vadd.f32 1.4214138, %v338_v42 }
 0x2a2   :  { %v341_v49 = vadd.f32 1.4214138, %v339_v43  ;;  %v855_v50 = vpop.permute.xlu0 %854  ;;  %v1186_v43 = vpop.eup %1185 }
 0x2a3   :  { %v342_v51 = vmul.f32 %v1182_v11, %v340_v44  ;;  %v1682_v4 = vadd.f32 %v855_v50, %v850_v45  ;;  %v1684_v3 = vadd.f32 %v855_v50, %v851_v9  ;;  %v1188_v9 = vpop.eup %1187 }
 0x2a4   :  { %v343_v56 = vmul.f32 %v1184_v12, %v341_v49 }
 0x2a5   :  { %v344_v57 = vadd.f32 -0.28449672, %v342_v51  ;;  %v1687_v62 = vmul.f32 0.70710677, %v1682_v4  ;;  %v1690_v5 = vmul.f32 0.70710677, %v1684_v3 }
 0x2a6   :  { %v345_v63 = vadd.f32 -0.28449672, %v343_v56 }
 0x2a7   :  { %v346_v13 = vmul.f32 %v1182_v11, %v344_v57  ;;  %v863_v19 = vand.u32 2147483647, %v1687_v62  ;;  %v864_v14 = vand.u32 2147483647, %v1690_v5  ;;  %vm903_vm12 = vcmp.lt.f32.partialorder %v1687_v62, 0.0 }
 0x2a8   :  { %v347_v30 = vmul.f32 %v1184_v12, %v345_v63  ;;  %vm904_vm13 = vcmp.lt.f32.partialorder %v1690_v5, 0.0 }
 0x2a9   :  { %v348_v16 = vadd.f32 0.2548296, %v346_v13  ;;  %v865_v20 = vmul.f32 0.3275911, %v863_v19  ;;  %v866_v37 = vmul.f32 0.3275911, %v864_v14 }
 0x2aa   :  { %v349_v31 = vadd.f32 0.2548296, %v347_v30  ;;  %v891_v30 = vsub.f32 0.0, %v863_v19 }
 0x2ab   :  { %v350_v41 = vmul.f32 %v1182_v11, %v348_v16  ;;  %v867_v42 = vadd.f32 1.0, %v865_v20  ;;  %v868_v45 = vadd.f32 1.0, %v866_v37  ;;  %v320_v11 = vmul.f32 0.5, %v1668_v10 }
 0x2ac   :  { %v351_v44 = vmul.f32 %v1184_v12, %v349_v31  ;;  %v892_v20 = vsub.f32 0.0, %v864_v14  ;;  %v321_v31 = vmul.f32 0.5, %v1670_v46 }
 0x2ad   :  { %v360_v49 = vmul.f32 %v1186_v43, %v350_v41  ;;  %1189 = vrcp.f32 %v867_v42  ;;  %v893_v43 = vmul.f32 %v891_v30, %v863_v19 }
 0x2ae   :  { %v361_v50 = vmul.f32 %v1188_v9, %v351_v44  ;;  %1191 = vrcp.f32 %v868_v45  ;;  %v894_v44 = vmul.f32 %v892_v20, %v864_v14 }
 0x2af   :  { %v362_v51 = vsub.f32 1.0, %v360_v49  ;;  %v895_v45 = vmul.f32 1.442695, %v893_v43 }
 0x2b0   :  { %v363_v56 = vsub.f32 1.0, %v361_v50  ;;  %v897_v49 = vmul.f32 1.442695, %v894_v44 }
 0x2b1   :  { %v366_v57 = vsub.f32 0.0, %v362_v51  ;;  %1193 = vpow2.f32 %v895_v45 }
 0x2b2   :  { %v367_v63 = vsub.f32 0.0, %v363_v56  ;;  %1195 = vpow2.f32 %v897_v49 }
 0x2b3   :  { %v368_v13 = vsel %vm364_vm10, %v366_v57, %v362_v51 }
 0x2b4   :  { %v369_v16 = vsel %vm365_vm11, %v367_v63, %v363_v56  ;;  %v370_v12 = vadd.f32 1.0, %v368_v13 }
 0x2b5   :  { %v371_v37 = vadd.f32 1.0, %v369_v16 }
 0x2b6   :  { %v1698_v41 = vmul.f32 %v370_v12, %v320_v11 }
 0x2b7   :  { %v1700_v42 = vmul.f32 %v371_v37, %v321_v31 }
 0x2b8   :  { %430 = vrot.lane.b32.xlu1 %v1698_v41, %s1222_s19 }
 0x2b9   :  { %432 = vrot.lane.b32.xlu0 %v1700_v42, %s1222_s19 }
 0x2ba   :  { %v1190_v47 = vpop.eup %1189 }
 0x2bb   :  { %v1192_v10 = vpop.eup %1191  ;;  %v873_v48 = vmul.f32 1.0614054, %v1190_v47 }
 0x2bc   :  { %v874_v9 = vmul.f32 1.0614054, %v1192_v10  ;;  %414 = vrot.lane.b32.xlu1 %v1698_v41, %s1221_s18 }
 0x2bd   :  { %v875_v46 = vadd.f32 -1.4531521, %v873_v48  ;;  %416 = vrot.lane.b32.xlu0 %v1700_v42, %s1221_s18 }
 0x2be   :  { %v876_v19 = vadd.f32 -1.4531521, %v874_v9  ;;  %v1194_v37 = vpop.eup %1193 }
 0x2bf   :  { %v877_v14 = vmul.f32 %v1190_v47, %v875_v46  ;;  %v1196_v44 = vpop.eup %1195 }
 0x2c0   :  { %v878_v50 = vmul.f32 %v1192_v10, %v876_v19  ;;  %422 = vrot.lane.b32.xlu1 %v1698_v41, %s1223_s22  ;;  %v859_v19 = vmul.f32 0.5, %v1682_v4  ;;  %v988_v4 = vld [vmem:[%s1959_s8] sm:$0xff] }
 0x2c1   :  { %v879_v51 = vadd.f32 1.4214138, %v877_v14  ;;  %424 = vrot.lane.b32.xlu0 %v1700_v42, %s1223_s22 }
 0x2c2   :  { %v880_v56 = vadd.f32 1.4214138, %v878_v50 }
 0x2c3   :  { %v881_v57 = vmul.f32 %v1190_v47, %v879_v51  ;;  %v860_v51 = vmul.f32 0.5, %v1684_v3 }
 0x2c4   :  { %v882_v63 = vmul.f32 %v1192_v10, %v880_v56  ;;  %406 = vrot.lane.b32.xlu1 %v1698_v41, %s1224_s23 }
 0x2c5   :  { %v883_v13 = vadd.f32 -0.28449672, %v881_v57  ;;  %408 = vrot.lane.b32.xlu0 %v1700_v42, %s1224_s23 }
 0x2c6   :  { %v884_v30 = vadd.f32 -0.28449672, %v882_v63 }
 0x2c7   :  { %v885_v11 = vmul.f32 %v1190_v47, %v883_v13 }
 0x2c8   :  { %v886_v16 = vmul.f32 %v1192_v10, %v884_v30  ;;  %390 = vrot.lane.b32.xlu1 %v1698_v41, %s1225_s24 }
 0x2c9   :  { %v887_v12 = vadd.f32 0.2548296, %v885_v11  ;;  %392 = vrot.lane.b32.xlu0 %v1700_v42, %s1225_s24 }
 0x2ca   :  { %v888_v20 = vadd.f32 0.2548296, %v886_v16 }
 0x2cb   :  { %v889_v31 = vmul.f32 %v1190_v47, %v887_v12 }
 0x2cc   :  { %v890_v43 = vmul.f32 %v1192_v10, %v888_v20  ;;  %398 = vrot.lane.b32.xlu1 %v1698_v41, %s1226_s25 }
 0x2cd   :  { %v899_v48 = vmul.f32 %v1194_v37, %v889_v31  ;;  %400 = vrot.lane.b32.xlu0 %v1700_v42, %s1226_s25 }
 0x2ce   :  { %v900_v45 = vmul.f32 %v1196_v44, %v890_v43 }
 0x2cf   :  { %v901_v9 = vsub.f32 1.0, %v899_v48 }
 0x2d0   :  { %v902_v49 = vsub.f32 1.0, %v900_v45  ;;  %374 = vrot.lane.b32.xlu1 %v1698_v41, %s1228_s26 }
 0x2d1   :  { %v905_v46 = vsub.f32 0.0, %v901_v9  ;;  %376 = vrot.lane.b32.xlu0 %v1700_v42, %s1228_s26 }
 0x2d2   :  { %v906_v47 = vsub.f32 0.0, %v902_v49 }
 0x2d3   :  { %v907_v10 = vsel %vm903_vm12, %v905_v46, %v901_v9 }
 0x2d4   :  { %v908_v14 = vsel %vm904_vm13, %v906_v47, %v902_v49  ;;  %v909_v50 = vadd.f32 1.0, %v907_v10  ;;  %382 = vrot.lane.b32.xlu1 %v1698_v41, %s1229_s27 }
 0x2d5   :  { %v910_v56 = vadd.f32 1.0, %v908_v14  ;;  %384 = vrot.lane.b32.xlu0 %v1700_v42, %s1229_s27 }
 0x2d6   :  { %v1738_v57 = vmul.f32 %v909_v50, %v859_v19 }
 0x2d7   :  { %v1740_v62 = vmul.f32 %v910_v56, %v860_v51 }
 0x2d8   :  { %969 = vrot.lane.b32.xlu1 %v1738_v57, %s1222_s19 }
 0x2d9   :  { %971 = vrot.lane.b32.xlu0 %v1740_v62, %s1222_s19 }
 0x2dc   :  { %953 = vrot.lane.b32.xlu1 %v1738_v57, %s1221_s18 }
 0x2dd   :  { %955 = vrot.lane.b32.xlu0 %v1740_v62, %s1221_s18 }
 0x2e0   :  { %961 = vrot.lane.b32.xlu1 %v1738_v57, %s1223_s22 }
 0x2e1   :  { %963 = vrot.lane.b32.xlu0 %v1740_v62, %s1223_s22 }
 0x2e4   :  { %945 = vrot.lane.b32.xlu1 %v1738_v57, %s1224_s23 }
 0x2e5   :  { %947 = vrot.lane.b32.xlu0 %v1740_v62, %s1224_s23 }
 0x2e8   :  { %929 = vrot.lane.b32.xlu1 %v1738_v57, %s1225_s24 }
 0x2e9   :  { %931 = vrot.lane.b32.xlu0 %v1740_v62, %s1225_s24 }
 0x2ec   :  { %937 = vrot.lane.b32.xlu1 %v1738_v57, %s1226_s25 }
 0x2ed   :  { %939 = vrot.lane.b32.xlu0 %v1740_v62, %s1226_s25 }
 0x2f0   :  { %913 = vrot.lane.b32.xlu1 %v1738_v57, %s1228_s26 }
 0x2f1   :  { %915 = vrot.lane.b32.xlu0 %v1740_v62, %s1228_s26 }
 0x2f4   :  { %921 = vrot.lane.b32.xlu1 %v1738_v57, %s1229_s27 }
 0x2f5   :  { %923 = vrot.lane.b32.xlu0 %v1740_v62, %s1229_s27 }
 0x2f8   :  { %452 = vperm.xlu1 %1176, %v988_v4  }
 0x2f9   :  { %991 = vperm.xlu0 %1175, %v988_v4  }
 0x32a   :  { %v431_v3 = vpop.permute.xlu1 %430 }
 0x32b   :  { %v433_v5 = vpop.permute.xlu0 %432 }
 0x32c   :  { %v434_v63 = vsel %vm200_vm0, %v431_v3, %v433_v5  ;;  %v435_v13 = vsel %vm200_vm0, %v433_v5, %v431_v3 }
 0x32d   :  { %v436_v30 = vmul.f32 %v434_v63, %v1395_v15  ;;  %v437_v11 = vmul.f32 %v435_v13, %v1401_v17 }
 0x32e   :  { %v415_v16 = vpop.permute.xlu1 %414 }
 0x32f   :  { %v417_v12 = vpop.permute.xlu0 %416  ;;  %v447_v20 = vpack.c.bf16 %v437_v11, %v437_v11  ;;  %v446_v31 = vpack.c.bf16 %v436_v30, %v436_v30 }
 0x330   :  { %v418_v43 = vsel %vm156_vm1, %v415_v16, %v417_v12  ;;  %v419_v44 = vsel %vm156_vm1, %v417_v12, %v415_v16 }
 0x331   :  { %1149 = vmatprep.subr.msk.bf16.mxu1 %vm239_vm3, %v447_v20  ;;  %v459_v37 = vsel %vm239_vm3, %v446_v31, 0  ;;  %v420_v9 = vmul.f32 %v418_v43, %v1405_v18  ;;  %v421_v49 = vmul.f32 %v419_v44, %v1409_v21 }
 0x332   :  { %471 = vmatpush1.bf16.msra.mxu1 %v459_v37  ;;  %v423_v48 = vpop.permute.xlu1 %422 }
 0x333   :  { %v425_v45 = vpop.permute.xlu0 %424 }
 0x334   :  { %v426_v15 = vsel %vm178_vm2, %v423_v48, %v425_v45  ;;  %v427_v17 = vsel %vm178_vm2, %v425_v45, %v423_v48 }
 0x335   :  { %v428_v46 = vmul.f32 %v426_v15, %v1416_v24  ;;  %v429_v47 = vmul.f32 %v427_v17, %v1425_v28 }
 0x336   :  { %v407_v10 = vpop.permute.xlu1 %406 }
 0x337   :  { %v409_v19 = vpop.permute.xlu0 %408  ;;  %v445_v14 = vpack.c.bf16 %v429_v47, %v421_v49  ;;  %v444_v50 = vpack.c.bf16 %v428_v46, %v420_v9 }
 0x338   :  { %v410_v51 = vsel %vm134_vm4, %v407_v10, %v409_v19  ;;  %v411_v56 = vsel %vm134_vm4, %v409_v19, %v407_v10 }
 0x339   :  { %v412_v4 = vmul.f32 %v410_v51, %v1432_v35  ;;  %v413_v18 = vmul.f32 %v411_v56, %v1440_v39  ;;  %472 = vmatprep.subr.bf16.mxu1 %v445_v14 }
 0x33a   :  { %473 = vmatpush1.bf16.msra.mxu1 %v444_v50  ;;  %v391_v21 = vpop.permute.xlu1 %390 }
 0x33b   :  { %v393_v24 = vpop.permute.xlu0 %392  ;;  %v443_v28 = vpack.c.bf16 %v413_v18, %v1700_v42  ;;  %v442_v3 = vpack.c.bf16 %v412_v4, %v1698_v41 }
 0x33c   :  { %v394_v5 = vsel %vm90_vm5, %v391_v21, %v393_v24  ;;  %v395_v63 = vsel %vm90_vm5, %v393_v24, %v391_v21 }
 0x33d   :  { %474 = vmatprep.subr.bf16.mxu1 %v443_v28  ;;  %v396_v42 = vmul.f32 %v395_v63, %v1463_v58  ;;  %v397_v41 = vmul.f32 %v394_v5, %v1466_v59 }
 0x33e   :  { %475 = vmatpush1.bf16.msra.mxu1 %v442_v3  ;;  %v399_v13 = vpop.permute.xlu1 %398 }
 0x33f   :  { %v401_v35 = vpop.permute.xlu0 %400 }
 0x340   :  { %v402_v39 = vsel %vm112_vm6, %v399_v13, %v401_v35  ;;  %v403_v30 = vsel %vm112_vm6, %v401_v35, %v399_v13 }
 0x341   :  { %v404_v11 = vmul.f32 %v403_v30, %v1470_v60  ;;  %v405_v16 = vmul.f32 %v402_v39, %v1473_v61 }
 0x342   :  { %v375_v12 = vpop.permute.xlu1 %374 }
 0x343   :  { %v377_v20 = vpop.permute.xlu0 %376  ;;  %v441_v31 = vpack.c.bf16 %v405_v16, %v397_v41  ;;  %v440_v37 = vpack.c.bf16 %v404_v11, %v396_v42 }
 0x344   :  { %v378_v43 = vsel %vm47_vm7, %v375_v12, %v377_v20  ;;  %v379_v44 = vsel %vm47_vm7, %v377_v20, %v375_v12 }
 0x345   :  { %476 = vmatprep.subr.bf16.mxu1 %v441_v31  ;;  %v380_v61 = vmul.f32 %v379_v44, %v1495_v25  ;;  %v381_v45 = vmul.f32 %v378_v43, %v1498_v26 }
 0x346   :  { %477 = vmatpush1.bf16.msra.mxu1 %v440_v37  ;;  %v383_v48 = vpop.permute.xlu1 %382 }
 0x347   :  { %v385_v58 = vpop.permute.xlu0 %384 }
 0x348   :  { %v386_v59 = vsel %vm68_vm8, %v383_v48, %v385_v58  ;;  %v387_v60 = vsel %vm68_vm8, %v385_v58, %v383_v48 }
 0x349   :  { %v388_v15 = vmul.f32 %v387_v60, %v1502_v27  ;;  %v389_v17 = vmul.f32 %v386_v59, %v1505_v29  ;;  %v448_v27 = vld [vmem:[%s1960_s7] sm:$0xf] }
 0x34a   :  { %v970_v9 = vpop.permute.xlu1 %969 }
 0x34b   :  { %v972_v49 = vpop.permute.xlu0 %971  ;;  %v439_v46 = vpack.c.bf16 %v389_v17, %v381_v45  ;;  %v438_v47 = vpack.c.bf16 %v388_v15, %v380_v61 }
 0x34c   :  { %v973_v10 = vsel %vm200_vm0, %v970_v9, %v972_v49  ;;  %v974_v19 = vsel %vm200_vm0, %v972_v49, %v970_v9 }
 0x34d   :  { %v975_v14 = vmul.f32 %v973_v10, %v1519_v38  ;;  %v976_v25 = vmul.f32 %v974_v19, %v1522_v40  ;;  %478 = vmatprep.subr.bf16.mxu1 %v439_v46 }
 0x34e   :  { %479 = vmatpush1.bf16.msra.mxu1 %v438_v47  ;;  %v954_v26 = vpop.permute.xlu1 %953  ;;  %v987_v47 = vld [vmem:[%s1960_s7] sm:$0xf] }
 0x34f   :  { %v985_v29 = vpack.c.bf16 %v975_v14, %v975_v14  ;;  %v986_v50 = vpack.c.bf16 %v976_v25, %v976_v25  ;;  %v956_v51 = vpop.permute.xlu0 %955 }
 0x350   :  { %v957_v38 = vsel %vm156_vm1, %v954_v26, %v956_v51  ;;  %v958_v40 = vsel %vm156_vm1, %v956_v51, %v954_v26 }
 0x351   :  { %1150 = vmatmul.mubr.msk.bf16.vlgmr.msra.gmra.mxu1 %vm235_vm9, %v448_v27  ;;  %1162 = vmatprep.subr.msk.bf16.mxu1 %vm239_vm3, %v986_v50  ;;  %v998_v56 = vsel %vm239_vm3, %v985_v29, 0  ;;  %v959_v28 = vmul.f32 %v957_v38, %v1544_v0  ;;  %v960_v3 = vmul.f32 %v958_v40, %v1547_v1 }
 0x352   :  { %1010 = vmatpush1.bf16.msra.mxu1 %v998_v56  ;;  %v962_v4 = vpop.permute.xlu1 %961  ;;  %1035 = vmatprep.mubr.bf16.mxu1 %v1227_v2 }
 0x353   :  { %v964_v18 = vpop.permute.xlu0 %963 }
 0x354   :  { %v965_v21 = vsel %vm178_vm2, %v962_v4, %v964_v18  ;;  %v966_v24 = vsel %vm178_vm2, %v964_v18, %v962_v4 }
 0x355   :  { %v967_v5 = vmul.f32 %v965_v21, %v1553_v6  ;;  %v968_v63 = vmul.f32 %v966_v24, %v1556_v7 }
 0x356   :  { %v946_v13 = vpop.permute.xlu1 %945 }
 0x357   :  { %v983_v35 = vpack.c.bf16 %v967_v5, %v959_v28  ;;  %v948_v39 = vpop.permute.xlu0 %947  ;;  %v984_v30 = vpack.c.bf16 %v968_v63, %v960_v3 }
 0x358   :  { %v949_v2 = vsel %vm134_vm4, %v946_v13, %v948_v39  ;;  %v950_v42 = vsel %vm134_vm4, %v948_v39, %v946_v13 }
 0x359   :  { %v951_v41 = vmul.f32 %v949_v2, %v1571_v22  ;;  %v952_v0 = vmul.f32 %v950_v42, %v1574_v23  ;;  %1011 = vmatprep.subr.bf16.mxu1 %v984_v30 }
 0x35a   :  { %1012 = vmatpush1.bf16.msra.mxu1 %v983_v35  ;;  %v930_v1 = vpop.permute.xlu1 %929 }
 0x35b   :  { %v981_v6 = vpack.c.bf16 %v951_v41, %v1738_v57  ;;  %v932_v7 = vpop.permute.xlu0 %931  ;;  %v982_v11 = vpack.c.bf16 %v952_v0, %v1740_v62 }
 0x35c   :  { %v933_v16 = vsel %vm90_vm5, %v930_v1, %v932_v7  ;;  %v934_v12 = vsel %vm90_vm5, %v932_v7, %v930_v1 }
 0x35d   :  { %1013 = vmatprep.subr.bf16.mxu1 %v982_v11  ;;  %v935_v57 = vmul.f32 %v934_v12, %v1595_v52  ;;  %v936_v62 = vmul.f32 %v933_v16, %v1598_v53  ;;  %v1056_v11 = vld [vmem:[%s1961_s9] sm:$0xff] }
 0x35e   :  { %1014 = vmatpush1.bf16.msra.mxu1 %v981_v6  ;;  %v938_v20 = vpop.permute.xlu1 %937 }
 0x35f   :  { %v940_v22 = vpop.permute.xlu0 %939 }
 0x360   :  { %v941_v23 = vsel %vm112_vm6, %v938_v20, %v940_v22  ;;  %v942_v31 = vsel %vm112_vm6, %v940_v22, %v938_v20 }
 0x361   :  { %v943_v37 = vmul.f32 %v942_v31, %v1601_v54  ;;  %v944_v43 = vmul.f32 %v941_v23, %v1604_v55  ;;  %v521_v31 = vld [vmem:[%s1962_s10] sm:$0xff] }
 0x362   :  { %v914_v44 = vpop.permute.xlu1 %913 }
 0x363   :  { %v979_v48 = vpack.c.bf16 %v943_v37, %v935_v57  ;;  %v916_v58 = vpop.permute.xlu0 %915  ;;  %v980_v59 = vpack.c.bf16 %v944_v43, %v936_v62 }
 0x364   :  { %v917_v60 = vsel %vm47_vm7, %v914_v44, %v916_v58  ;;  %v918_v61 = vsel %vm47_vm7, %v916_v58, %v914_v44 }
 0x365   :  { %1015 = vmatprep.subr.bf16.mxu1 %v980_v59  ;;  %v919_v55 = vmul.f32 %v918_v61, %v1625_v32  ;;  %v920_v15 = vmul.f32 %v917_v60, %v1628_v33 }
 0x366   :  { %1016 = vmatpush1.bf16.msra.mxu1 %v979_v48  ;;  %v922_v45 = vpop.permute.xlu1 %921 }
 0x367   :  { %v924_v52 = vpop.permute.xlu0 %923 }
 0x368   :  { %v925_v53 = vsel %vm68_vm8, %v922_v45, %v924_v52  ;;  %v926_v54 = vsel %vm68_vm8, %v924_v52, %v922_v45 }
 0x369   :  { %v927_v17 = vmul.f32 %v926_v54, %v1631_v34  ;;  %v928_v9 = vmul.f32 %v925_v53, %v1634_v36 }
 0x36b   :  { %v977_v49 = vpack.c.bf16 %v927_v17, %v919_v55  ;;  %v978_v46 = vpack.c.bf16 %v928_v9, %v920_v15 }
 0x36d   :  { %1017 = vmatprep.subr.bf16.mxu1 %v978_v46 }
 0x36e   :  { %1018 = vmatpush1.bf16.msra.mxu1 %v977_v49 }
 0x371   :  { %1163 = vmatmul.mubr.msk.bf16.vlgmr.msra.gmra.mxu1 %vm235_vm9, %v987_v47 }
 0x373   :  { %v453_v10 = vpop.permute.xlu1 %452 }
 0x374   :  { %v992_v36 = vpop.permute.xlu0 %991 }
 0x411   :  { %v498_v8 = vpop.f32.mrf.mxu1 }
 0x412   :  { %v499_v32 = vadd.f32 %v498_v8, %v453_v10 }
 0x413   :  { %v500_v19 = vpop.f32.mrf.mxu1 }
 0x414   :  { %v501_v14 = vadd.f32 %v500_v19, %v453_v10  ;;  %v508_v24 = vmul.f32 %v499_v32, %v499_v32 }
 0x415   :  { %v502_v33 = vpop.f32.mrf.mxu1 }
 0x416   :  { %v505_v25 = vadd.f32 %v501_v14, %v499_v32  ;;  %v509_v4 = vmul.f32 %v501_v14, %v501_v14 }
 0x417   :  { %v503_v34 = vpop.f32.mrf.mxu1 }
 0x418   :  { %506 = vadd.xlane.f32.xlu1 %v505_v25  ;;  %v510_v28 = vadd.f32 %v509_v4, %v508_v24 }
 0x431   :  { %v1037_v26 = vpop.f32.mrf.mxu1 }
 0x432   :  { %v1038_v27 = vadd.f32 %v1037_v26, %v992_v36 }
 0x433   :  { %v1039_v29 = vpop.f32.mrf.mxu1 }
 0x434   :  { %v1040_v50 = vadd.f32 %v1039_v29, %v992_v36  ;;  %v1047_v38 = vmul.f32 %v1038_v27, %v1038_v27 }
 0x435   :  { %v1041_v51 = vpop.f32.mrf.mxu1 }
 0x436   :  { %v1044_v56 = vadd.f32 %v1040_v50, %v1038_v27  ;;  %v1048_v40 = vmul.f32 %v1040_v50, %v1040_v50 }
 0x437   :  { %v1042_v18 = vpop.f32.mrf.mxu1 }
 0x438   :  { %1045 = vadd.xlane.f32.xlu0 %v1044_v56  ;;  %v1049_v21 = vadd.f32 %v1048_v40, %v1047_v38 }
 0x43a   :  { %1050 = vadd.xlane.f32.xlu1 %v1049_v21 }
 0x43c   :  { %511 = vadd.xlane.f32.xlu0 %v510_v28 }
 0x4a1   :  { %v507_v3 = vpop.xlane.xlu1 %506 }
 0x4a2   :  { %v513_v63 = vmul.f32 0.00390625, %v507_v3 }
 0x4a4   :  { %v515_v42 = vmul.f32 %v513_v63, %v513_v63 }
 0x4c1   :  { %v1046_v5 = vpop.xlane.xlu0 %1045 }
 0x4c2   :  { %v1052_v13 = vmul.f32 0.00390625, %v1046_v5 }
 0x4c3   :  { %v1051_v35 = vpop.xlane.xlu1 %1050 }
 0x4c4   :  { %v1054_v39 = vmul.f32 %v1052_v13, %v1052_v13  ;;  %v1053_v30 = vmul.f32 0.00390625, %v1051_v35 }
 0x4c5   :  { %v512_v2 = vpop.xlane.xlu0 %511 }
 0x4c6   :  { %v1055_v41 = vsub.f32 %v1053_v30, %v1054_v39  ;;  %v514_v0 = vmul.f32 0.00390625, %v512_v2 }
 0x4c8   :  { %v1057_v1 = vadd.f32 1e-05, %v1055_v41  ;;  %v516_v6 = vsub.f32 %v514_v0, %v515_v42 }
 0x4ca   :  { %1197 = vrsqrt.f32 %v1057_v1  ;;  %v518_v7 = vadd.f32 1e-05, %v516_v6 }
 0x4cc   :  { %1199 = vrsqrt.f32 %v518_v7 }
 0x4d7   :  { %v1198_v16 = vpop.eup %1197 }
 0x4d8   :  { %v1059_v12 = vmul.f32 %v1198_v16, %v1056_v11 }
 0x4d9   :  { %v1200_v20 = vpop.eup %1199 }
 0x4da   :  { %1065 = vperm.xlu1 %1176, %v1059_v12   ;;  %v520_v22 = vmul.f32 %v1200_v20, %v1056_v11  ;;  %v1061_v23 = vmul.f32 %v1059_v12, %v1052_v13 }
 0x4dc   :  { %526 = vperm.xlu0 %1175, %v520_v22   ;;  %v522_v57 = vmul.f32 %v520_v22, %v513_v63  ;;  %v1062_v37 = vsub.f32 %v521_v31, %v1061_v23 }
 0x4de   :  { %v523_v62 = vsub.f32 %v521_v31, %v522_v57 }
 0x4e0   :  { %533 = vperm.xlu1 %1176, %v523_v62   ;;  %1072 = vperm.xlu0 %1175, %v1062_v37  }
 0x555   :  { %v1066_v43 = vpop.permute.xlu1 %1065 }
 0x556   :  { %v1068_v48 = vmul.f32 %v1066_v43, %v1038_v27  ;;  %v1069_v58 = vmul.f32 %v1066_v43, %v1040_v50 }
 0x557   :  { %v527_v44 = vpop.permute.xlu0 %526 }
 0x558   :  { %v529_v59 = vmul.f32 %v527_v44, %v499_v32  ;;  %v530_v60 = vmul.f32 %v527_v44, %v501_v14 }
 0x55b   :  { %v534_v61 = vpop.permute.xlu1 %533  ;;  %v1073_v45 = vpop.permute.xlu0 %1072 }
 0x55c   :  { %v1896_v52 = vadd.f32 %v534_v61, %v529_v59  ;;  %v1898_v53 = vadd.f32 %v534_v61, %v530_v60  ;;  %v1900_v54 = vadd.f32 %v1073_v45, %v1068_v48  ;;  %v1902_v55 = vadd.f32 %v1073_v45, %v1069_v58 }
 0x55e   :  { %v1905_v15 = vmul.f32 0.70710677, %v1896_v52  ;;  %v1908_v17 = vmul.f32 0.70710677, %v1898_v53  ;;  %v1911_v9 = vmul.f32 0.70710677, %v1900_v54 }
 0x55f   :  { %v1914_v49 = vmul.f32 0.70710677, %v1902_v55 }
 0x560   :  { %v542_v46 = vand.u32 2147483647, %v1905_v15  ;;  %v543_v47 = vand.u32 2147483647, %v1908_v17  ;;  %v1081_v8 = vand.u32 2147483647, %v1911_v9 }
 0x561   :  { %v1082_v10 = vand.u32 2147483647, %v1914_v49  ;;  %vm582_vm14 = vcmp.lt.f32.partialorder %v1905_v15, 0.0  ;;  %vm583_vm15 = vcmp.lt.f32.partialorder %v1908_v17, 0.0  ;;  %vm1121_vm0 = vcmp.lt.f32.partialorder %v1911_v9, 0.0  ;;  %v1217_v17 = vld [vmem:[%s1952_s0] sm:$0xff] }
 0x562   :  { %v544_v19 = vmul.f32 0.3275911, %v542_v46  ;;  %v545_v32 = vmul.f32 0.3275911, %v543_v47  ;;  %v1083_v14 = vmul.f32 0.3275911, %v1081_v8 }
 0x563   :  { %v1084_v33 = vmul.f32 0.3275911, %v1082_v10  ;;  %v570_v27 = vsub.f32 0.0, %v542_v46  ;;  %v571_v29 = vsub.f32 0.0, %v543_v47  ;;  %v1109_v51 = vsub.f32 0.0, %v1081_v8 }
 0x564   :  { %v546_v25 = vadd.f32 1.0, %v544_v19  ;;  %v547_v34 = vadd.f32 1.0, %v545_v32  ;;  %v1085_v36 = vadd.f32 1.0, %v1083_v14  ;;  %v1110_v38 = vsub.f32 0.0, %v1082_v10 }
 0x565   :  { %v1086_v26 = vadd.f32 1.0, %v1084_v33  ;;  %v572_v50 = vmul.f32 %v570_v27, %v542_v46  ;;  %v573_v56 = vmul.f32 %v571_v29, %v543_v47  ;;  %v1111_v24 = vmul.f32 %v1109_v51, %v1081_v8 }
 0x566   :  { %1201 = vrcp.f32 %v546_v25  ;;  %v1112_v5 = vmul.f32 %v1110_v38, %v1082_v10  ;;  %vm1122_vm1 = vcmp.lt.f32.partialorder %v1914_v49, 0.0  ;;  %v1078_v9 = vmul.f32 0.5, %v1902_v55  ;;  %v1220_v55 = vld [vmem:[%s1952_s0 + $0x18] sm:$0xff] }
 0x567   :  { %1203 = vrcp.f32 %v547_v34  ;;  %v574_v21 = vmul.f32 1.442695, %v572_v50  ;;  %v576_v3 = vmul.f32 1.442695, %v573_v56  ;;  %v1113_v42 = vmul.f32 1.442695, %v1111_v24 }
 0x568   :  { %1205 = vrcp.f32 %v1085_v36  ;;  %v1115_v1 = vmul.f32 1.442695, %v1112_v5  ;;  %v538_v24 = vmul.f32 0.5, %v1896_v52 }
 0x569   :  { %1207 = vrcp.f32 %v1086_v26 }
 0x56a   :  { %1209 = vpow2.f32 %v574_v21 }
 0x56b   :  { %1211 = vpow2.f32 %v576_v3 }
 0x56c   :  { %1213 = vpow2.f32 %v1113_v42  ;;  %v1077_v42 = vmul.f32 0.5, %v1900_v54 }
 0x56d   :  { %1215 = vpow2.f32 %v1115_v1 }
 0x573   :  { %v1202_v40 = vpop.eup %1201 }
 0x574   :  { %v1204_v4 = vpop.eup %1203  ;;  %v552_v18 = vmul.f32 1.0614054, %v1202_v40 }
 0x575   :  { %v553_v28 = vmul.f32 1.0614054, %v1204_v4  ;;  %v1206_v13 = vpop.eup %1205 }
 0x576   :  { %v554_v63 = vadd.f32 -1.4531521, %v552_v18  ;;  %v1208_v39 = vpop.eup %1207  ;;  %v1091_v2 = vmul.f32 1.0614054, %v1206_v13 }
 0x577   :  { %v555_v35 = vadd.f32 -1.4531521, %v553_v28  ;;  %v1092_v0 = vmul.f32 1.0614054, %v1208_v39  ;;  %v1210_v8 = vpop.eup %1209 }
 0x578   :  { %v556_v30 = vmul.f32 %v1202_v40, %v554_v63  ;;  %v1093_v7 = vadd.f32 -1.4531521, %v1091_v2  ;;  %v1212_v32 = vpop.eup %1211  ;;  %v539_v63 = vmul.f32 0.5, %v1898_v53  ;;  %v1218_v53 = vld [vmem:[%s1952_s0 + $0x8] sm:$0xff] }
 0x579   :  { %v557_v41 = vmul.f32 %v1204_v4, %v555_v35  ;;  %v1094_v16 = vadd.f32 -1.4531521, %v1092_v0  ;;  %v1214_v27 = vpop.eup %1213 }
 0x57a   :  { %v558_v6 = vadd.f32 1.4214138, %v556_v30  ;;  %v1095_v20 = vmul.f32 %v1206_v13, %v1093_v7  ;;  %v1216_v51 = vpop.eup %1215  ;;  %v1219_v7 = vld [vmem:[%s1952_s0 + $0x10] sm:$0xff] }
 0x57b   :  { %v559_v11 = vadd.f32 1.4214138, %v557_v41  ;;  %v1096_v23 = vmul.f32 %v1208_v39, %v1094_v16 }
 0x57c   :  { %v560_v12 = vmul.f32 %v1202_v40, %v558_v6  ;;  %v1097_v57 = vadd.f32 1.4214138, %v1095_v20 }
 0x57d   :  { %v561_v22 = vmul.f32 %v1204_v4, %v559_v11  ;;  %v1098_v37 = vadd.f32 1.4214138, %v1096_v23 }
 0x57e   :  { %v562_v31 = vadd.f32 -0.28449672, %v560_v12  ;;  %v1099_v44 = vmul.f32 %v1206_v13, %v1097_v57 }
 0x57f   :  { %v563_v62 = vadd.f32 -0.28449672, %v561_v22  ;;  %v1100_v58 = vmul.f32 %v1208_v39, %v1098_v37 }
 0x580   :  { %v564_v43 = vmul.f32 %v1202_v40, %v562_v31  ;;  %v1101_v60 = vadd.f32 -0.28449672, %v1099_v44 }
 0x581   :  { %v565_v48 = vmul.f32 %v1204_v4, %v563_v62  ;;  %v1102_v45 = vadd.f32 -0.28449672, %v1100_v58 }
 0x582   :  { %v566_v59 = vadd.f32 0.2548296, %v564_v43  ;;  %v1103_v47 = vmul.f32 %v1206_v13, %v1101_v60 }
 0x583   :  { %v567_v61 = vadd.f32 0.2548296, %v565_v48  ;;  %v1104_v19 = vmul.f32 %v1208_v39, %v1102_v45 }
 0x584   :  { %v568_v46 = vmul.f32 %v1202_v40, %v566_v59  ;;  %v1105_v33 = vadd.f32 0.2548296, %v1103_v47 }
 0x585   :  { %v569_v10 = vmul.f32 %v1204_v4, %v567_v61  ;;  %v1106_v34 = vadd.f32 0.2548296, %v1104_v19 }
 0x586   :  { %v578_v14 = vmul.f32 %v1210_v8, %v568_v46  ;;  %v1107_v26 = vmul.f32 %v1206_v13, %v1105_v33 }
 0x587   :  { %v579_v25 = vmul.f32 %v1212_v32, %v569_v10  ;;  %v1108_v50 = vmul.f32 %v1208_v39, %v1106_v34 }
 0x588   :  { %v580_v36 = vsub.f32 1.0, %v578_v14  ;;  %v1117_v38 = vmul.f32 %v1214_v27, %v1107_v26 }
 0x589   :  { %v581_v29 = vsub.f32 1.0, %v579_v25  ;;  %v1118_v18 = vmul.f32 %v1216_v51, %v1108_v50 }
 0x58a   :  { %v584_v56 = vsub.f32 0.0, %v580_v36  ;;  %v1119_v21 = vsub.f32 1.0, %v1117_v38 }
 0x58b   :  { %v585_v40 = vsub.f32 0.0, %v581_v29  ;;  %v1120_v5 = vsub.f32 1.0, %v1118_v18 }
 0x58c   :  { %v586_v4 = vsel %vm582_vm14, %v584_v56, %v580_v36  ;;  %v1123_v35 = vsub.f32 0.0, %v1119_v21 }
 0x58d   :  { %v587_v28 = vsel %vm583_vm15, %v585_v40, %v581_v29  ;;  %v588_v3 = vadd.f32 1.0, %v586_v4  ;;  %v1124_v30 = vsub.f32 0.0, %v1120_v5 }
 0x58e   :  { %v589_v13 = vadd.f32 1.0, %v587_v28  ;;  %v1125_v2 = vsel %vm1121_vm0, %v1123_v35, %v1119_v21 }
 0x58f   :  { %v590_v39 = vmul.f32 %v588_v3, %v538_v24  ;;  %v1126_v41 = vsel %vm1122_vm1, %v1124_v30, %v1120_v5  ;;  %v1127_v0 = vadd.f32 1.0, %v1125_v2 }
 0x590   :  { %v591_v15 = vmul.f32 %v589_v13, %v539_v63  ;;  %v1128_v6 = vadd.f32 1.0, %v1126_v41 }
 0x591   :  { %v592_v52 = vadd.f32 %v1217_v17, %v590_v39  ;;  %v1129_v49 = vmul.f32 %v1127_v0, %v1077_v42 }
 0x592   :  { %v593_v1 = vadd.f32 %v1218_v53, %v591_v15  ;;  %v1130_v54 = vmul.f32 %v1128_v6, %v1078_v9 }
 0x593   :  { %594 = vst [vmem:[%s1963_s11] sm:$0xff] %v592_v52  ;;  %v1131_v11 = vadd.f32 %v1219_v7, %v1129_v49 }
 0x594   :  { %595 = vst [vmem:[%s1963_s11 + $0x8] sm:$0xff] %v593_v1  ;;  %v1132_v16 = vadd.f32 %v1220_v55, %v1130_v54 }
 0x595   :  { %1164 = vst [vmem:[%s1963_s11 + $0x10] sm:$0xff] %v1131_v11 }
 0x596   :  { %1165 = vst [vmem:[%s1963_s11 + $0x18] sm:$0xff] %v1132_v16 }

// kernel: res_block_forward.1
= control target key start
LH: loop header
LB: loop body
LE: loop exit
PB: predicated region body
PF: predicated region fallthrough
CT: control target
= control target key end

     0   :  { %s1221_s18 = smov 113   ;;  %s1222_s19 = smov 111   ;;  %v1227_v2 = vmov 0   ;;  %v45_v6 = vlaneseq  ;;  %vm239_vm3 = vcmask 1043456   ;;  %vm235_vm9 = vcmask 588800   ;;  %s1952_s0 = inlined_call_operand.vmem [shape: f32[2,8,256], index: 0, kind: input, shape index: {}]   ;;  %s1953_s2 = inlined_call_operand.vmem [shape: f32[8,8], index: 2, kind: input, shape index: {}]   ;;  %s1954_s4 = inlined_call_operand.vmem [shape: f32[8,1], index: 4, kind: input, shape index: {}]   ;;  %s1955_s1 = inlined_call_operand.vmem [shape: f32[9,1,256], index: 1, kind: input, shape index: {}]   ;;  %s1956_s3 = inlined_call_operand.vmem [shape: bf16[8,72], index: 3, kind: input, shape index: {}]   ;;  %s1957_s5 = inlined_call_operand.vmem [shape: f32[8,1], index: 5, kind: input, shape index: {}]   ;;  %s1958_s6 = inlined_call_operand.vmem [shape: f32[8,1], index: 6, kind: input, shape index: {}]   ;;  %s1959_s8 = inlined_call_operand.vmem [shape: f32[8,1], index: 8, kind: input, shape index: {}]   ;;  %s1960_s7 = inlined_call_operand.vmem [shape: bf16[8,72], index: 7, kind: input, shape index: {}]   ;;  %s1961_s9 = inlined_call_operand.vmem [shape: f32[8,1], index: 9, kind: input, shape index: {}]   ;;  %s1962_s10 = inlined_call_operand.vmem [shape: f32[8,1], index: 10, kind: input, shape index: {}]   ;;  %s1963_s11 = inlined_call_operand.vmem [shape: f32[2,8,256], index: 11, kind: output, shape index: {}]  }
   0x1   :  { %v1293_v0 = vld [vmem:[%s1952_s0] sm:$0xff]  ;;  %v1302_v1 = vld [vmem:[%s1952_s0 + $0x8] sm:$0xff]  ;;  %s1223_s22 = smov 112   ;;  %s1224_s23 = smov 127   ;;  %278 = vmatprep.mubr.bf16.mxu0 %v1227_v2  ;;  %1175 = vset.pattern.permute.xlu0 %v1227_v2  ;;  %v1339_v3 = vld [vmem:[%s1952_s0 + $0x18] sm:$0xff] }
   0x2   :  { %152 = vrot.lane.b32.xlu1 %v1293_v0, %s1221_s18  ;;  %196 = vrot.lane.b32.xlu0 %v1293_v0, %s1222_s19  ;;  %s1225_s24 = smov 15   ;;  %s1226_s25 = smov 1   ;;  %v1344_v4 = vld [vmem:[%s1952_s0 + $0x10] sm:$0xff]  ;;  %v229_v5 = vld [vmem:[%s1954_s4] sm:$0xff]  ;;  %v53_v7 = vshrl.u32 %v45_v6, 7  ;;  %v1381_v8 = vand.u32 127, %v45_v6 }
   0x3   :  { %s1228_s26 = smov 17   ;;  %1176 = vset.pattern.permute.xlu1 %v1227_v2  ;;  %496 = vmatprep.mubr.bf16.mxu1 %v1227_v2  ;;  %s1229_s27 = smov 16   ;;  %v1146_v11 = vld [vmem:[%s1955_s1 + $0x10] sm:$0x3]  ;;  %v1144_v14 = vld [vmem:[%s1955_s1 + $0xc] sm:$0x3] }
   0x4   :  { %v1383_v9 = vsub.s32 0, %v53_v7  ;;  %v1385_v10 = vsub.s32 1, %v53_v7  ;;  %vm200_vm0 = vcmp.lt.s32.totalorder %v1381_v8, 111  ;;  %v1145_v16 = vld [vmem:[%s1955_s1 + $0xe] sm:$0x3]  ;;  %vm156_vm1 = vcmp.lt.s32.totalorder %v1381_v8, 113 }
   0x5   :  { %vm178_vm2 = vcmp.lt.s32.totalorder %v1381_v8, 112  ;;  %v1143_v25 = vld [vmem:[%s1955_s1 + $0xa] sm:$0x3]  ;;  %vm134_vm4 = vcmp.lt.s32.totalorder %v1381_v8, 127  ;;  %v1141_v52 = vld [vmem:[%s1955_s1 + $0x4] sm:$0x3] }
   0x6   :  { %154 = vrot.lane.b32.xlu1 %v1302_v1, %s1221_s18  ;;  %198 = vrot.lane.b32.xlu0 %v1302_v1, %s1222_s19  ;;  %v1395_v15 = vrot.slane %v1146_v11, %v1383_v9  ;;  %v1401_v17 = vrot.slane %v1146_v11, %v1385_v10  ;;  %v1405_v18 = vrot.slane %v1144_v14, %v1383_v9  ;;  %v1142_v53 = vld [vmem:[%s1955_s1 + $0x6] sm:$0x3]  ;;  %vm90_vm5 = vcmp.lt.s32.totalorder %v1381_v8, 15 }
   0x7   :  { %v1409_v21 = vrot.slane %v1144_v14, %v1385_v10  ;;  %v1416_v24 = vrot.slane %v1145_v16, %v1383_v9  ;;  %v1425_v28 = vrot.slane %v1145_v16, %v1385_v10  ;;  %v1432_v35 = vrot.slane %v1143_v25, %v1383_v9  ;;  %v50_v14 = vld [vmem:[%s1955_s1] sm:$0x3]  ;;  %v1140_v16 = vld [vmem:[%s1955_s1 + $0x2] sm:$0x3] }
   0x8   :  { %v1440_v39 = vrot.slane %v1143_v25, %v1385_v10  ;;  %v1463_v58 = vrot.slane %v1141_v52, %v1383_v9  ;;  %v1466_v59 = vrot.slane %v1141_v52, %v1385_v10  ;;  %vm112_vm6 = vcmp.lt.s32.totalorder %v1381_v8, 1 }
   0x9   :  { %v1470_v60 = vrot.slane %v1142_v53, %v1383_v9  ;;  %v1473_v61 = vrot.slane %v1142_v53, %v1385_v10  ;;  %vm47_vm7 = vcmp.lt.s32.totalorder %v1381_v8, 17  ;;  %v1495_v25 = vrot.slane %v50_v14, %v1383_v9  ;;  %v1157_v53 = vld [vmem:[%s1955_s1 + $0xc] sm:$0x3] }
   0xa   :  { %176 = vrot.lane.b32.xlu1 %v1302_v1, %s1223_s22  ;;  %174 = vrot.lane.b32.xlu0 %v1293_v0, %s1223_s22  ;;  %vm68_vm8 = vcmp.lt.s32.totalorder %v1381_v8, 16 }
   0xe   :  { %132 = vrot.lane.b32.xlu1 %v1302_v1, %s1224_s23  ;;  %130 = vrot.lane.b32.xlu0 %v1293_v0, %s1224_s23 }
  0x12   :  { %88 = vrot.lane.b32.xlu1 %v1302_v1, %s1225_s24  ;;  %86 = vrot.lane.b32.xlu0 %v1293_v0, %s1225_s24 }
  0x16   :  { %110 = vrot.lane.b32.xlu1 %v1302_v1, %s1226_s25  ;;  %108 = vrot.lane.b32.xlu0 %v1293_v0, %s1226_s25 }
  0x1a   :  { %43 = vrot.lane.b32.xlu1 %v1302_v1, %s1228_s26  ;;  %41 = vrot.lane.b32.xlu0 %v1293_v0, %s1228_s26 }
  0x1e   :  { %66 = vrot.lane.b32.xlu1 %v1302_v1, %s1229_s27  ;;  %64 = vrot.lane.b32.xlu0 %v1293_v0, %s1229_s27 }
  0x22   :  { %741 = vrot.lane.b32.xlu1 %v1339_v3, %s1222_s19  ;;  %739 = vrot.lane.b32.xlu0 %v1344_v4, %s1222_s19 }
  0x26   :  { %701 = vrot.lane.b32.xlu1 %v1339_v3, %s1221_s18  ;;  %699 = vrot.lane.b32.xlu0 %v1344_v4, %s1221_s18 }
  0x2a   :  { %721 = vrot.lane.b32.xlu1 %v1339_v3, %s1223_s22  ;;  %719 = vrot.lane.b32.xlu0 %v1344_v4, %s1223_s22 }
  0x2e   :  { %681 = vrot.lane.b32.xlu1 %v1339_v3, %s1224_s23  ;;  %679 = vrot.lane.b32.xlu0 %v1344_v4, %s1224_s23 }
  0x32   :  { %641 = vrot.lane.b32.xlu1 %v1339_v3, %s1225_s24  ;;  %639 = vrot.lane.b32.xlu0 %v1344_v4, %s1225_s24 }
  0x36   :  { %661 = vrot.lane.b32.xlu1 %v1339_v3, %s1226_s25  ;;  %659 = vrot.lane.b32.xlu0 %v1344_v4, %s1226_s25 }
  0x3a   :  { %601 = vrot.lane.b32.xlu1 %v1339_v3, %s1228_s26  ;;  %599 = vrot.lane.b32.xlu0 %v1344_v4, %s1228_s26 }
  0x3e   :  { %621 = vrot.lane.b32.xlu1 %v1339_v3, %s1229_s27  ;;  %619 = vrot.lane.b32.xlu0 %v1344_v4, %s1229_s27 }
  0x42   :  { %232 = vperm.xlu0 %1175, %v229_v5   ;;  %773 = vperm.xlu1 %1176, %v229_v5  }
  0x74   :  { %v153_v12 = vpop.permute.xlu1 %152  ;;  %v197_v13 = vpop.permute.xlu0 %196 }
  0x78   :  { %v155_v19 = vpop.permute.xlu1 %154  ;;  %v199_v20 = vpop.permute.xlu0 %198 }
  0x79   :  { %v201_v22 = vsel %vm200_vm0, %v197_v13, %v199_v20  ;;  %v202_v23 = vsel %vm200_vm0, %v199_v20, %v197_v13  ;;  %v157_v26 = vsel %vm156_vm1, %v153_v12, %v155_v19  ;;  %v158_v30 = vsel %vm156_vm1, %v155_v19, %v153_v12 }
  0x7a   :  { %v216_v27 = vmul.f32 %v1395_v15, %v201_v22  ;;  %v217_v29 = vmul.f32 %v1401_v17, %v202_v23  ;;  %v172_v36 = vmul.f32 %v1405_v18, %v157_v26  ;;  %v173_v40 = vmul.f32 %v1409_v21, %v158_v30  ;;  %v1159_v30 = vld [vmem:[%s1955_s1 + $0x10] sm:$0x3] }
  0x7b   :  { %v1498_v26 = vrot.slane %v50_v14, %v1385_v10 }
  0x7c   :  { %v177_v31 = vpop.permute.xlu1 %176  ;;  %v175_v32 = vpop.permute.xlu0 %174  ;;  %v227_v33 = vpack.c.bf16 %v217_v29, %v217_v29  ;;  %v226_v34 = vpack.c.bf16 %v216_v27, %v216_v27  ;;  %v1502_v27 = vrot.slane %v1140_v16, %v1383_v9  ;;  %v1505_v29 = vrot.slane %v1140_v16, %v1385_v10 }
  0x7d   :  { %v179_v37 = vsel %vm178_vm2, %v175_v32, %v177_v31  ;;  %v180_v38 = vsel %vm178_vm2, %v177_v31, %v175_v32 }
  0x7e   :  { %v194_v41 = vmul.f32 %v1416_v24, %v179_v37  ;;  %v195_v42 = vmul.f32 %v1425_v28, %v180_v38  ;;  %1147 = vmatprep.subr.msk.bf16.mxu0 %vm239_vm3, %v227_v33  ;;  %v241_v43 = vsel %vm239_vm3, %v226_v34, 0  ;;  %v1519_v38 = vrot.slane %v1159_v30, %v1383_v9 }
  0x7f   :  { %253 = vmatpush1.bf16.msra.mxu0 %v241_v43 }
  0x80   :  { %v133_v44 = vpop.permute.xlu1 %132  ;;  %v131_v45 = vpop.permute.xlu0 %130  ;;  %v225_v46 = vpack.c.bf16 %v195_v42, %v173_v40  ;;  %v224_v47 = vpack.c.bf16 %v194_v41, %v172_v36  ;;  %v1522_v40 = vrot.slane %v1159_v30, %v1385_v10 }
  0x81   :  { %v135_v48 = vsel %vm134_vm4, %v131_v45, %v133_v44  ;;  %v136_v49 = vsel %vm134_vm4, %v133_v44, %v131_v45 }
  0x82   :  { %v150_v50 = vmul.f32 %v1432_v35, %v135_v48  ;;  %v151_v51 = vmul.f32 %v1440_v39, %v136_v49  ;;  %254 = vmatprep.subr.bf16.mxu0 %v225_v46 }
  0x83   :  { %255 = vmatpush1.bf16.msra.mxu0 %v224_v47 }
  0x84   :  { %v89_v54 = vpop.permute.xlu1 %88  ;;  %v87_v55 = vpop.permute.xlu0 %86  ;;  %v223_v56 = vpack.c.bf16 %v151_v51, %v1302_v1  ;;  %v222_v57 = vpack.c.bf16 %v150_v50, %v1293_v0 }
  0x85   :  { %v91_v62 = vsel %vm90_vm5, %v87_v55, %v89_v54  ;;  %v92_v63 = vsel %vm90_vm5, %v89_v54, %v87_v55  ;;  %v228_v54 = vld [vmem:[%s1956_s3] sm:$0xf]  ;;  %v1158_v55 = vld [vmem:[%s1955_s1 + $0xe] sm:$0x3] }
  0x86   :  { %256 = vmatprep.subr.bf16.mxu0 %v223_v56  ;;  %v106_v7 = vmul.f32 %v1463_v58, %v92_v63  ;;  %v107_v11 = vmul.f32 %v1466_v59, %v91_v62 }
  0x87   :  { %257 = vmatpush1.bf16.msra.mxu0 %v222_v57 }
  0x88   :  { %v111_v0 = vpop.permute.xlu1 %110  ;;  %v109_v1 = vpop.permute.xlu0 %108 }
  0x89   :  { %v113_v5 = vsel %vm112_vm6, %v109_v1, %v111_v0  ;;  %v114_v6 = vsel %vm112_vm6, %v111_v0, %v109_v1  ;;  %v1544_v0 = vrot.slane %v1157_v53, %v1383_v9  ;;  %v1547_v1 = vrot.slane %v1157_v53, %v1385_v10 }
  0x8a   :  { %v128_v12 = vmul.f32 %v1470_v60, %v114_v6  ;;  %v129_v13 = vmul.f32 %v1473_v61, %v113_v5  ;;  %v1553_v6 = vrot.slane %v1158_v55, %v1383_v9 }
  0x8c   :  { %v44_v19 = vpop.permute.xlu1 %43  ;;  %v42_v20 = vpop.permute.xlu0 %41  ;;  %v221_v22 = vpack.c.bf16 %v129_v13, %v107_v11  ;;  %v220_v23 = vpack.c.bf16 %v128_v12, %v106_v7  ;;  %v1556_v7 = vrot.slane %v1158_v55, %v1385_v10  ;;  %v1156_v11 = vld [vmem:[%s1955_s1 + $0xa] sm:$0x3] }
  0x8d   :  { %v48_v31 = vsel %vm47_vm7, %v42_v20, %v44_v19  ;;  %v49_v32 = vsel %vm47_vm7, %v44_v19, %v42_v20 }
  0x8e   :  { %258 = vmatprep.subr.bf16.mxu0 %v221_v22  ;;  %v62_v41 = vmul.f32 %v1495_v25, %v49_v32  ;;  %v63_v42 = vmul.f32 %v1498_v26, %v48_v31  ;;  %v1571_v22 = vrot.slane %v1156_v11, %v1383_v9 }
  0x8f   :  { %259 = vmatpush1.bf16.msra.mxu0 %v220_v23  ;;  %v1574_v23 = vrot.slane %v1156_v11, %v1385_v10 }
  0x90   :  { %v67_v33 = vpop.permute.xlu1 %66  ;;  %v65_v34 = vpop.permute.xlu0 %64 }
  0x91   :  { %v69_v36 = vsel %vm68_vm8, %v65_v34, %v67_v33  ;;  %v70_v37 = vsel %vm68_vm8, %v67_v33, %v65_v34 }
  0x92   :  { %v84_v43 = vmul.f32 %v1502_v27, %v70_v37  ;;  %v85_v44 = vmul.f32 %v1505_v29, %v69_v36 }
  0x94   :  { %v742_v45 = vpop.permute.xlu1 %741  ;;  %v740_v46 = vpop.permute.xlu0 %739  ;;  %v219_v47 = vpack.c.bf16 %v85_v44, %v63_v42  ;;  %v218_v48 = vpack.c.bf16 %v84_v43, %v62_v41 }
  0x95   :  { %v743_v49 = vsel %vm200_vm0, %v740_v46, %v742_v45  ;;  %v744_v50 = vsel %vm200_vm0, %v742_v45, %v740_v46  ;;  %v1154_v46 = vld [vmem:[%s1955_s1 + $0x4] sm:$0x3] }
  0x96   :  { %v757_v51 = vmul.f32 %v1519_v38, %v743_v49  ;;  %v758_v52 = vmul.f32 %v1522_v40, %v744_v50  ;;  %260 = vmatprep.subr.bf16.mxu0 %v219_v47  ;;  %v1155_v47 = vld [vmem:[%s1955_s1 + $0x6] sm:$0x3]  ;;  %v1598_v53 = vrot.slane %v1154_v46, %v1385_v10 }
  0x97   :  { %261 = vmatpush1.bf16.msra.mxu0 %v218_v48  ;;  %v1604_v55 = vrot.slane %v1155_v47, %v1385_v10 }
  0x98   :  { %v767_v56 = vpack.c.bf16 %v757_v51, %v757_v51  ;;  %v768_v57 = vpack.c.bf16 %v758_v52, %v758_v52  ;;  %v702_v62 = vpop.permute.xlu1 %701  ;;  %v700_v63 = vpop.permute.xlu0 %699  ;;  %v1595_v52 = vrot.slane %v1154_v46, %v1383_v9 }
  0x99   :  { %v703_v12 = vsel %vm156_vm1, %v700_v63, %v702_v62  ;;  %v704_v13 = vsel %vm156_vm1, %v702_v62, %v700_v63 }
  0x9a   :  { %1148 = vmatmul.mubr.msk.bf16.vlgmr.msra.gmra.mxu0 %vm235_vm9, %v228_v54  ;;  %1160 = vmatprep.subr.msk.bf16.mxu0 %vm239_vm3, %v768_v57  ;;  %v780_v5 = vsel %vm239_vm3, %v767_v56, 0  ;;  %v717_v30 = vmul.f32 %v1544_v0, %v703_v12  ;;  %v718_v31 = vmul.f32 %v1547_v1, %v704_v13  ;;  %v1601_v54 = vrot.slane %v1155_v47, %v1383_v9 }
  0x9b   :  { %792 = vmatpush1.bf16.msra.mxu0 %v780_v5  ;;  %817 = vmatprep.mubr.bf16.mxu0 %v1227_v2 }
  0x9c   :  { %v722_v14 = vpop.permute.xlu1 %721  ;;  %v720_v16 = vpop.permute.xlu0 %719 }
  0x9d   :  { %v723_v19 = vsel %vm178_vm2, %v720_v16, %v722_v14  ;;  %v724_v20 = vsel %vm178_vm2, %v722_v14, %v720_v16  ;;  %v605_v14 = vld [vmem:[%s1955_s1] sm:$0x3]  ;;  %v1153_v16 = vld [vmem:[%s1955_s1 + $0x2] sm:$0x3] }
  0x9e   :  { %v737_v32 = vmul.f32 %v1553_v6, %v723_v19  ;;  %v738_v33 = vmul.f32 %v1556_v7, %v724_v20 }
  0xa0   :  { %v765_v34 = vpack.c.bf16 %v737_v32, %v717_v30  ;;  %v682_v36 = vpop.permute.xlu1 %681  ;;  %v680_v37 = vpop.permute.xlu0 %679  ;;  %v766_v41 = vpack.c.bf16 %v738_v33, %v718_v31  ;;  %v1625_v32 = vrot.slane %v605_v14, %v1383_v9  ;;  %v1628_v33 = vrot.slane %v605_v14, %v1385_v10 }
  0xa1   :  { %v683_v42 = vsel %vm134_vm4, %v680_v37, %v682_v36  ;;  %v684_v43 = vsel %vm134_vm4, %v682_v36, %v680_v37  ;;  %v1634_v36 = vrot.slane %v1153_v16, %v1385_v10 }
  0xa2   :  { %v697_v44 = vmul.f32 %v1571_v22, %v683_v42  ;;  %v698_v45 = vmul.f32 %v1574_v23, %v684_v43  ;;  %793 = vmatprep.subr.bf16.mxu0 %v766_v41 }
  0xa3   :  { %794 = vmatpush1.bf16.msra.mxu0 %v765_v34  ;;  %v1631_v34 = vrot.slane %v1153_v16, %v1383_v9 }
  0xa4   :  { %v763_v48 = vpack.c.bf16 %v697_v44, %v1344_v4  ;;  %v642_v49 = vpop.permute.xlu1 %641  ;;  %v640_v50 = vpop.permute.xlu0 %639  ;;  %v764_v51 = vpack.c.bf16 %v698_v45, %v1339_v3 }
  0xa5   :  { %v643_v4 = vsel %vm90_vm5, %v640_v50, %v642_v49  ;;  %v644_v56 = vsel %vm90_vm5, %v642_v49, %v640_v50  ;;  %v769_v50 = vld [vmem:[%s1956_s3] sm:$0xf] }
  0xa6   :  { %795 = vmatprep.subr.bf16.mxu0 %v764_v51  ;;  %v657_v5 = vmul.f32 %v1595_v52, %v644_v56  ;;  %v658_v11 = vmul.f32 %v1598_v53, %v643_v4 }
  0xa7   :  { %796 = vmatpush1.bf16.msra.mxu0 %v763_v48 }
  0xa8   :  { %v662_v3 = vpop.permute.xlu1 %661  ;;  %v660_v57 = vpop.permute.xlu0 %659 }
  0xa9   :  { %v663_v62 = vsel %vm112_vm6, %v660_v57, %v662_v3  ;;  %v664_v63 = vsel %vm112_vm6, %v662_v3, %v660_v57 }
  0xaa   :  { %v677_v12 = vmul.f32 %v1601_v54, %v664_v63  ;;  %v678_v13 = vmul.f32 %v1604_v55, %v663_v62 }
  0xac   :  { %v761_v19 = vpack.c.bf16 %v677_v12, %v657_v5  ;;  %v602_v20 = vpop.permute.xlu1 %601  ;;  %v600_v30 = vpop.permute.xlu0 %599  ;;  %v762_v31 = vpack.c.bf16 %v678_v13, %v658_v11 }
  0xad   :  { %v603_v37 = vsel %vm47_vm7, %v600_v30, %v602_v20  ;;  %v604_v41 = vsel %vm47_vm7, %v602_v20, %v600_v30 }
  0xae   :  { %797 = vmatprep.subr.bf16.mxu0 %v762_v31  ;;  %v617_v9 = vmul.f32 %v1625_v32, %v604_v41  ;;  %v618_v10 = vmul.f32 %v1628_v33, %v603_v37 }
  0xaf   :  { %798 = vmatpush1.bf16.msra.mxu0 %v761_v19 }
  0xb0   :  { %v622_v42 = vpop.permute.xlu1 %621  ;;  %v620_v43 = vpop.permute.xlu0 %619 }
  0xb1   :  { %v623_v44 = vsel %vm68_vm8, %v620_v43, %v622_v42  ;;  %v624_v45 = vsel %vm68_vm8, %v622_v42, %v620_v43 }
  0xb2   :  { %v637_v46 = vmul.f32 %v1631_v34, %v624_v45  ;;  %v638_v47 = vmul.f32 %v1634_v36, %v623_v44 }
  0xb4   :  { %v759_v48 = vpack.c.bf16 %v637_v46, %v617_v9  ;;  %v760_v49 = vpack.c.bf16 %v638_v47, %v618_v10 }
  0xb6   :  { %799 = vmatprep.subr.bf16.mxu0 %v760_v49 }
  0xb7   :  { %800 = vmatpush1.bf16.msra.mxu0 %v759_v48 }
  0xba   :  { %1161 = vmatmul.mubr.msk.bf16.vlgmr.msra.gmra.mxu0 %vm235_vm9, %v769_v50  ;;  %v299_v50 = vld [vmem:[%s1957_s5] sm:$0xff] }
  0xbd   :  { %v233_v51 = vpop.permute.xlu0 %232  ;;  %v774_v14 = vpop.permute.xlu1 %773 }
 0x15a   :  { %v280_v4 = vpop.f32.mrf.mxu0 }
 0x15b   :  { %v281_v56 = vadd.f32 %v280_v4, %v233_v51 }
 0x15c   :  { %v282_v3 = vpop.f32.mrf.mxu0 }
 0x15d   :  { %v283_v57 = vadd.f32 %v282_v3, %v233_v51  ;;  %v290_v5 = vmul.f32 %v281_v56, %v281_v56  ;;  %v303_v3 = vld [vmem:[%s1958_s6] sm:$0xff] }
 0x15e   :  { %v284_v62 = vpop.f32.mrf.mxu0 }
 0x15f   :  { %v287_v63 = vadd.f32 %v283_v57, %v281_v56  ;;  %v291_v11 = vmul.f32 %v283_v57, %v283_v57 }
 0x160   :  { %v285_v12 = vpop.f32.mrf.mxu0 }
 0x161   :  { %288 = vadd.xlane.f32.xlu1 %v287_v63  ;;  %v292_v13 = vadd.f32 %v291_v11, %v290_v5 }
 0x163   :  { %293 = vadd.xlane.f32.xlu0 %v292_v13 }
 0x17a   :  { %v819_v16 = vpop.f32.mrf.mxu0 }
 0x17b   :  { %v1652_v19 = vadd.f32 %v819_v16, %v774_v14 }
 0x17c   :  { %v821_v20 = vpop.f32.mrf.mxu0 }
 0x17d   :  { %v1654_v30 = vadd.f32 %v821_v20, %v774_v14  ;;  %v829_v41 = vmul.f32 %v1652_v19, %v1652_v19 }
 0x17e   :  { %v823_v31 = vpop.f32.mrf.mxu0 }
 0x17f   :  { %v826_v37 = vadd.f32 %v1654_v30, %v1652_v19  ;;  %v830_v42 = vmul.f32 %v1654_v30, %v1654_v30 }
 0x180   :  { %v824_v43 = vpop.f32.mrf.mxu0 }
 0x181   :  { %827 = vadd.xlane.f32.xlu0 %v826_v37  ;;  %v831_v44 = vadd.f32 %v830_v42, %v829_v41 }
 0x183   :  { %832 = vadd.xlane.f32.xlu1 %v831_v44 }
 0x1ea   :  { %v289_v45 = vpop.xlane.xlu1 %288 }
 0x1eb   :  { %v295_v9 = vmul.f32 0.00390625, %v289_v45 }
 0x1ec   :  { %v294_v10 = vpop.xlane.xlu0 %293 }
 0x1ed   :  { %v297_v46 = vmul.f32 %v295_v9, %v295_v9  ;;  %v296_v47 = vmul.f32 0.00390625, %v294_v10 }
 0x1ef   :  { %v298_v48 = vsub.f32 %v296_v47, %v297_v46 }
 0x1f1   :  { %v300_v49 = vadd.f32 1e-05, %v298_v48 }
 0x1f3   :  { %1177 = vrsqrt.f32 %v300_v49 }
 0x200   :  { %v1178_v51 = vpop.eup %1177 }
 0x201   :  { %v302_v4 = vmul.f32 %v1178_v51, %v299_v50 }
 0x203   :  { %308 = vperm.xlu0 %1175, %v302_v4   ;;  %v304_v62 = vmul.f32 %v302_v4, %v295_v9 }
 0x205   :  { %v305_v63 = vsub.f32 %v303_v3, %v304_v62 }
 0x207   :  { %315 = vperm.xlu1 %1176, %v305_v63  }
 0x20a   :  { %v828_v5 = vpop.xlane.xlu0 %827 }
 0x20b   :  { %v834_v11 = vmul.f32 0.00390625, %v828_v5 }
 0x20c   :  { %v833_v12 = vpop.xlane.xlu1 %832 }
 0x20d   :  { %v836_v13 = vmul.f32 %v834_v11, %v834_v11  ;;  %v835_v14 = vmul.f32 0.00390625, %v833_v12 }
 0x20f   :  { %v837_v16 = vsub.f32 %v835_v14, %v836_v13 }
 0x211   :  { %v839_v20 = vadd.f32 1e-05, %v837_v16 }
 0x213   :  { %1179 = vrsqrt.f32 %v839_v20 }
 0x220   :  { %v1180_v31 = vpop.eup %1179 }
 0x221   :  { %v841_v37 = vmul.f32 %v1180_v31, %v299_v50 }
 0x223   :  { %847 = vperm.xlu1 %1176, %v841_v37   ;;  %v843_v41 = vmul.f32 %v841_v37, %v834_v11 }
 0x225   :  { %v844_v42 = vsub.f32 %v303_v3, %v843_v41 }
 0x227   :  { %854 = vperm.xlu0 %1175, %v844_v42  }
 0x27e   :  { %v309_v43 = vpop.permute.xlu0 %308 }
 0x27f   :  { %v311_v44 = vmul.f32 %v309_v43, %v281_v56  ;;  %v312_v45 = vmul.f32 %v309_v43, %v283_v57 }
 0x282   :  { %v316_v9 = vpop.permute.xlu1 %315 }
 0x283   :  { %v1668_v10 = vadd.f32 %v316_v9, %v311_v44  ;;  %v1670_v46 = vadd.f32 %v316_v9, %v312_v45 }
 0x285   :  { %v1673_v47 = vmul.f32 0.70710677, %v1668_v10  ;;  %v1676_v48 = vmul.f32 0.70710677, %v1670_v46 }
 0x287   :  { %v324_v49 = vand.u32 2147483647, %v1673_v47  ;;  %v325_v50 = vand.u32 2147483647, %v1676_v48  ;;  %vm364_vm10 = vcmp.lt.f32.partialorder %v1673_v47, 0.0  ;;  %vm365_vm11 = vcmp.lt.f32.partialorder %v1676_v48, 0.0 }
 0x289   :  { %v326_v51 = vmul.f32 0.3275911, %v324_v49  ;;  %v327_v4 = vmul.f32 0.3275911, %v325_v50  ;;  %v352_v57 = vsub.f32 0.0, %v324_v49  ;;  %v353_v62 = vsub.f32 0.0, %v325_v50 }
 0x28b   :  { %v328_v3 = vadd.f32 1.0, %v326_v51  ;;  %v329_v56 = vadd.f32 1.0, %v327_v4  ;;  %v354_v63 = vmul.f32 %v352_v57, %v324_v49  ;;  %v355_v5 = vmul.f32 %v353_v62, %v325_v50 }
 0x28d   :  { %1181 = vrcp.f32 %v328_v3  ;;  %v356_v14 = vmul.f32 1.442695, %v354_v63  ;;  %v358_v20 = vmul.f32 1.442695, %v355_v5 }
 0x28e   :  { %1183 = vrcp.f32 %v329_v56 }
 0x28f   :  { %1185 = vpow2.f32 %v356_v14 }
 0x290   :  { %1187 = vpow2.f32 %v358_v20 }
 0x29a   :  { %v1182_v11 = vpop.eup %1181 }
 0x29b   :  { %v1184_v12 = vpop.eup %1183  ;;  %v334_v13 = vmul.f32 1.0614054, %v1182_v11 }
 0x29c   :  { %v335_v16 = vmul.f32 1.0614054, %v1184_v12 }
 0x29d   :  { %v336_v31 = vadd.f32 -1.4531521, %v334_v13 }
 0x29e   :  { %v337_v37 = vadd.f32 -1.4531521, %v335_v16  ;;  %v848_v41 = vpop.permute.xlu1 %847 }
 0x29f   :  { %v338_v42 = vmul.f32 %v1182_v11, %v336_v31  ;;  %v850_v45 = vmul.f32 %v848_v41, %v1652_v19  ;;  %v851_v9 = vmul.f32 %v848_v41, %v1654_v30 }
 0x2a0   :  { %v339_v43 = vmul.f32 %v1184_v12, %v337_v37 }
 0x2a1   :  { %v340_v44 = vadd.f32 1.4214138, %v338_v42 }
 0x2a2   :  { %v341_v49 = vadd.f32 1.4214138, %v339_v43  ;;  %v855_v50 = vpop.permute.xlu0 %854  ;;  %v1186_v43 = vpop.eup %1185 }
 0x2a3   :  { %v342_v51 = vmul.f32 %v1182_v11, %v340_v44  ;;  %v1682_v4 = vadd.f32 %v855_v50, %v850_v45  ;;  %v1684_v3 = vadd.f32 %v855_v50, %v851_v9  ;;  %v1188_v9 = vpop.eup %1187 }
 0x2a4   :  { %v343_v56 = vmul.f32 %v1184_v12, %v341_v49 }
 0x2a5   :  { %v344_v57 = vadd.f32 -0.28449672, %v342_v51  ;;  %v1687_v62 = vmul.f32 0.70710677, %v1682_v4  ;;  %v1690_v5 = vmul.f32 0.70710677, %v1684_v3 }
 0x2a6   :  { %v345_v63 = vadd.f32 -0.28449672, %v343_v56 }
 0x2a7   :  { %v346_v13 = vmul.f32 %v1182_v11, %v344_v57  ;;  %v863_v19 = vand.u32 2147483647, %v1687_v62  ;;  %v864_v14 = vand.u32 2147483647, %v1690_v5  ;;  %vm903_vm12 = vcmp.lt.f32.partialorder %v1687_v62, 0.0 }
 0x2a8   :  { %v347_v30 = vmul.f32 %v1184_v12, %v345_v63  ;;  %vm904_vm13 = vcmp.lt.f32.partialorder %v1690_v5, 0.0 }
 0x2a9   :  { %v348_v16 = vadd.f32 0.2548296, %v346_v13  ;;  %v865_v20 = vmul.f32 0.3275911, %v863_v19  ;;  %v866_v37 = vmul.f32 0.3275911, %v864_v14 }
 0x2aa   :  { %v349_v31 = vadd.f32 0.2548296, %v347_v30  ;;  %v891_v30 = vsub.f32 0.0, %v863_v19 }
 0x2ab   :  { %v350_v41 = vmul.f32 %v1182_v11, %v348_v16  ;;  %v867_v42 = vadd.f32 1.0, %v865_v20  ;;  %v868_v45 = vadd.f32 1.0, %v866_v37  ;;  %v320_v11 = vmul.f32 0.5, %v1668_v10 }
 0x2ac   :  { %v351_v44 = vmul.f32 %v1184_v12, %v349_v31  ;;  %v892_v20 = vsub.f32 0.0, %v864_v14  ;;  %v321_v31 = vmul.f32 0.5, %v1670_v46 }
 0x2ad   :  { %v360_v49 = vmul.f32 %v1186_v43, %v350_v41  ;;  %1189 = vrcp.f32 %v867_v42  ;;  %v893_v43 = vmul.f32 %v891_v30, %v863_v19 }
 0x2ae   :  { %v361_v50 = vmul.f32 %v1188_v9, %v351_v44  ;;  %1191 = vrcp.f32 %v868_v45  ;;  %v894_v44 = vmul.f32 %v892_v20, %v864_v14 }
 0x2af   :  { %v362_v51 = vsub.f32 1.0, %v360_v49  ;;  %v895_v45 = vmul.f32 1.442695, %v893_v43 }
 0x2b0   :  { %v363_v56 = vsub.f32 1.0, %v361_v50  ;;  %v897_v49 = vmul.f32 1.442695, %v894_v44 }
 0x2b1   :  { %v366_v57 = vsub.f32 0.0, %v362_v51  ;;  %1193 = vpow2.f32 %v895_v45 }
 0x2b2   :  { %v367_v63 = vsub.f32 0.0, %v363_v56  ;;  %1195 = vpow2.f32 %v897_v49 }
 0x2b3   :  { %v368_v13 = vsel %vm364_vm10, %v366_v57, %v362_v51 }
 0x2b4   :  { %v369_v16 = vsel %vm365_vm11, %v367_v63, %v363_v56  ;;  %v370_v12 = vadd.f32 1.0, %v368_v13 }
 0x2b5   :  { %v371_v37 = vadd.f32 1.0, %v369_v16 }
 0x2b6   :  { %v1698_v41 = vmul.f32 %v370_v12, %v320_v11 }
 0x2b7   :  { %v1700_v42 = vmul.f32 %v371_v37, %v321_v31 }
 0x2b8   :  { %430 = vrot.lane.b32.xlu1 %v1698_v41, %s1222_s19 }
 0x2b9   :  { %432 = vrot.lane.b32.xlu0 %v1700_v42, %s1222_s19 }
 0x2ba   :  { %v1190_v47 = vpop.eup %1189 }
 0x2bb   :  { %v1192_v10 = vpop.eup %1191  ;;  %v873_v48 = vmul.f32 1.0614054, %v1190_v47 }
 0x2bc   :  { %v874_v9 = vmul.f32 1.0614054, %v1192_v10  ;;  %414 = vrot.lane.b32.xlu1 %v1698_v41, %s1221_s18 }
 0x2bd   :  { %v875_v46 = vadd.f32 -1.4531521, %v873_v48  ;;  %416 = vrot.lane.b32.xlu0 %v1700_v42, %s1221_s18 }
 0x2be   :  { %v876_v19 = vadd.f32 -1.4531521, %v874_v9  ;;  %v1194_v37 = vpop.eup %1193 }
 0x2bf   :  { %v877_v14 = vmul.f32 %v1190_v47, %v875_v46  ;;  %v1196_v44 = vpop.eup %1195 }
 0x2c0   :  { %v878_v50 = vmul.f32 %v1192_v10, %v876_v19  ;;  %422 = vrot.lane.b32.xlu1 %v1698_v41, %s1223_s22  ;;  %v859_v19 = vmul.f32 0.5, %v1682_v4  ;;  %v988_v4 = vld [vmem:[%s1959_s8] sm:$0xff] }
 0x2c1   :  { %v879_v51 = vadd.f32 1.4214138, %v877_v14  ;;  %424 = vrot.lane.b32.xlu0 %v1700_v42, %s1223_s22 }
 0x2c2   :  { %v880_v56 = vadd.f32 1.4214138, %v878_v50 }
 0x2c3   :  { %v881_v57 = vmul.f32 %v1190_v47, %v879_v51  ;;  %v860_v51 = vmul.f32 0.5, %v1684_v3 }
 0x2c4   :  { %v882_v63 = vmul.f32 %v1192_v10, %v880_v56  ;;  %406 = vrot.lane.b32.xlu1 %v1698_v41, %s1224_s23 }
 0x2c5   :  { %v883_v13 = vadd.f32 -0.28449672, %v881_v57  ;;  %408 = vrot.lane.b32.xlu0 %v1700_v42, %s1224_s23 }
 0x2c6   :  { %v884_v30 = vadd.f32 -0.28449672, %v882_v63 }
 0x2c7   :  { %v885_v11 = vmul.f32 %v1190_v47, %v883_v13 }
 0x2c8   :  { %v886_v16 = vmul.f32 %v1192_v10, %v884_v30  ;;  %390 = vrot.lane.b32.xlu1 %v1698_v41, %s1225_s24 }
 0x2c9   :  { %v887_v12 = vadd.f32 0.2548296, %v885_v11  ;;  %392 = vrot.lane.b32.xlu0 %v1700_v42, %s1225_s24 }
 0x2ca   :  { %v888_v20 = vadd.f32 0.2548296, %v886_v16 }
 0x2cb   :  { %v889_v31 = vmul.f32 %v1190_v47, %v887_v12 }
 0x2cc   :  { %v890_v43 = vmul.f32 %v1192_v10, %v888_v20  ;;  %398 = vrot.lane.b32.xlu1 %v1698_v41, %s1226_s25 }
 0x2cd   :  { %v899_v48 = vmul.f32 %v1194_v37, %v889_v31  ;;  %400 = vrot.lane.b32.xlu0 %v1700_v42, %s1226_s25 }
 0x2ce   :  { %v900_v45 = vmul.f32 %v1196_v44, %v890_v43 }
 0x2cf   :  { %v901_v9 = vsub.f32 1.0, %v899_v48 }
 0x2d0   :  { %v902_v49 = vsub.f32 1.0, %v900_v45  ;;  %374 = vrot.lane.b32.xlu1 %v1698_v41, %s1228_s26 }
 0x2d1   :  { %v905_v46 = vsub.f32 0.0, %v901_v9  ;;  %376 = vrot.lane.b32.xlu0 %v1700_v42, %s1228_s26 }
 0x2d2   :  { %v906_v47 = vsub.f32 0.0, %v902_v49 }
 0x2d3   :  { %v907_v10 = vsel %vm903_vm12, %v905_v46, %v901_v9 }
 0x2d4   :  { %v908_v14 = vsel %vm904_vm13, %v906_v47, %v902_v49  ;;  %v909_v50 = vadd.f32 1.0, %v907_v10  ;;  %382 = vrot.lane.b32.xlu1 %v1698_v41, %s1229_s27 }
 0x2d5   :  { %v910_v56 = vadd.f32 1.0, %v908_v14  ;;  %384 = vrot.lane.b32.xlu0 %v1700_v42, %s1229_s27 }
 0x2d6   :  { %v1738_v57 = vmul.f32 %v909_v50, %v859_v19 }
 0x2d7   :  { %v1740_v62 = vmul.f32 %v910_v56, %v860_v51 }
 0x2d8   :  { %969 = vrot.lane.b32.xlu1 %v1738_v57, %s1222_s19 }
 0x2d9   :  { %971 = vrot.lane.b32.xlu0 %v1740_v62, %s1222_s19 }
 0x2dc   :  { %953 = vrot.lane.b32.xlu1 %v1738_v57, %s1221_s18 }
 0x2dd   :  { %955 = vrot.lane.b32.xlu0 %v1740_v62, %s1221_s18 }
 0x2e0   :  { %961 = vrot.lane.b32.xlu1 %v1738_v57, %s1223_s22 }
 0x2e1   :  { %963 = vrot.lane.b32.xlu0 %v1740_v62, %s1223_s22 }
 0x2e4   :  { %945 = vrot.lane.b32.xlu1 %v1738_v57, %s1224_s23 }
 0x2e5   :  { %947 = vrot.lane.b32.xlu0 %v1740_v62, %s1224_s23 }
 0x2e8   :  { %929 = vrot.lane.b32.xlu1 %v1738_v57, %s1225_s24 }
 0x2e9   :  { %931 = vrot.lane.b32.xlu0 %v1740_v62, %s1225_s24 }
 0x2ec   :  { %937 = vrot.lane.b32.xlu1 %v1738_v57, %s1226_s25 }
 0x2ed   :  { %939 = vrot.lane.b32.xlu0 %v1740_v62, %s1226_s25 }
 0x2f0   :  { %913 = vrot.lane.b32.xlu1 %v1738_v57, %s1228_s26 }
 0x2f1   :  { %915 = vrot.lane.b32.xlu0 %v1740_v62, %s1228_s26 }
 0x2f4   :  { %921 = vrot.lane.b32.xlu1 %v1738_v57, %s1229_s27 }
 0x2f5   :  { %923 = vrot.lane.b32.xlu0 %v1740_v62, %s1229_s27 }
 0x2f8   :  { %452 = vperm.xlu1 %1176, %v988_v4  }
 0x2f9   :  { %991 = vperm.xlu0 %1175, %v988_v4  }
 0x32a   :  { %v431_v3 = vpop.permute.xlu1 %430 }
 0x32b   :  { %v433_v5 = vpop.permute.xlu0 %432 }
 0x32c   :  { %v434_v63 = vsel %vm200_vm0, %v431_v3, %v433_v5  ;;  %v435_v13 = vsel %vm200_vm0, %v433_v5, %v431_v3 }
 0x32d   :  { %v436_v30 = vmul.f32 %v434_v63, %v1395_v15  ;;  %v437_v11 = vmul.f32 %v435_v13, %v1401_v17 }
 0x32e   :  { %v415_v16 = vpop.permute.xlu1 %414 }
 0x32f   :  { %v417_v12 = vpop.permute.xlu0 %416  ;;  %v447_v20 = vpack.c.bf16 %v437_v11, %v437_v11  ;;  %v446_v31 = vpack.c.bf16 %v436_v30, %v436_v30 }
 0x330   :  { %v418_v43 = vsel %vm156_vm1, %v415_v16, %v417_v12  ;;  %v419_v44 = vsel %vm156_vm1, %v417_v12, %v415_v16 }
 0x331   :  { %1149 = vmatprep.subr.msk.bf16.mxu1 %vm239_vm3, %v447_v20  ;;  %v459_v37 = vsel %vm239_vm3, %v446_v31, 0  ;;  %v420_v9 = vmul.f32 %v418_v43, %v1405_v18  ;;  %v421_v49 = vmul.f32 %v419_v44, %v1409_v21 }
 0x332   :  { %471 = vmatpush1.bf16.msra.mxu1 %v459_v37  ;;  %v423_v48 = vpop.permute.xlu1 %422 }
 0x333   :  { %v425_v45 = vpop.permute.xlu0 %424 }
 0x334   :  { %v426_v15 = vsel %vm178_vm2, %v423_v48, %v425_v45  ;;  %v427_v17 = vsel %vm178_vm2, %v425_v45, %v423_v48 }
 0x335   :  { %v428_v46 = vmul.f32 %v426_v15, %v1416_v24  ;;  %v429_v47 = vmul.f32 %v427_v17, %v1425_v28 }
 0x336   :  { %v407_v10 = vpop.permute.xlu1 %406 }
 0x337   :  { %v409_v19 = vpop.permute.xlu0 %408  ;;  %v445_v14 = vpack.c.bf16 %v429_v47, %v421_v49  ;;  %v444_v50 = vpack.c.bf16 %v428_v46, %v420_v9 }
 0x338   :  { %v410_v51 = vsel %vm134_vm4, %v407_v10, %v409_v19  ;;  %v411_v56 = vsel %vm134_vm4, %v409_v19, %v407_v10 }
 0x339   :  { %v412_v4 = vmul.f32 %v410_v51, %v1432_v35  ;;  %v413_v18 = vmul.f32 %v411_v56, %v1440_v39  ;;  %472 = vmatprep.subr.bf16.mxu1 %v445_v14 }
 0x33a   :  { %473 = vmatpush1.bf16.msra.mxu1 %v444_v50  ;;  %v391_v21 = vpop.permute.xlu1 %390 }
 0x33b   :  { %v393_v24 = vpop.permute.xlu0 %392  ;;  %v443_v28 = vpack.c.bf16 %v413_v18, %v1700_v42  ;;  %v442_v3 = vpack.c.bf16 %v412_v4, %v1698_v41 }
 0x33c   :  { %v394_v5 = vsel %vm90_vm5, %v391_v21, %v393_v24  ;;  %v395_v63 = vsel %vm90_vm5, %v393_v24, %v391_v21 }
 0x33d   :  { %474 = vmatprep.subr.bf16.mxu1 %v443_v28  ;;  %v396_v42 = vmul.f32 %v395_v63, %v1463_v58  ;;  %v397_v41 = vmul.f32 %v394_v5, %v1466_v59 }
 0x33e   :  { %475 = vmatpush1.bf16.msra.mxu1 %v442_v3  ;;  %v399_v13 = vpop.permute.xlu1 %398 }
 0x33f   :  { %v401_v35 = vpop.permute.xlu0 %400 }
 0x340   :  { %v402_v39 = vsel %vm112_vm6, %v399_v13, %v401_v35  ;;  %v403_v30 = vsel %vm112_vm6, %v401_v35, %v399_v13 }
 0x341   :  { %v404_v11 = vmul.f32 %v403_v30, %v1470_v60  ;;  %v405_v16 = vmul.f32 %v402_v39, %v1473_v61 }
 0x342   :  { %v375_v12 = vpop.permute.xlu1 %374 }
 0x343   :  { %v377_v20 = vpop.permute.xlu0 %376  ;;  %v441_v31 = vpack.c.bf16 %v405_v16, %v397_v41  ;;  %v440_v37 = vpack.c.bf16 %v404_v11, %v396_v42 }
 0x344   :  { %v378_v43 = vsel %vm47_vm7, %v375_v12, %v377_v20  ;;  %v379_v44 = vsel %vm47_vm7, %v377_v20, %v375_v12 }
 0x345   :  { %476 = vmatprep.subr.bf16.mxu1 %v441_v31  ;;  %v380_v61 = vmul.f32 %v379_v44, %v1495_v25  ;;  %v381_v45 = vmul.f32 %v378_v43, %v1498_v26 }
 0x346   :  { %477 = vmatpush1.bf16.msra.mxu1 %v440_v37  ;;  %v383_v48 = vpop.permute.xlu1 %382 }
 0x347   :  { %v385_v58 = vpop.permute.xlu0 %384 }
 0x348   :  { %v386_v59 = vsel %vm68_vm8, %v383_v48, %v385_v58  ;;  %v387_v60 = vsel %vm68_vm8, %v385_v58, %v383_v48 }
 0x349   :  { %v388_v15 = vmul.f32 %v387_v60, %v1502_v27  ;;  %v389_v17 = vmul.f32 %v386_v59, %v1505_v29  ;;  %v448_v27 = vld [vmem:[%s1960_s7] sm:$0xf] }
 0x34a   :  { %v970_v9 = vpop.permute.xlu1 %969 }
 0x34b   :  { %v972_v49 = vpop.permute.xlu0 %971  ;;  %v439_v46 = vpack.c.bf16 %v389_v17, %v381_v45  ;;  %v438_v47 = vpack.c.bf16 %v388_v15, %v380_v61 }
 0x34c   :  { %v973_v10 = vsel %vm200_vm0, %v970_v9, %v972_v49  ;;  %v974_v19 = vsel %vm200_vm0, %v972_v49, %v970_v9 }
 0x34d   :  { %v975_v14 = vmul.f32 %v973_v10, %v1519_v38  ;;  %v976_v25 = vmul.f32 %v974_v19, %v1522_v40  ;;  %478 = vmatprep.subr.bf16.mxu1 %v439_v46 }
 0x34e   :  { %479 = vmatpush1.bf16.msra.mxu1 %v438_v47  ;;  %v954_v26 = vpop.permute.xlu1 %953  ;;  %v987_v47 = vld [vmem:[%s1960_s7] sm:$0xf] }
 0x34f   :  { %v985_v29 = vpack.c.bf16 %v975_v14, %v975_v14  ;;  %v986_v50 = vpack.c.bf16 %v976_v25, %v976_v25  ;;  %v956_v51 = vpop.permute.xlu0 %955 }
 0x350   :  { %v957_v38 = vsel %vm156_vm1, %v954_v26, %v956_v51  ;;  %v958_v40 = vsel %vm156_vm1, %v956_v51, %v954_v26 }
 0x351   :  { %1150 = vmatmul.mubr.msk.bf16.vlgmr.msra.gmra.mxu1 %vm235_vm9, %v448_v27  ;;  %1162 = vmatprep.subr.msk.bf16.mxu1 %vm239_vm3, %v986_v50  ;;  %v998_v56 = vsel %vm239_vm3, %v985_v29, 0  ;;  %v959_v28 = vmul.f32 %v957_v38, %v1544_v0  ;;  %v960_v3 = vmul.f32 %v958_v40, %v1547_v1 }
 0x352   :  { %1010 = vmatpush1.bf16.msra.mxu1 %v998_v56  ;;  %v962_v4 = vpop.permute.xlu1 %961  ;;  %1035 = vmatprep.mubr.bf16.mxu1 %v1227_v2 }
 0x353   :  { %v964_v18 = vpop.permute.xlu0 %963 }
 0x354   :  { %v965_v21 = vsel %vm178_vm2, %v962_v4, %v964_v18  ;;  %v966_v24 = vsel %vm178_vm2, %v964_v18, %v962_v4 }
 0x355   :  { %v967_v5 = vmul.f32 %v965_v21, %v1553_v6  ;;  %v968_v63 = vmul.f32 %v966_v24, %v1556_v7 }
 0x356   :  { %v946_v13 = vpop.permute.xlu1 %945 }
 0x357   :  { %v983_v35 = vpack.c.bf16 %v967_v5, %v959_v28  ;;  %v948_v39 = vpop.permute.xlu0 %947  ;;  %v984_v30 = vpack.c.bf16 %v968_v63, %v960_v3 }
 0x358   :  { %v949_v2 = vsel %vm134_vm4, %v946_v13, %v948_v39  ;;  %v950_v42 = vsel %vm134_vm4, %v948_v39, %v946_v13 }
 0x359   :  { %v951_v41 = vmul.f32 %v949_v2, %v1571_v22  ;;  %v952_v0 = vmul.f32 %v950_v42, %v1574_v23  ;;  %1011 = vmatprep.subr.bf16.mxu1 %v984_v30 }
 0x35a   :  { %1012 = vmatpush1.bf16.msra.mxu1 %v983_v35  ;;  %v930_v1 = vpop.permute.xlu1 %929 }
 0x35b   :  { %v981_v6 = vpack.c.bf16 %v951_v41, %v1738_v57  ;;  %v932_v7 = vpop.permute.xlu0 %931  ;;  %v982_v11 = vpack.c.bf16 %v952_v0, %v1740_v62 }
 0x35c   :  { %v933_v16 = vsel %vm90_vm5, %v930_v1, %v932_v7  ;;  %v934_v12 = vsel %vm90_vm5, %v932_v7, %v930_v1 }
 0x35d   :  { %1013 = vmatprep.subr.bf16.mxu1 %v982_v11  ;;  %v935_v57 = vmul.f32 %v934_v12, %v1595_v52  ;;  %v936_v62 = vmul.f32 %v933_v16, %v1598_v53  ;;  %v1056_v11 = vld [vmem:[%s1961_s9] sm:$0xff] }
 0x35e   :  { %1014 = vmatpush1.bf16.msra.mxu1 %v981_v6  ;;  %v938_v20 = vpop.permute.xlu1 %937 }
 0x35f   :  { %v940_v22 = vpop.permute.xlu0 %939 }
 0x360   :  { %v941_v23 = vsel %vm112_vm6, %v938_v20, %v940_v22  ;;  %v942_v31 = vsel %vm112_vm6, %v940_v22, %v938_v20 }
 0x361   :  { %v943_v37 = vmul.f32 %v942_v31, %v1601_v54  ;;  %v944_v43 = vmul.f32 %v941_v23, %v1604_v55  ;;  %v521_v31 = vld [vmem:[%s1962_s10] sm:$0xff] }
 0x362   :  { %v914_v44 = vpop.permute.xlu1 %913 }
 0x363   :  { %v979_v48 = vpack.c.bf16 %v943_v37, %v935_v57  ;;  %v916_v58 = vpop.permute.xlu0 %915  ;;  %v980_v59 = vpack.c.bf16 %v944_v43, %v936_v62 }
 0x364   :  { %v917_v60 = vsel %vm47_vm7, %v914_v44, %v916_v58  ;;  %v918_v61 = vsel %vm47_vm7, %v916_v58, %v914_v44 }
 0x365   :  { %1015 = vmatprep.subr.bf16.mxu1 %v980_v59  ;;  %v919_v55 = vmul.f32 %v918_v61, %v1625_v32  ;;  %v920_v15 = vmul.f32 %v917_v60, %v1628_v33 }
 0x366   :  { %1016 = vmatpush1.bf16.msra.mxu1 %v979_v48  ;;  %v922_v45 = vpop.permute.xlu1 %921 }
 0x367   :  { %v924_v52 = vpop.permute.xlu0 %923 }
 0x368   :  { %v925_v53 = vsel %vm68_vm8, %v922_v45, %v924_v52  ;;  %v926_v54 = vsel %vm68_vm8, %v924_v52, %v922_v45 }
 0x369   :  { %v927_v17 = vmul.f32 %v926_v54, %v1631_v34  ;;  %v928_v9 = vmul.f32 %v925_v53, %v1634_v36 }
 0x36b   :  { %v977_v49 = vpack.c.bf16 %v927_v17, %v919_v55  ;;  %v978_v46 = vpack.c.bf16 %v928_v9, %v920_v15 }
 0x36d   :  { %1017 = vmatprep.subr.bf16.mxu1 %v978_v46 }
 0x36e   :  { %1018 = vmatpush1.bf16.msra.mxu1 %v977_v49 }
 0x371   :  { %1163 = vmatmul.mubr.msk.bf16.vlgmr.msra.gmra.mxu1 %vm235_vm9, %v987_v47 }
 0x373   :  { %v453_v10 = vpop.permute.xlu1 %452 }
 0x374   :  { %v992_v36 = vpop.permute.xlu0 %991 }
 0x411   :  { %v498_v8 = vpop.f32.mrf.mxu1 }
 0x412   :  { %v499_v32 = vadd.f32 %v498_v8, %v453_v10 }
 0x413   :  { %v500_v19 = vpop.f32.mrf.mxu1 }
 0x414   :  { %v501_v14 = vadd.f32 %v500_v19, %v453_v10  ;;  %v508_v24 = vmul.f32 %v499_v32, %v499_v32 }
 0x415   :  { %v502_v33 = vpop.f32.mrf.mxu1 }
 0x416   :  { %v505_v25 = vadd.f32 %v501_v14, %v499_v32  ;;  %v509_v4 = vmul.f32 %v501_v14, %v501_v14 }
 0x417   :  { %v503_v34 = vpop.f32.mrf.mxu1 }
 0x418   :  { %506 = vadd.xlane.f32.xlu1 %v505_v25  ;;  %v510_v28 = vadd.f32 %v509_v4, %v508_v24 }
 0x431   :  { %v1037_v26 = vpop.f32.mrf.mxu1 }
 0x432   :  { %v1038_v27 = vadd.f32 %v1037_v26, %v992_v36 }
 0x433   :  { %v1039_v29 = vpop.f32.mrf.mxu1 }
 0x434   :  { %v1040_v50 = vadd.f32 %v1039_v29, %v992_v36  ;;  %v1047_v38 = vmul.f32 %v1038_v27, %v1038_v27 }
 0x435   :  { %v1041_v51 = vpop.f32.mrf.mxu1 }
 0x436   :  { %v1044_v56 = vadd.f32 %v1040_v50, %v1038_v27  ;;  %v1048_v40 = vmul.f32 %v1040_v50, %v1040_v50 }
 0x437   :  { %v1042_v18 = vpop.f32.mrf.mxu1 }
 0x438   :  { %1045 = vadd.xlane.f32.xlu0 %v1044_v56  ;;  %v1049_v21 = vadd.f32 %v1048_v40, %v1047_v38 }
 0x43a   :  { %1050 = vadd.xlane.f32.xlu1 %v1049_v21 }
 0x43c   :  { %511 = vadd.xlane.f32.xlu0 %v510_v28 }
 0x4a1   :  { %v507_v3 = vpop.xlane.xlu1 %506 }
 0x4a2   :  { %v513_v63 = vmul.f32 0.00390625, %v507_v3 }
 0x4a4   :  { %v515_v42 = vmul.f32 %v513_v63, %v513_v63 }
 0x4c1   :  { %v1046_v5 = vpop.xlane.xlu0 %1045 }
 0x4c2   :  { %v1052_v13 = vmul.f32 0.00390625, %v1046_v5 }
 0x4c3   :  { %v1051_v35 = vpop.xlane.xlu1 %1050 }
 0x4c4   :  { %v1054_v39 = vmul.f32 %v1052_v13, %v1052_v13  ;;  %v1053_v30 = vmul.f32 0.00390625, %v1051_v35 }
 0x4c5   :  { %v512_v2 = vpop.xlane.xlu0 %511 }
 0x4c6   :  { %v1055_v41 = vsub.f32 %v1053_v30, %v1054_v39  ;;  %v514_v0 = vmul.f32 0.00390625, %v512_v2 }
 0x4c8   :  { %v1057_v1 = vadd.f32 1e-05, %v1055_v41  ;;  %v516_v6 = vsub.f32 %v514_v0, %v515_v42 }
 0x4ca   :  { %1197 = vrsqrt.f32 %v1057_v1  ;;  %v518_v7 = vadd.f32 1e-05, %v516_v6 }
 0x4cc   :  { %1199 = vrsqrt.f32 %v518_v7 }
 0x4d7   :  { %v1198_v16 = vpop.eup %1197 }
 0x4d8   :  { %v1059_v12 = vmul.f32 %v1198_v16, %v1056_v11 }
 0x4d9   :  { %v1200_v20 = vpop.eup %1199 }
 0x4da   :  { %1065 = vperm.xlu1 %1176, %v1059_v12   ;;  %v520_v22 = vmul.f32 %v1200_v20, %v1056_v11  ;;  %v1061_v23 = vmul.f32 %v1059_v12, %v1052_v13 }
 0x4dc   :  { %526 = vperm.xlu0 %1175, %v520_v22   ;;  %v522_v57 = vmul.f32 %v520_v22, %v513_v63  ;;  %v1062_v37 = vsub.f32 %v521_v31, %v1061_v23 }
 0x4de   :  { %v523_v62 = vsub.f32 %v521_v31, %v522_v57 }
 0x4e0   :  { %533 = vperm.xlu1 %1176, %v523_v62   ;;  %1072 = vperm.xlu0 %1175, %v1062_v37  }
 0x555   :  { %v1066_v43 = vpop.permute.xlu1 %1065 }
 0x556   :  { %v1068_v48 = vmul.f32 %v1066_v43, %v1038_v27  ;;  %v1069_v58 = vmul.f32 %v1066_v43, %v1040_v50 }
 0x557   :  { %v527_v44 = vpop.permute.xlu0 %526 }
 0x558   :  { %v529_v59 = vmul.f32 %v527_v44, %v499_v32  ;;  %v530_v60 = vmul.f32 %v527_v44, %v501_v14 }
 0x55b   :  { %v534_v61 = vpop.permute.xlu1 %533  ;;  %v1073_v45 = vpop.permute.xlu0 %1072 }
 0x55c   :  { %v1896_v52 = vadd.f32 %v534_v61, %v529_v59  ;;  %v1898_v53 = vadd.f32 %v534_v61, %v530_v60  ;;  %v1900_v54 = vadd.f32 %v1073_v45, %v1068_v48  ;;  %v1902_v55 = vadd.f32 %v1073_v45, %v1069_v58 }
 0x55e   :  { %v1905_v15 = vmul.f32 0.70710677, %v1896_v52  ;;  %v1908_v17 = vmul.f32 0.70710677, %v1898_v53  ;;  %v1911_v9 = vmul.f32 0.70710677, %v1900_v54 }
 0x55f   :  { %v1914_v49 = vmul.f32 0.70710677, %v1902_v55 }
 0x560   :  { %v542_v46 = vand.u32 2147483647, %v1905_v15  ;;  %v543_v47 = vand.u32 2147483647, %v1908_v17  ;;  %v1081_v8 = vand.u32 2147483647, %v1911_v9 }
 0x561   :  { %v1082_v10 = vand.u32 2147483647, %v1914_v49  ;;  %vm582_vm14 = vcmp.lt.f32.partialorder %v1905_v15, 0.0  ;;  %vm583_vm15 = vcmp.lt.f32.partialorder %v1908_v17, 0.0  ;;  %vm1121_vm0 = vcmp.lt.f32.partialorder %v1911_v9, 0.0  ;;  %v1217_v17 = vld [vmem:[%s1952_s0] sm:$0xff] }
 0x562   :  { %v544_v19 = vmul.f32 0.3275911, %v542_v46  ;;  %v545_v32 = vmul.f32 0.3275911, %v543_v47  ;;  %v1083_v14 = vmul.f32 0.3275911, %v1081_v8 }
 0x563   :  { %v1084_v33 = vmul.f32 0.3275911, %v1082_v10  ;;  %v570_v27 = vsub.f32 0.0, %v542_v46  ;;  %v571_v29 = vsub.f32 0.0, %v543_v47  ;;  %v1109_v51 = vsub.f32 0.0, %v1081_v8 }
 0x564   :  { %v546_v25 = vadd.f32 1.0, %v544_v19  ;;  %v547_v34 = vadd.f32 1.0, %v545_v32  ;;  %v1085_v36 = vadd.f32 1.0, %v1083_v14  ;;  %v1110_v38 = vsub.f32 0.0, %v1082_v10 }
 0x565   :  { %v1086_v26 = vadd.f32 1.0, %v1084_v33  ;;  %v572_v50 = vmul.f32 %v570_v27, %v542_v46  ;;  %v573_v56 = vmul.f32 %v571_v29, %v543_v47  ;;  %v1111_v24 = vmul.f32 %v1109_v51, %v1081_v8 }
 0x566   :  { %1201 = vrcp.f32 %v546_v25  ;;  %v1112_v5 = vmul.f32 %v1110_v38, %v1082_v10  ;;  %vm1122_vm1 = vcmp.lt.f32.partialorder %v1914_v49, 0.0  ;;  %v1078_v9 = vmul.f32 0.5, %v1902_v55  ;;  %v1220_v55 = vld [vmem:[%s1952_s0 + $0x18] sm:$0xff] }
 0x567   :  { %1203 = vrcp.f32 %v547_v34  ;;  %v574_v21 = vmul.f32 1.442695, %v572_v50  ;;  %v576_v3 = vmul.f32 1.442695, %v573_v56  ;;  %v1113_v42 = vmul.f32 1.442695, %v1111_v24 }
 0x568   :  { %1205 = vrcp.f32 %v1085_v36  ;;  %v1115_v1 = vmul.f32 1.442695, %v1112_v5  ;;  %v538_v24 = vmul.f32 0.5, %v1896_v52 }
 0x569   :  { %1207 = vrcp.f32 %v1086_v26 }
 0x56a   :  { %1209 = vpow2.f32 %v574_v21 }
 0x56b   :  { %1211 = vpow2.f32 %v576_v3 }
 0x56c   :  { %1213 = vpow2.f32 %v1113_v42  ;;  %v1077_v42 = vmul.f32 0.5, %v1900_v54 }
 0x56d   :  { %1215 = vpow2.f32 %v1115_v1 }
 0x573   :  { %v1202_v40 = vpop.eup %1201 }
 0x574   :  { %v1204_v4 = vpop.eup %1203  ;;  %v552_v18 = vmul.f32 1.0614054, %v1202_v40 }
 0x575   :  { %v553_v28 = vmul.f32 1.0614054, %v1204_v4  ;;  %v1206_v13 = vpop.eup %1205 }
 0x576   :  { %v554_v63 = vadd.f32 -1.4531521, %v552_v18  ;;  %v1208_v39 = vpop.eup %1207  ;;  %v1091_v2 = vmul.f32 1.0614054, %v1206_v13 }
 0x577   :  { %v555_v35 = vadd.f32 -1.4531521, %v553_v28  ;;  %v1092_v0 = vmul.f32 1.0614054, %v1208_v39  ;;  %v1210_v8 = vpop.eup %1209 }
 0x578   :  { %v556_v30 = vmul.f32 %v1202_v40, %v554_v63  ;;  %v1093_v7 = vadd.f32 -1.4531521, %v1091_v2  ;;  %v1212_v32 = vpop.eup %1211  ;;  %v539_v63 = vmul.f32 0.5, %v1898_v53  ;;  %v1218_v53 = vld [vmem:[%s1952_s0 + $0x8] sm:$0xff] }
 0x579   :  { %v557_v41 = vmul.f32 %v1204_v4, %v555_v35  ;;  %v1094_v16 = vadd.f32 -1.4531521, %v1092_v0  ;;  %v1214_v27 = vpop.eup %1213 }
 0x57a   :  { %v558_v6 = vadd.f32 1.4214138, %v556_v30  ;;  %v1095_v20 = vmul.f32 %v1206_v13, %v1093_v7  ;;  %v1216_v51 = vpop.eup %1215  ;;  %v1219_v7 = vld [vmem:[%s1952_s0 + $0x10] sm:$0xff] }
 0x57b   :  { %v559_v11 = vadd.f32 1.4214138, %v557_v41  ;;  %v1096_v23 = vmul.f32 %v1208_v39, %v1094_v16 }
 0x57c   :  { %v560_v12 = vmul.f32 %v1202_v40, %v558_v6  ;;  %v1097_v57 = vadd.f32 1.4214138, %v1095_v20 }
 0x57d   :  { %v561_v22 = vmul.f32 %v1204_v4, %v559_v11  ;;  %v1098_v37 = vadd.f32 1.4214138, %v1096_v23 }
 0x57e   :  { %v562_v31 = vadd.f32 -0.28449672, %v560_v12  ;;  %v1099_v44 = vmul.f32 %v1206_v13, %v1097_v57 }
 0x57f   :  { %v563_v62 = vadd.f32 -0.28449672, %v561_v22  ;;  %v1100_v58 = vmul.f32 %v1208_v39, %v1098_v37 }
 0x580   :  { %v564_v43 = vmul.f32 %v1202_v40, %v562_v31  ;;  %v1101_v60 = vadd.f32 -0.28449672, %v1099_v44 }
 0x581   :  { %v565_v48 = vmul.f32 %v1204_v4, %v563_v62  ;;  %v1102_v45 = vadd.f32 -0.28449672, %v1100_v58 }
 0x582   :  { %v566_v59 = vadd.f32 0.2548296, %v564_v43  ;;  %v1103_v47 = vmul.f32 %v1206_v13, %v1101_v60 }
 0x583   :  { %v567_v61 = vadd.f32 0.2548296, %v565_v48  ;;  %v1104_v19 = vmul.f32 %v1208_v39, %v1102_v45 }
 0x584   :  { %v568_v46 = vmul.f32 %v1202_v40, %v566_v59  ;;  %v1105_v33 = vadd.f32 0.2548296, %v1103_v47 }
 0x585   :  { %v569_v10 = vmul.f32 %v1204_v4, %v567_v61  ;;  %v1106_v34 = vadd.f32 0.2548296, %v1104_v19 }
 0x586   :  { %v578_v14 = vmul.f32 %v1210_v8, %v568_v46  ;;  %v1107_v26 = vmul.f32 %v1206_v13, %v1105_v33 }
 0x587   :  { %v579_v25 = vmul.f32 %v1212_v32, %v569_v10  ;;  %v1108_v50 = vmul.f32 %v1208_v39, %v1106_v34 }
 0x588   :  { %v580_v36 = vsub.f32 1.0, %v578_v14  ;;  %v1117_v38 = vmul.f32 %v1214_v27, %v1107_v26 }
 0x589   :  { %v581_v29 = vsub.f32 1.0, %v579_v25  ;;  %v1118_v18 = vmul.f32 %v1216_v51, %v1108_v50 }
 0x58a   :  { %v584_v56 = vsub.f32 0.0, %v580_v36  ;;  %v1119_v21 = vsub.f32 1.0, %v1117_v38 }
 0x58b   :  { %v585_v40 = vsub.f32 0.0, %v581_v29  ;;  %v1120_v5 = vsub.f32 1.0, %v1118_v18 }
 0x58c   :  { %v586_v4 = vsel %vm582_vm14, %v584_v56, %v580_v36  ;;  %v1123_v35 = vsub.f32 0.0, %v1119_v21 }
 0x58d   :  { %v587_v28 = vsel %vm583_vm15, %v585_v40, %v581_v29  ;;  %v588_v3 = vadd.f32 1.0, %v586_v4  ;;  %v1124_v30 = vsub.f32 0.0, %v1120_v5 }
 0x58e   :  { %v589_v13 = vadd.f32 1.0, %v587_v28  ;;  %v1125_v2 = vsel %vm1121_vm0, %v1123_v35, %v1119_v21 }
 0x58f   :  { %v590_v39 = vmul.f32 %v588_v3, %v538_v24  ;;  %v1126_v41 = vsel %vm1122_vm1, %v1124_v30, %v1120_v5  ;;  %v1127_v0 = vadd.f32 1.0, %v1125_v2 }
 0x590   :  { %v591_v15 = vmul.f32 %v589_v13, %v539_v63  ;;  %v1128_v6 = vadd.f32 1.0, %v1126_v41 }
 0x591   :  { %v592_v52 = vadd.f32 %v1217_v17, %v590_v39  ;;  %v1129_v49 = vmul.f32 %v1127_v0, %v1077_v42 }
 0x592   :  { %v593_v1 = vadd.f32 %v1218_v53, %v591_v15  ;;  %v1130_v54 = vmul.f32 %v1128_v6, %v1078_v9 }
 0x593   :  { %594 = vst [vmem:[%s1963_s11] sm:$0xff] %v592_v52  ;;  %v1131_v11 = vadd.f32 %v1219_v7, %v1129_v49 }
 0x594   :  { %595 = vst [vmem:[%s1963_s11 + $0x8] sm:$0xff] %v593_v1  ;;  %v1132_v16 = vadd.f32 %v1220_v55, %v1130_v54 }
 0x595   :  { %1164 = vst [vmem:[%s1963_s11 + $0x10] sm:$0xff] %v1131_v11 }
 0x596   :  { %1165 = vst [vmem:[%s1963_s11 + $0x18] sm:$0xff] %v1132_v16 }

</bundles_post_ra>
